<compile_context>
chip_gen: v5e
topology: v5e:2x2
jax: 0.10.0
libtpu: 0.0.40
codegen_flags: <defaults>
</compile_context>

<pallas_src>
import functools
import math

import jax
import jax.numpy as jnp
from jax.experimental import pallas as pl
from jax.experimental.pallas import tpu as pltpu


def _upsample_conv_kernel(x_ref, w_ref, b_ref, o_ref, *, th, W, Cout):
    """One (batch, row-tile) step of fused nearest-2x-upsample + 3x3 conv.

    x_ref : (1, H+2, W+2, Cin)     bf16  zero-padded input image (1x res)
    w_ref : (2, 2, 3*Cin, 2*Cout)  bf16  folded weights [row phase a, row tap p]
    b_ref : (1, 2*Cout)            f32   bias tiled over the two column phases
    o_ref : (1, th, 2, W, 2*Cout)  bf16  phase-interleaved output tile
    """
    ti = pl.program_id(1)
    row0 = pl.multiple_of(ti * th, th)
    s = x_ref[0, pl.ds(row0, th + 2), :, :]                  # (th+2, W+2, Cin)

    # One (th+2, W, 3*Cin) slab holding the 3 column shifts (c = 0, 1, 2),
    # flattened so the row-tap windows below are cheap sublane-aligned slices.
    cat = jnp.concatenate([s[:, 0:W, :], s[:, 1:W + 1, :], s[:, 2:W + 2, :]],
                          axis=-1)
    cat = cat.reshape((th + 2) * W, -1)                      # ((th+2)*W, 3*Cin)

    bias = b_ref[...]                                        # (1, 2*Cout) f32
    for a in range(2):                                       # output row phase
        # Row tap p reads original rows shifted by (a + p); all 3 column taps
        # and both column phases are fused into one (3*Cin, 2*Cout) matmul.
        acc = jnp.dot(cat[a * W:(a + th) * W], w_ref[a, 0],
                      preferred_element_type=jnp.float32)
        acc = acc + jnp.dot(cat[(a + 1) * W:(a + 1 + th) * W], w_ref[a, 1],
                            preferred_element_type=jnp.float32)
        acc = acc + bias
        # Lane-dense (2*Cout-wide) store of row phase `a`.
        o_ref[0, :, a, :, :] = acc.reshape(th, W, 2 * Cout).astype(o_ref.dtype)


def upsample_forward_nhwc(x_nhwc, weight, bias, *, row_tile=32,
                          out_dtype=jnp.bfloat16):
    """NHWC-native fused nearest-2x-upsample + Conv2d(3x3, padding=1).

    x_nhwc: (B, H, W, Cin).  weight: (Cout, Cin, 3, 3) OIHW.  bias: (Cout,).
    Returns (B, 2H, 2W, Cout) in `out_dtype` (default bf16).
    """
    B, H, W, Cin = x_nhwc.shape
    Cout = weight.shape[0]
    assert weight.shape == (Cout, Cin, 3, 3)
    assert bias.shape == (Cout,)

    # Largest row tile that divides H (ragged tails handled by shrinking th).
    # Pick row_tile per generation / VMEM budget for large images.
    th = max(1, min(row_tile, H))
    while H % th:
        th -= 1
    nt = H // th

    # bf16 activations + 1-element zero halo at 1x resolution (one cheap fused
    # XLA pass; the expensive overlapping-slab stack of the old version is gone).
    x_pad = jnp.pad(x_nhwc.astype(jnp.bfloat16),
                    ((0, 0), (1, 1), (1, 1), (0, 0)))        # (B, H+2, W+2, Cin)

    # Fold the 3x3 kernel into per-(row phase a, row tap p) matrices of shape
    # (3 column taps * Cin, 2 column phases * Cout).  Phase 0 reads original
    # rows/cols {i-1, i} with taps {W0 | W1+W2}; phase 1 reads {i, i+1} with
    # taps {W0+W1 | W2}.
    F = jnp.array([[[1., 0., 0.], [0., 1., 1.]],
                   [[1., 1., 0.], [0., 0., 1.]]], jnp.float32)    # (phase, tap, k)
    wt = jnp.transpose(weight, (2, 3, 1, 0)).astype(jnp.float32)  # (kh, kw, Ci, Co)
    kf = jnp.einsum("apk,bql,klio->apbqio", F, F, wt)             # (a,p,b,q,Ci,Co)
    wbig = jnp.zeros((2, 2, 3, Cin, 2, Cout), jnp.float32)
    for a in range(2):
        for p in range(2):
            for b in range(2):
                for q in range(2):
                    # column tap q of column phase b sits at column offset b+q
                    wbig = wbig.at[a, p, b + q, :, b, :].set(kf[a, p, b, q])
    wmat = wbig.reshape(2, 2, 3 * Cin, 2 * Cout).astype(jnp.bfloat16)
    bias2 = jnp.concatenate([bias, bias]).reshape(1, 2 * Cout).astype(jnp.float32)

    kern = functools.partial(_upsample_conv_kernel, th=th, W=W, Cout=Cout)
    out = pl.pallas_call(
        kern,
        grid=(B, nt),
        in_specs=[
            # Whole padded image per batch element; constant in ti, so Pallas
            # keeps it VMEM-resident across the row tiles of one image.
            pl.BlockSpec((1, H + 2, W + 2, Cin), lambda bi, ti: (bi, 0, 0, 0)),
            # Grid-invariant folded weights / bias (VMEM resident).  At
            # production channel counts on v7x, consider single-buffering them
            # to save VMEM headroom.
            pl.BlockSpec((2, 2, 3 * Cin, 2 * Cout), lambda bi, ti: (0, 0, 0, 0)),
            pl.BlockSpec((1, 2 * Cout), lambda bi, ti: (0, 0)),
        ],
        out_specs=pl.BlockSpec((1, th, 2, W, 2 * Cout),
                               lambda bi, ti: (bi, ti, 0, 0, 0)),
        out_shape=jax.ShapeDtypeStruct((B, H, 2, W, 2 * Cout), out_dtype),
        compiler_params=pltpu.CompilerParams(
            dimension_semantics=("parallel", "parallel")),
    )(x_pad, wmat, bias2)

    # Phase interleave is a pure (free) reshape: (B,H,2,W,2C) -> (B,2H,2W,C).
    return out.reshape(B, 2 * H, 2 * W, Cout)


def upsample_forward(x, weight, bias, **kwargs):
    """PyTorch-interface wrapper: NCHW in, NCHW out (transposes only at the
    edges; callers that are NHWC end-to-end should use upsample_forward_nhwc)."""
    y = upsample_forward_nhwc(jnp.transpose(x, (0, 2, 3, 1)), weight, bias,
                              **kwargs)
    return jnp.transpose(y, (0, 3, 1, 2))


if __name__ == "__main__":
    B, C, H, W = 2, 128, 16, 16
    key = jax.random.PRNGKey(0)
    kx, kw, kb = jax.random.split(key, 3)
    x = jax.random.normal(kx, (B, C, H, W), jnp.float32)
    w = jax.random.normal(kw, (C, C, 3, 3), jnp.float32) * (1.0 / math.sqrt(9 * C))
    b = 0.1 * jax.random.normal(kb, (C,), jnp.float32)

    fwd = jax.jit(upsample_forward)
    y = fwd(x, w, b)
    jax.block_until_ready(y)
    assert y.shape == (B, C, 2 * H, 2 * W)
    assert y.dtype == jnp.bfloat16

    # Reference with matching compute precision (bf16 inputs/weights, f32
    # accumulation) and exact PyTorch semantics: nearest 2x + 3x3 conv, pad 1.
    x_up = jnp.repeat(jnp.repeat(x, 2, axis=2), 2, axis=3)
    ref = jax.lax.conv_general_dilated(
        x_up.astype(jnp.bfloat16), w.astype(jnp.bfloat16),
        window_strides=(1, 1), padding=((1, 1), (1, 1)),
        dimension_numbers=("NCHW", "OIHW", "NCHW"),
        preferred_element_type=jnp.float32) + b.reshape(1, C, 1, 1)
    err = float(jnp.max(jnp.abs(y.astype(jnp.float32) - ref)))
    assert err < 7e-2, f"max abs err vs reference: {err}"
    print("KERNEL_OK")
</pallas_src>

<mosaic_0001>
module attributes {stable_mosaic.version = 11 : i64} {
  func.func @_upsample_conv_kernel(%arg0: i32, %arg1: i32, %arg2: memref<1x18x18x128xbf16, #tpu.memory_space<vmem>>, %arg3: memref<2x2x384x256xbf16, #tpu.memory_space<vmem>>, %arg4: memref<1x256xf32, #tpu.memory_space<vmem>>, %arg5: memref<1x16x2x16x256xbf16, #tpu.memory_space<vmem>>) attributes {dimension_semantics = [#tpu.dimension_semantics<parallel>, #tpu.dimension_semantics<parallel>], iteration_bounds = array<i64: 2, 1>, scalar_prefetch = 0 : i64, scratch_operands = 0 : i64, tpu.core_type = #tpu.core_type<tc>, window_params = [{transform_indices = @transform_0, window_bounds = array<i64: 1, 18, 18, 128>}, {pipeline_mode = #tpu.pipeline_mode<synchronous>, transform_indices = @transform_1, window_bounds = array<i64: 2, 2, 384, 256>}, {pipeline_mode = #tpu.pipeline_mode<synchronous>, transform_indices = @transform_2, window_bounds = array<i64: 1, 256>}, {transform_indices = @transform_3, window_bounds = array<i64: 1, 16, 2, 16, 256>}]} {
    %c16_i32 = arith.constant 16 : i32
    %0 = arith.muli %arg1, %c16_i32 : i32
    %1 = tpu.assume_multiple %0, 16 : i32
    %c0 = arith.constant 0 : index
    %2 = arith.index_cast %1 : i32 to index
    %c0_0 = arith.constant 0 : index
    %c0_1 = arith.constant 0 : index
    %3 = vector.load %arg2[%c0, %2, %c0_0, %c0_1] : memref<1x18x18x128xbf16, #tpu.memory_space<vmem>>, vector<1x18x18x128xbf16>
    %4 = vector.shape_cast %3 : vector<1x18x18x128xbf16> to vector<18x18x128xbf16>
    %5 = vector.extract_strided_slice %4 {offsets = [0, 0, 0], sizes = [18, 16, 128], strides = [1, 1, 1]} : vector<18x18x128xbf16> to vector<18x16x128xbf16>
    %6 = vector.extract_strided_slice %4 {offsets = [0, 1, 0], sizes = [18, 16, 128], strides = [1, 1, 1]} : vector<18x18x128xbf16> to vector<18x16x128xbf16>
    %7 = vector.extract_strided_slice %4 {offsets = [0, 2, 0], sizes = [18, 16, 128], strides = [1, 1, 1]} : vector<18x18x128xbf16> to vector<18x16x128xbf16>
    %8 = tpu.concatenate %5, %6, %7 in 2 : vector<18x16x128xbf16>, vector<18x16x128xbf16>, vector<18x16x128xbf16> -> vector<18x16x384xbf16>
    %9 = vector.shape_cast %8 : vector<18x16x384xbf16> to vector<288x384xbf16>
    %c0_2 = arith.constant 0 : index
    %c0_3 = arith.constant 0 : index
    %10 = vector.load %arg4[%c0_2, %c0_3] : memref<1x256xf32, #tpu.memory_space<vmem>>, vector<1x256xf32>
    %11 = vector.extract_strided_slice %9 {offsets = [0, 0], sizes = [256, 384], strides = [1, 1]} : vector<288x384xbf16> to vector<256x384xbf16>
    %c0_4 = arith.constant 0 : index
    %c0_5 = arith.constant 0 : index
    %c0_6 = arith.constant 0 : index
    %c0_7 = arith.constant 0 : index
    %12 = vector.load %arg3[%c0_4, %c0_5, %c0_6, %c0_7] : memref<2x2x384x256xbf16, #tpu.memory_space<vmem>>, vector<1x1x384x256xbf16>
    %13 = vector.shape_cast %12 : vector<1x1x384x256xbf16> to vector<384x256xbf16>
    %cst = arith.constant dense<0.000000e+00> : vector<256x256xf32>
    %14 = tpu.matmul %11, %13, %cst {dimension_numbers = #tpu.dot_dimension_numbers<[1], [0], [0], [1], [0, 0, 1, 1], [], []>} : vector<256x384xbf16>, vector<384x256xbf16>, vector<256x256xf32> -> vector<256x256xf32>
    %15 = vector.extract_strided_slice %9 {offsets = [16, 0], sizes = [256, 384], strides = [1, 1]} : vector<288x384xbf16> to vector<256x384xbf16>
    %c0_8 = arith.constant 0 : index
    %c1 = arith.constant 1 : index
    %c0_9 = arith.constant 0 : index
    %c0_10 = arith.constant 0 : index
    %16 = vector.load %arg3[%c0_8, %c1, %c0_9, %c0_10] : memref<2x2x384x256xbf16, #tpu.memory_space<vmem>>, vector<1x1x384x256xbf16>
    %17 = vector.shape_cast %16 : vector<1x1x384x256xbf16> to vector<384x256xbf16>
    %cst_11 = arith.constant dense<0.000000e+00> : vector<256x256xf32>
    %18 = tpu.matmul %15, %17, %cst_11 {dimension_numbers = #tpu.dot_dimension_numbers<[1], [0], [0], [1], [0, 0, 1, 1], [], []>} : vector<256x384xbf16>, vector<384x256xbf16>, vector<256x256xf32> -> vector<256x256xf32>
    %19 = arith.addf %14, %18 : vector<256x256xf32>
    %20 = vector.broadcast %10 : vector<1x256xf32> to vector<256x256xf32>
    %21 = arith.addf %19, %20 : vector<256x256xf32>
    %22 = vector.shape_cast %21 : vector<256x256xf32> to vector<16x16x256xf32>
    %23 = arith.truncf %22 : vector<16x16x256xf32> to vector<16x16x256xbf16>
    %c0_12 = arith.constant 0 : index
    %c0_13 = arith.constant 0 : index
    %c0_14 = arith.constant 0 : index
    %c0_15 = arith.constant 0 : index
    %c0_16 = arith.constant 0 : index
    %24 = vector.load %arg5[%c0_12, %c0_13, %c0_14, %c0_15, %c0_16] : memref<1x16x2x16x256xbf16, #tpu.memory_space<vmem>>, vector<1x16x1x16x256xbf16>
    %25 = vector.shape_cast %24 : vector<1x16x1x16x256xbf16> to vector<16x16x256xbf16>
    %26 = vector.shape_cast %23 : vector<16x16x256xbf16> to vector<1x16x1x16x256xbf16>
    tpu.vector_store %arg5[%c0_12, %c0_13, %c0_14, %c0_15, %c0_16], %26 {strides = array<i32>} : memref<1x16x2x16x256xbf16, #tpu.memory_space<vmem>>, vector<1x16x1x16x256xbf16>,
    %27 = vector.extract_strided_slice %9 {offsets = [16, 0], sizes = [256, 384], strides = [1, 1]} : vector<288x384xbf16> to vector<256x384xbf16>
    %c1_17 = arith.constant 1 : index
    %c0_18 = arith.constant 0 : index
    %c0_19 = arith.constant 0 : index
    %c0_20 = arith.constant 0 : index
    %28 = vector.load %arg3[%c1_17, %c0_18, %c0_19, %c0_20] : memref<2x2x384x256xbf16, #tpu.memory_space<vmem>>, vector<1x1x384x256xbf16>
    %29 = vector.shape_cast %28 : vector<1x1x384x256xbf16> to vector<384x256xbf16>
    %cst_21 = arith.constant dense<0.000000e+00> : vector<256x256xf32>
    %30 = tpu.matmul %27, %29, %cst_21 {dimension_numbers = #tpu.dot_dimension_numbers<[1], [0], [0], [1], [0, 0, 1, 1], [], []>} : vector<256x384xbf16>, vector<384x256xbf16>, vector<256x256xf32> -> vector<256x256xf32>
    %31 = vector.extract_strided_slice %9 {offsets = [32, 0], sizes = [256, 384], strides = [1, 1]} : vector<288x384xbf16> to vector<256x384xbf16>
    %c1_22 = arith.constant 1 : index
    %c1_23 = arith.constant 1 : index
    %c0_24 = arith.constant 0 : index
    %c0_25 = arith.constant 0 : index
    %32 = vector.load %arg3[%c1_22, %c1_23, %c0_24, %c0_25] : memref<2x2x384x256xbf16, #tpu.memory_space<vmem>>, vector<1x1x384x256xbf16>
    %33 = vector.shape_cast %32 : vector<1x1x384x256xbf16> to vector<384x256xbf16>
    %cst_26 = arith.constant dense<0.000000e+00> : vector<256x256xf32>
    %34 = tpu.matmul %31, %33, %cst_26 {dimension_numbers = #tpu.dot_dimension_numbers<[1], [0], [0], [1], [0, 0, 1, 1], [], []>} : vector<256x384xbf16>, vector<384x256xbf16>, vector<256x256xf32> -> vector<256x256xf32>
    %35 = arith.addf %30, %34 : vector<256x256xf32>
    %36 = vector.broadcast %10 : vector<1x256xf32> to vector<256x256xf32>
    %37 = arith.addf %35, %36 : vector<256x256xf32>
    %38 = vector.shape_cast %37 : vector<256x256xf32> to vector<16x16x256xf32>
    %39 = arith.truncf %38 : vector<16x16x256xf32> to vector<16x16x256xbf16>
    %c0_27 = arith.constant 0 : index
    %c0_28 = arith.constant 0 : index
    %c1_29 = arith.constant 1 : index
    %c0_30 = arith.constant 0 : index
    %c0_31 = arith.constant 0 : index
    %40 = vector.load %arg5[%c0_27, %c0_28, %c1_29, %c0_30, %c0_31] : memref<1x16x2x16x256xbf16, #tpu.memory_space<vmem>>, vector<1x16x1x16x256xbf16>
    %41 = vector.shape_cast %40 : vector<1x16x1x16x256xbf16> to vector<16x16x256xbf16>
    %42 = vector.shape_cast %39 : vector<16x16x256xbf16> to vector<1x16x1x16x256xbf16>
    tpu.vector_store %arg5[%c0_27, %c0_28, %c1_29, %c0_30, %c0_31], %42 {strides = array<i32>} : memref<1x16x2x16x256xbf16, #tpu.memory_space<vmem>>, vector<1x16x1x16x256xbf16>,
    return
  }
  func.func @transform_0(%arg0: i32, %arg1: i32) -> (i32, i32, i32, i32) {
    %c0_i32 = arith.constant 0 : i32
    %c0_i32_0 = arith.constant 0 : i32
    %c0_i32_1 = arith.constant 0 : i32
    %c0_i32_2 = arith.constant 0 : i32
    return %arg0, %c0_i32, %c0_i32_0, %c0_i32_1 : i32, i32, i32, i32
  }
  func.func @transform_1(%arg0: i32, %arg1: i32) -> (i32, i32, i32, i32) {
    %c0_i32 = arith.constant 0 : i32
    %c0_i32_0 = arith.constant 0 : i32
    %c0_i32_1 = arith.constant 0 : i32
    %c0_i32_2 = arith.constant 0 : i32
    %c0_i32_3 = arith.constant 0 : i32
    return %c0_i32, %c0_i32_0, %c0_i32_1, %c0_i32_2 : i32, i32, i32, i32
  }
  func.func @transform_2(%arg0: i32, %arg1: i32) -> (i32, i32) {
    %c0_i32 = arith.constant 0 : i32
    %c0_i32_0 = arith.constant 0 : i32
    %c0_i32_1 = arith.constant 0 : i32
    return %c0_i32, %c0_i32_0 : i32, i32
  }
  func.func @transform_3(%arg0: i32, %arg1: i32) -> (i32, i32, i32, i32, i32) {
    %c0_i32 = arith.constant 0 : i32
    %c0_i32_0 = arith.constant 0 : i32
    %c0_i32_1 = arith.constant 0 : i32
    %c0_i32_2 = arith.constant 0 : i32
    return %arg0, %arg1, %c0_i32, %c0_i32_0, %c0_i32_1 : i32, i32, i32, i32, i32
  }
}

</mosaic_0001>

<bundles_post_ra>
// kernel: upsample_forward.1
= control target key start
LH: loop header
LB: loop body
LE: loop exit
PB: predicated region body
PF: predicated region fallthrough
CT: control target
= control target key end

     0   :  { %s5717_s12 = smov 0   ;;  %s5719_s13 = smov 0   ;;  %s8486_s0 = inlined_call_operand.vmem [shape: bf16[2,18,18,128], index: 0, kind: input, shape index: {}]   ;;  %s8487_s1 = inlined_call_operand.vmem [shape: bf16[2,2,384,256], index: 1, kind: input, shape index: {}]   ;;  %s8488_s2 = inlined_call_operand.vmem [shape: f32[1,256], index: 2, kind: input, shape index: {}]   ;;  %s8489_s3 = inlined_call_operand.vmem [shape: bf16[2,16,2,16,256], index: 3, kind: output, shape index: {}]  }
   0x1   :  { %s5721_s14 = smov 0  }
   0x2 LB: > { %s25_s15 = sadd.s32 1, %s5691_s13  ;;  %p4371_p0 = scmp.ge.s32.totalorder %s5695_s14, 1  ;;  %s5695_s14 = sphi %s5721_s14, %s13_s14   ;;  %s5691_s13 = sphi %s5719_s13, %s8961_s13   ;;  %s5687_s12 = sphi %s5717_s12, %s8960_s12  }
   0x3   : > { %p27_p1 = scmp.ge.s32.totalorder %s25_s15, 2  ;;  %p151_p2 = scmp.lt.s32.totalorder %s5695_s14, 3 }
   0x5   : > { %s8963_s15 = smov (%p27_p1, %s25_s15), 0  ;;  %p152_p3 = pnand %p4371_p0, %p151_p2 }
   0x7   : > { %155 = sbr.rel (%p152_p3) target bundleno = 1719 (0x6b7), region = 32 }
   0xc   : > { %v4553_v0 = vld [vmem:[%s8487_s1 + $0x1f0] sm:$0xf]  ;;  %v5475_v1 = vld [vmem:[%s8487_s1 + $0x1f4] sm:$0xf0]  ;;  %v5474_v9 = vld [vmem:[%s8487_s1 + $0x1f4] sm:$0xf] }
   0xd   : > { %v4617_v2 = vld [vmem:[%s8487_s1 + $0x270] sm:$0xf]  ;;  %v4554_v3 = vor.u32 %v5475_v1, %v4553_v0  ;;  %v5491_v4 = vld [vmem:[%s8487_s1 + $0x274] sm:$0xf0]  ;;  %v4555_v10 = vld [vmem:[%s8487_s1 + $0x1f8] sm:$0xf0] }
   0xe   : > { %v4681_v5 = vld [vmem:[%s8487_s1 + $0x2f0] sm:$0xf]  ;;  %v5507_v6 = vld [vmem:[%s8487_s1 + $0x2f4] sm:$0xf0]  ;;  %v4618_v7 = vor.u32 %v5491_v4, %v4617_v2  ;;  %v4545_v11 = vld [vmem:[%s8487_s1 + $0x1e0] sm:$0xf]  ;;  %v4558_v12 = vor.u32 %v5474_v9, %v4555_v10 }
   0xf   : > { %v4682_v8 = vor.u32 %v5507_v6, %v4681_v5  ;;  %1062 = vmatpush.bf16.msra.mxu0 %v4554_v3  ;;  %v5473_v13 = vld [vmem:[%s8487_s1 + $0x1e4] sm:$0xf0]  ;;  %v4609_v14 = vld [vmem:[%s8487_s1 + $0x260] sm:$0xf]  ;;  %v5472_v20 = vld [vmem:[%s8487_s1 + $0x1e4] sm:$0xf] }
  0x10   : > { %v5489_v15 = vld [vmem:[%s8487_s1 + $0x264] sm:$0xf0]  ;;  %1151 = vmatpush.bf16.msra.mxu1 %v4618_v7  ;;  %v4546_v16 = vor.u32 %v5473_v13, %v4545_v11  ;;  %v4673_v18 = vld [vmem:[%s8487_s1 + $0x2e0] sm:$0xf]  ;;  %1329 = vmatpush.bf16.msra.mxu3 %v4558_v12  ;;  %v4547_v22 = vld [vmem:[%s8487_s1 + $0x1e8] sm:$0xf0] }
  0x11   : > { %1240 = vmatpush.bf16.msra.mxu2 %v4682_v8  ;;  %v4610_v17 = vor.u32 %v5489_v15, %v4609_v14  ;;  %v5505_v19 = vld [vmem:[%s8487_s1 + $0x2e4] sm:$0xf0]  ;;  %v4537_v23 = vld [vmem:[%s8487_s1 + $0x1d0] sm:$0xf]  ;;  %v5471_v24 = vld [vmem:[%s8487_s1 + $0x1d4] sm:$0xf0]  ;;  %v4550_v25 = vor.u32 %v5472_v20, %v4547_v22 }
  0x12   : > { %v4674_v21 = vor.u32 %v5505_v19, %v4673_v18  ;;  %v4601_v26 = vld [vmem:[%s8487_s1 + $0x250] sm:$0xf]  ;;  %v5487_v27 = vld [vmem:[%s8487_s1 + $0x254] sm:$0xf0]  ;;  %v4538_v29 = vor.u32 %v5471_v24, %v4537_v23  ;;  %v5470_v31 = vld [vmem:[%s8487_s1 + $0x1d4] sm:$0xf] }
  0x13   : > { %v4665_v28 = vld [vmem:[%s8487_s1 + $0x2d0] sm:$0xf]  ;;  %1063 = vmatpush.bf16.msra.mxu0 %v4546_v16  ;;  %v5503_v30 = vld [vmem:[%s8487_s1 + $0x2d4] sm:$0xf0]  ;;  %v4539_v32 = vld [vmem:[%s8487_s1 + $0x1d8] sm:$0xf0]  ;;  %v4602_v33 = vor.u32 %v5487_v27, %v4601_v26 }
  0x14   : > { %1152 = vmatpush.bf16.msra.mxu1 %v4610_v17  ;;  %v4666_v34 = vor.u32 %v5503_v30, %v4665_v28  ;;  %v4529_v35 = vld [vmem:[%s8487_s1 + $0x1c0] sm:$0xf]  ;;  %v5469_v36 = vld [vmem:[%s8487_s1 + $0x1c4] sm:$0xf0]  ;;  %1330 = vmatpush.bf16.msra.mxu3 %v4550_v25  ;;  %v4542_v38 = vor.u32 %v5470_v31, %v4539_v32  ;;  %v5468_v42 = vld [vmem:[%s8487_s1 + $0x1c4] sm:$0xf] }
  0x15   : > { %1241 = vmatpush.bf16.msra.mxu2 %v4674_v21  ;;  %v4593_v37 = vld [vmem:[%s8487_s1 + $0x240] sm:$0xf]  ;;  %v5485_v39 = vld [vmem:[%s8487_s1 + $0x244] sm:$0xf0]  ;;  %v4531_v43 = vld [vmem:[%s8487_s1 + $0x1c8] sm:$0xf0]  ;;  %v4530_v44 = vor.u32 %v5469_v36, %v4529_v35 }
  0x16   : > { %v4657_v40 = vld [vmem:[%s8487_s1 + $0x2c0] sm:$0xf]  ;;  %v5501_v41 = vld [vmem:[%s8487_s1 + $0x2c4] sm:$0xf0]  ;;  %v4594_v45 = vor.u32 %v5485_v39, %v4593_v37  ;;  %v4521_v47 = vld [vmem:[%s8487_s1 + $0x1b0] sm:$0xf]  ;;  %v4534_v50 = vor.u32 %v5468_v42, %v4531_v43 }
  0x17   : > { %1064 = vmatpush.bf16.msra.mxu0 %v4538_v29  ;;  %v4658_v46 = vor.u32 %v5501_v41, %v4657_v40  ;;  %v5467_v48 = vld [vmem:[%s8487_s1 + $0x1b4] sm:$0xf0]  ;;  %v4585_v49 = vld [vmem:[%s8487_s1 + $0x230] sm:$0xf]  ;;  %v5466_v54 = vld [vmem:[%s8487_s1 + $0x1b4] sm:$0xf] }
  0x18   : > { %1153 = vmatpush.bf16.msra.mxu1 %v4602_v33  ;;  %1331 = vmatpush.bf16.msra.mxu3 %v4542_v38  ;;  %v5483_v51 = vld [vmem:[%s8487_s1 + $0x234] sm:$0xf0]  ;;  %v4649_v52 = vld [vmem:[%s8487_s1 + $0x2b0] sm:$0xf]  ;;  %v4523_v55 = vld [vmem:[%s8487_s1 + $0x1b8] sm:$0xf0]  ;;  %v4522_v56 = vor.u32 %v5467_v48, %v4521_v47 }
  0x19   : > { %1242 = vmatpush.bf16.msra.mxu2 %v4666_v34  ;;  %v5499_v53 = vld [vmem:[%s8487_s1 + $0x2b4] sm:$0xf0]  ;;  %v4586_v57 = vor.u32 %v5483_v51, %v4585_v49  ;;  %v4513_v59 = vld [vmem:[%s8487_s1 + $0x1a0] sm:$0xf]  ;;  %v5465_v60 = vld [vmem:[%s8487_s1 + $0x1a4] sm:$0xf0]  ;;  %v4526_v62 = vor.u32 %v5466_v54, %v4523_v55 }
  0x1a   : > { %v4650_v58 = vor.u32 %v5499_v53, %v4649_v52  ;;  %v4577_v61 = vld [vmem:[%s8487_s1 + $0x220] sm:$0xf]  ;;  %v5481_v63 = vld [vmem:[%s8487_s1 + $0x224] sm:$0xf0]  ;;  %v5464_v2 = vld [vmem:[%s8487_s1 + $0x1a4] sm:$0xf]  ;;  %v4514_v4 = vor.u32 %v5465_v60, %v4513_v59 }
  0x1b   : > { %1065 = vmatpush.bf16.msra.mxu0 %v4530_v44  ;;  %v4641_v0 = vld [vmem:[%s8487_s1 + $0x2a0] sm:$0xf]  ;;  %v5497_v1 = vld [vmem:[%s8487_s1 + $0x2a4] sm:$0xf0]  ;;  %v4515_v3 = vld [vmem:[%s8487_s1 + $0x1a8] sm:$0xf0]  ;;  %v4578_v7 = vor.u32 %v5481_v63, %v4577_v61 }
  0x1c   : > { %1154 = vmatpush.bf16.msra.mxu1 %v4594_v45  ;;  %1332 = vmatpush.bf16.msra.mxu3 %v4534_v50  ;;  %v4505_v5 = vld [vmem:[%s8487_s1 + $0x190] sm:$0xf]  ;;  %v5463_v6 = vld [vmem:[%s8487_s1 + $0x194] sm:$0xf0]  ;;  %v4642_v8 = vor.u32 %v5497_v1, %v4641_v0  ;;  %v4518_v12 = vor.u32 %v5464_v2, %v4515_v3  ;;  %v5462_v14 = vld [vmem:[%s8487_s1 + $0x194] sm:$0xf] }
  0x1d   : > { %1243 = vmatpush.bf16.msra.mxu2 %v4658_v46  ;;  %v4569_v9 = vld [vmem:[%s8487_s1 + $0x210] sm:$0xf]  ;;  %v5479_v10 = vld [vmem:[%s8487_s1 + $0x214] sm:$0xf0]  ;;  %p180_p4 = scmp.lt.s32.totalorder %s5687_s12, 1  ;;  %v4506_v18 = vor.u32 %v5463_v6, %v4505_v5  ;;  %vm651_vm0 = vcmask 1046528  }
  0x1e   : > { %v4633_v11 = vld [vmem:[%s8487_s1 + $0x290] sm:$0xf]  ;;  %v5495_v13 = vld [vmem:[%s8487_s1 + $0x294] sm:$0xf0]  ;;  %v4507_v15 = vld [vmem:[%s8487_s1 + $0x198] sm:$0xf0]  ;;  %v4570_v21 = vor.u32 %v5479_v10, %v4569_v9 }
  0x1f   : > { %1066 = vmatpush.bf16.msra.mxu0 %v4522_v56  ;;  %v4497_v16 = vld [vmem:[%s8487_s1 + $0x180] sm:$0xf]  ;;  %v5461_v17 = vld [vmem:[%s8487_s1 + $0x184] sm:$0xf0]  ;;  %s8965_s12 = smov (!%p180_p4, %s5687_s12), 1  ;;  %v4634_v22 = vor.u32 %v5495_v13, %v4633_v11  ;;  %v4510_v26 = vor.u32 %v5462_v14, %v4507_v15 }
  0x20   : > { %1155 = vmatpush.bf16.msra.mxu1 %v4586_v57  ;;  %1333 = vmatpush.bf16.msra.mxu3 %v4526_v62  ;;  %v4561_v19 = vld [vmem:[%s8487_s1 + $0x200] sm:$0xf]  ;;  %v5477_v20 = vld [vmem:[%s8487_s1 + $0x204] sm:$0xf0]  ;;  %v5460_v25 = vld [vmem:[%s8487_s1 + $0x184] sm:$0xf]  ;;  %v4498_v32 = vor.u32 %v5461_v17, %v4497_v16 }
  0x21   : > { %1244 = vmatpush.bf16.msra.mxu2 %v4650_v58  ;;  %v4625_v23 = vld [vmem:[%s8487_s1 + $0x280] sm:$0xf]  ;;  %v5493_v24 = vld [vmem:[%s8487_s1 + $0x284] sm:$0xf0]  ;;  %v4499_v27 = vld [vmem:[%s8487_s1 + $0x188] sm:$0xf0]  ;;  %v4562_v36 = vor.u32 %v5477_v20, %v4561_v19 }
  0x22   : > { %s5604_s29 = smul.u32 216, %s8965_s12  ;;  %v4745_v28 = vld [vmem:[%s8487_s1 + $0x70] sm:$0xf]  ;;  %v5427_v29 = vld [vmem:[%s8487_s1 + $0x74] sm:$0xf0]  ;;  %v4626_v37 = vor.u32 %v5493_v24, %v4625_v23  ;;  %v4502_v41 = vor.u32 %v5460_v25, %v4499_v27  ;;  %s5393_s26 = sshll.u32 %s8965_s12, 9 }
  0x23   : > { %1067 = vmatpush.bf16.msra.mxu0 %v4514_v4  ;;  %v4809_v30 = vld [vmem:[%s8487_s1 + $0xf0] sm:$0xf]  ;;  %v5443_v31 = vld [vmem:[%s8487_s1 + $0xf4] sm:$0xf0]  ;;  %v5506_v33 = vld [vmem:[%s8487_s1 + $0x2f4] sm:$0xf]  ;;  %v4746_v43 = vor.u32 %v5427_v29, %v4745_v28 }
  0x24   : > { %1156 = vmatpush.bf16.msra.mxu1 %v4578_v7  ;;  %1334 = vmatpush.bf16.msra.mxu3 %v4518_v12  ;;  %s5949_s17 = scalar_lea.vmem %s8486_s0, %s5604_s29  ;;  %v4683_v34 = vld [vmem:[%s8487_s1 + $0x2f8] sm:$0xf0]  ;;  %v5490_v35 = vld [vmem:[%s8487_s1 + $0x274] sm:$0xf]  ;;  %v4810_v46 = vor.u32 %v5443_v31, %v4809_v30  ;;  %vm416_vm1 = vsmask.f32 7424  ;;  %s7116_s29 = scalar_lea.vmem %s8489_s3, %s5393_s26 }
  0x25   : > { %1245 = vmatpush.bf16.msra.mxu2 %v4642_v8  ;;  %v5395_v38 = vld [vmem:[%s5949_s17 + $0xc] sm:$0xff]  ;;  %v205_v39 = vld [vmem:[%s5949_s17 + $0x14] sm:$0x1]  ;;  %v4619_v40 = vld [vmem:[%s8487_s1 + $0x278] sm:$0xf0]  ;;  %v4686_v49 = vor.u32 %v5506_v33, %v4683_v34 }
  0x26   : > { %v381_v42 = vunpack.c.l.b16 %v205_v39  ;;  %v430_v44 = vshrl.u32 %v5395_v38, 16  ;;  %v432_v45 = vshll.u32 %v5395_v38, 16  ;;  %v655_v48 = vrot.slane %v5395_v38, 1  ;;  %v208_v52 = vld [vmem:[%s5949_s17 + $0x20] sm:$0x1]  ;;  %v5396_v56 = vld [vmem:[%s5949_s17 + $0x18] sm:$0xff] }
  0x27   : > { %1068 = vmatpush.bf16.msra.mxu0 %v4506_v18  ;;  %v4622_v50 = vor.u32 %v5490_v35, %v4619_v40  ;;  %v382_v59 = vunpack.c.l.b16 %v208_v52  ;;  %v444_v61 = vshll.u32 %v5396_v56, 16  ;;  %v4737_v62 = vld [vmem:[%s8487_s1 + $0x60] sm:$0xf]  ;;  %v5425_v63 = vld [vmem:[%s8487_s1 + $0x64] sm:$0xf0]  ;;  %v442_v11 = vshrl.u32 %v5396_v56, 16 }
  0x28   : > { %1157 = vmatpush.bf16.msra.mxu1 %v4570_v21  ;;  %1335 = vmatpush.bf16.msra.mxu3 %v4510_v26  ;;  %v399_v47 = vpack.c.b16 %v381_v42, %v381_v42  ;;  %v434_v51 = vrot.slane %v432_v45, 1  ;;  %v4738_v1 = vor.u32 %v5425_v63, %v4737_v62  ;;  %v4801_v2 = vld [vmem:[%s8487_s1 + $0xe0] sm:$0xf]  ;;  %v5441_v3 = vld [vmem:[%s8487_s1 + $0xe4] sm:$0xf0]  ;;  %v658_v14 = vrot.slane %v5396_v56, 1 }
  0x29   : > { %1246 = vmatpush.bf16.msra.mxu2 %v4634_v22  ;;  %v400_v0 = vpack.c.b16 %v382_v59, %v382_v59  ;;  %v5504_v4 = vld [vmem:[%s8487_s1 + $0x2e4] sm:$0xf]  ;;  %v4802_v5 = vor.u32 %v5441_v3, %v4801_v2  ;;  %v4675_v6 = vld [vmem:[%s8487_s1 + $0x2e8] sm:$0xf0]  ;;  %v446_v12 = vrot.slane %v444_v61, 1  ;;  %v5398_v34 = vld [vmem:[%s5949_s17 + $0x30] sm:$0xff] }
  0x2a   : > { %v437_v53 = vshll.u32 %v399_v47, 16  ;;  %v656_v54 = vrot.slane %v399_v47, 1  ;;  %v435_v55 = vor.u32 %v434_v51, %v430_v44  ;;  %v5488_v7 = vld [vmem:[%s8487_s1 + $0x264] sm:$0xf]  ;;  %v4611_v8 = vld [vmem:[%s8487_s1 + $0x268] sm:$0xf0]  ;;  %v4678_v9 = vor.u32 %v5504_v4, %v4675_v6 }
  0x2b   : > { %1069 = vmatpush.bf16.msra.mxu0 %v4498_v32  ;;  %v4614_v10 = vor.u32 %v5488_v7, %v4611_v8  ;;  %v449_v13 = vshll.u32 %v400_v0, 16  ;;  %v659_v15 = vrot.slane %v400_v0, 1  ;;  %v447_v16 = vor.u32 %v446_v12, %v442_v11  ;;  %v211_v18 = vld [vmem:[%s5949_s17 + $0x2c] sm:$0x1]  ;;  %v5397_v21 = vld [vmem:[%s5949_s17 + $0x24] sm:$0xff]  ;;  %v5399_v63 = vld [vmem:[%s5949_s17 + $0x3c] sm:$0xff] }
  0x2c   : > { %1158 = vmatpush.bf16.msra.mxu1 %v4562_v36  ;;  %1336 = vmatpush.bf16.msra.mxu3 %v4502_v41  ;;  %v439_v57 = vrot.slane %v437_v53, 1  ;;  %v5968_v58 = vsel %vm651_vm0, %v655_v48, %v656_v54  ;;  %v383_v22 = vunpack.c.l.b16 %v211_v18  ;;  %v456_v24 = vshll.u32 %v5397_v21, 16  ;;  %v214_v32 = vld [vmem:[%s5949_s17 + $0x38] sm:$0x1]  ;;  %v4793_v40 = vld [vmem:[%s8487_s1 + $0xd0] sm:$0xf] }
  0x2d   : > { %1247 = vmatpush.bf16.msra.mxu2 %v4626_v37  ;;  %8598 = vst [vmem:[#allocation2_spill] sm:$0xff] %v5968_v58  ;;  %v451_v17 = vrot.slane %v449_v13, 1  ;;  %v6001_v19 = vsel %vm651_vm0, %v658_v14, %v659_v15  ;;  %v454_v25 = vshrl.u32 %v5397_v21, 16  ;;  %v661_v28 = vrot.slane %v5397_v21, 1  ;;  %v5423_v39 = vld [vmem:[%s8487_s1 + $0x54] sm:$0xf0] }
  0x2e   : > { %1070 = vmatmul.bf16.vlgmr.msra.gmra.mxu0 %v5395_v38  ;;  %v5972_v60 = vsel %vm416_vm1, %v435_v55, %v439_v57  ;;  %8600 = vst [vmem:[#allocation4_spill] sm:$0xff] %v6001_v19  ;;  %v401_v23 = vpack.c.b16 %v383_v22, %v383_v22  ;;  %v458_v26 = vrot.slane %v456_v24, 1  ;;  %v384_v36 = vunpack.c.l.b16 %v214_v32  ;;  %v5502_v44 = vld [vmem:[%s8487_s1 + $0x2d4] sm:$0xf]  ;;  %v4667_v45 = vld [vmem:[%s8487_s1 + $0x2d8] sm:$0xf0] }
  0x2f   : > { %1418 = vmatpush.bf16.msrb.mxu0 %v4622_v50  ;;  %1337 = vmatmul.bf16.vlgmr.msra.gmra.mxu3 %v5395_v38  ;;  %8599 = vst [vmem:[#allocation3_spill] sm:$0xff] %v5972_v60  ;;  %v6004_v20 = vsel %vm416_vm1, %v447_v16, %v451_v17  ;;  %v468_v37 = vshll.u32 %v5398_v34, 16  ;;  %v4729_v38 = vld [vmem:[%s8487_s1 + $0x50] sm:$0xf]  ;;  %v4670_v47 = vor.u32 %v5502_v44, %v4667_v45  ;;  %v5486_v48 = vld [vmem:[%s8487_s1 + $0x254] sm:$0xf] }
  0x30   : > { %1925 = vmatpush.bf16.msrb.mxu3 %v4810_v46  ;;  %1507 = vmatpush.bf16.msrb.mxu1 %v4686_v49  ;;  %8601 = vst [vmem:[#allocation5_spill] sm:$0xff] %v6004_v20  ;;  %v461_v27 = vshll.u32 %v401_v23, 16  ;;  %v662_v29 = vrot.slane %v401_v23, 1  ;;  %v459_v30 = vor.u32 %v458_v26, %v454_v25  ;;  %v402_v41 = vpack.c.b16 %v384_v36, %v384_v36  ;;  %v4603_v49 = vld [vmem:[%s8487_s1 + $0x258] sm:$0xf0]  ;;  %v5400_v12 = vld [vmem:[%s5949_s17 + $0x48] sm:$0xff] }
  0x31   : > { %1836 = vmatpush.bf16.msrb.mxu2 %v4746_v43  ;;  %1159 = vmatmul.bf16.vlgmr.msra.gmra.mxu1 %v5972_v60  ;;  %v4730_v42 = vor.u32 %v5423_v39, %v4729_v38  ;;  %v5439_v43 = vld [vmem:[%s8487_s1 + $0xd4] sm:$0xf0]  ;;  %v4606_v50 = vor.u32 %v5486_v48, %v4603_v49  ;;  %v466_v51 = vshrl.u32 %v5398_v34, 16  ;;  %v470_v52 = vrot.slane %v468_v37, 1  ;;  %v217_v59 = vld [vmem:[%s5949_s17 + $0x44] sm:$0x1] }
  0x32   : > { %1248 = vmatmul.bf16.vlgmr.msra.gmra.mxu2 %v5968_v58  ;;  %v463_v31 = vrot.slane %v461_v27, 1  ;;  %v6011_v33 = vsel %vm651_vm0, %v661_v28, %v662_v29  ;;  %v4794_v46 = vor.u32 %v5439_v43, %v4793_v40  ;;  %v473_v53 = vshll.u32 %v402_v41, 16  ;;  %v4721_v16 = vld [vmem:[%s8487_s1 + $0x40] sm:$0xf]  ;;  %v5421_v17 = vld [vmem:[%s8487_s1 + $0x44] sm:$0xf0] }
  0x33   : > { %1419 = vmatpush.bf16.msrb.mxu0 %v4614_v10  ;;  %8602 = vst [vmem:[#allocation6_spill] sm:$0xff] %v6011_v33  ;;  %v664_v54 = vrot.slane %v5398_v34, 1  ;;  %v665_v55 = vrot.slane %v402_v41, 1  ;;  %v385_v0 = vunpack.c.l.b16 %v217_v59  ;;  %v480_v2 = vshll.u32 %v5399_v63, 16  ;;  %v220_v10 = vld [vmem:[%s5949_s17 + $0x50] sm:$0x1] }
  0x34   : > { %1926 = vmatpush.bf16.msrb.mxu3 %v4802_v5  ;;  %1508 = vmatpush.bf16.msrb.mxu1 %v4678_v9  ;;  %v6015_v35 = vsel %vm416_vm1, %v459_v30, %v463_v31  ;;  %v475_v57 = vrot.slane %v473_v53, 1  ;;  %v478_v3 = vshrl.u32 %v5399_v63, 16  ;;  %v667_v6 = vrot.slane %v5399_v63, 1  ;;  %v4785_v18 = vld [vmem:[%s8487_s1 + $0xc0] sm:$0xf]  ;;  %v5401_v43 = vld [vmem:[%s5949_s17 + $0x54] sm:$0xff] }
  0x35   : > { %1837 = vmatpush.bf16.msrb.mxu2 %v4738_v1  ;;  %8603 = vst [vmem:[#allocation7_spill] sm:$0xff] %v6015_v35  ;;  %v6045_v61 = vsel %vm651_vm0, %v664_v54, %v665_v55  ;;  %v403_v1 = vpack.c.b16 %v385_v0, %v385_v0  ;;  %v482_v4 = vrot.slane %v480_v2, 1  ;;  %v386_v14 = vunpack.c.l.b16 %v220_v10  ;;  %v5437_v23 = vld [vmem:[%s8487_s1 + $0xc4] sm:$0xf0]  ;;  %v5500_v24 = vld [vmem:[%s8487_s1 + $0x2c4] sm:$0xf] }
  0x36   : > { %8604 = vst [vmem:[#allocation8_spill] sm:$0xff] %v6045_v61  ;;  %v492_v15 = vshll.u32 %v5400_v12, 16  ;;  %v4722_v22 = vor.u32 %v5421_v17, %v4721_v16  ;;  %v4659_v25 = vld [vmem:[%s8487_s1 + $0x2c8] sm:$0xf0]  ;;  %v4786_v26 = vor.u32 %v5437_v23, %v4785_v18  ;;  %v5484_v28 = vld [vmem:[%s8487_s1 + $0x244] sm:$0xf] }
  0x37   : > { %1420 = vmatpush.bf16.msrb.mxu0 %v4606_v50  ;;  %v485_v5 = vshll.u32 %v403_v1, 16  ;;  %v668_v7 = vrot.slane %v403_v1, 1  ;;  %v483_v8 = vor.u32 %v482_v4, %v478_v3  ;;  %v4662_v27 = vor.u32 %v5500_v24, %v4659_v25  ;;  %v4595_v29 = vld [vmem:[%s8487_s1 + $0x248] sm:$0xf0]  ;;  %v223_v40 = vld [vmem:[%s5949_s17 + $0x5c] sm:$0x1] }
  0x38   : > { %1927 = vmatpush.bf16.msrb.mxu3 %v4794_v46  ;;  %1509 = vmatpush.bf16.msrb.mxu1 %v4670_v47  ;;  %v4598_v30 = vor.u32 %v5484_v28, %v4595_v29  ;;  %v490_v31 = vshrl.u32 %v5400_v12, 16  ;;  %v494_v32 = vrot.slane %v492_v15, 1  ;;  %v670_v36 = vrot.slane %v5400_v12, 1  ;;  %v226_v54 = vld [vmem:[%s5949_s17 + $0x68] sm:$0x1] }
  0x39   : > { %1838 = vmatpush.bf16.msrb.mxu2 %v4730_v42  ;;  %v487_v9 = vrot.slane %v485_v5, 1  ;;  %v6055_v11 = vsel %vm651_vm0, %v667_v6, %v668_v7  ;;  %v387_v44 = vunpack.c.l.b16 %v223_v40  ;;  %v504_v46 = vshll.u32 %v5401_v43, 16  ;;  %v5419_v0 = vld [vmem:[%s8487_s1 + $0x34] sm:$0xf0]  ;;  %v4777_v1 = vld [vmem:[%s8487_s1 + $0xb0] sm:$0xf] }
  0x3a   : > { %8606 = vst [vmem:[#allocation10_spill] sm:$0xff] %v6055_v11  ;;  %v495_v38 = vor.u32 %v494_v32, %v490_v31  ;;  %v502_v47 = vshrl.u32 %v5401_v43, 16  ;;  %v673_v50 = vrot.slane %v5401_v43, 1  ;;  %v388_v59 = vunpack.c.l.b16 %v226_v54  ;;  %v5435_v5 = vld [vmem:[%s8487_s1 + $0xb4] sm:$0xf0] }
  0x3b   : > { %v6059_v13 = vsel %vm416_vm1, %v483_v8, %v487_v9  ;;  %1421 = vmatpush.bf16.msrb.mxu0 %v4598_v30  ;;  %v405_v45 = vpack.c.b16 %v387_v44, %v387_v44  ;;  %v506_v48 = vrot.slane %v504_v46, 1  ;;  %v4778_v6 = vor.u32 %v5435_v5, %v4777_v1  ;;  %v5498_v7 = vld [vmem:[%s8487_s1 + $0x2b4] sm:$0xf]  ;;  %v4651_v8 = vld [vmem:[%s8487_s1 + $0x2b8] sm:$0xf0] }
  0x3c   : > { %8607 = vst [vmem:[#allocation11_spill] sm:$0xff] %v6059_v13  ;;  %1928 = vmatpush.bf16.msrb.mxu3 %v4786_v26  ;;  %1510 = vmatpush.bf16.msrb.mxu1 %v4662_v27  ;;  %v406_v2 = vpack.c.b16 %v388_v59, %v388_v59  ;;  %v4654_v9 = vor.u32 %v5498_v7, %v4651_v8  ;;  %v5482_v15 = vld [vmem:[%s8487_s1 + $0x234] sm:$0xf]  ;;  %v4587_v16 = vld [vmem:[%s8487_s1 + $0x238] sm:$0xf0]  ;;  %v5403_v27 = vld [vmem:[%s5949_s17 + $0x6c] sm:$0xff] }
  0x3d   : > { %1839 = vmatpush.bf16.msrb.mxu2 %v4722_v22  ;;  %v509_v49 = vshll.u32 %v405_v45, 16  ;;  %v229_v24 = vld [vmem:[%s5949_s17 + $0x74] sm:$0x1]  ;;  %v528_v30 = vshll.u32 %v5403_v27, 16  ;;  %v526_v31 = vshrl.u32 %v5403_v27, 16 }
  0x3e   : > { %1075 = vmatmul.bf16.gmra.mxu0 %v5396_v56  ;;  %v677_v18 = vrot.slane %v406_v2, 1  ;;  %v389_v28 = vunpack.c.l.b16 %v229_v24  ;;  %v4643_v5 = vld [vmem:[%s8487_s1 + $0x2a8] sm:$0xf0] }
  0x3f   : > { %1342 = vmatmul.bf16.gmra.mxu3 %v5396_v56  ;;  %v471_v56 = vor.u32 %v470_v52, %v466_v51  ;;  %v674_v51 = vrot.slane %v405_v45, 1  ;;  %v507_v52 = vor.u32 %v506_v48, %v502_v47  ;;  %v511_v53 = vrot.slane %v509_v49, 1  ;;  %v5404_v47 = vld [vmem:[%s5949_s17 + $0x78] sm:$0xff] }
  0x40   : > { %1929 = vmatpush.bf16.msrb.mxu3 %v4778_v6  ;;  %1511 = vmatpush.bf16.msrb.mxu1 %v4654_v9  ;;  %v407_v29 = vpack.c.b16 %v389_v28, %v389_v28  ;;  %v530_v32 = vrot.slane %v528_v30, 1  ;;  %v540_v59 = vshll.u32 %v5404_v47, 16  ;;  %v538_v8 = vshrl.u32 %v5404_v47, 16 }
  0x41   : > { %1164 = vmatmul.bf16.gmra.mxu1 %v6004_v20  ;;  %v6048_v62 = vsel %vm416_vm1, %v471_v56, %v475_v57  ;;  %v6099_v55 = vsel %vm651_vm0, %v673_v50, %v674_v51  ;;  %v6102_v56 = vsel %vm416_vm1, %v507_v52, %v511_v53  ;;  %v5402_v57 = vld [vmem:[%s5949_s17 + $0x60] sm:$0xff]  ;;  %v5417_v51 = vld [vmem:[%s8487_s1 + $0x24] sm:$0xf0] }
  0x42   : > { %1253 = vmatmul.bf16.gmra.mxu2 %v6001_v19  ;;  %8605 = vst [vmem:[#allocation9_spill] sm:$0xff] %v6048_v62  ;;  %v516_v3 = vshll.u32 %v5402_v57, 16  ;;  %v514_v10 = vshrl.u32 %v5402_v57, 16  ;;  %v676_v17 = vrot.slane %v5402_v57, 1  ;;  %v4705_v50 = vld [vmem:[%s8487_s1 + $0x20] sm:$0xf] }
  0x43   : > { %8610 = vst [vmem:[#allocation14_spill] sm:$0xff] %v6099_v55  ;;  %v4769_v52 = vld [vmem:[%s8487_s1 + $0xa0] sm:$0xf]  ;;  %v542_v9 = vrot.slane %v540_v59, 1 }
  0x44   : > { %8611 = vst [vmem:[#allocation15_spill] sm:$0xff] %v6102_v56  ;;  %v6133_v25 = vsel %vm651_vm0, %v676_v17, %v677_v18 }
  0x45   : > { %8612 = vst [vmem:[#allocation16_spill] sm:$0xff] %v6133_v25 }
  0x4e   : > { %1080 = vmatmul.bf16.gmra.mxu0 %v5397_v21 }
  0x4f   : > { %1347 = vmatmul.bf16.gmra.mxu3 %v5397_v21  ;;  %v404_v21 = vpack.c.b16 %v386_v14, %v386_v14  ;;  %v521_v14 = vshll.u32 %v406_v2, 16 }
  0x51   : > { %1169 = vmatmul.bf16.gmra.mxu1 %v6015_v35  ;;  %v671_v37 = vrot.slane %v404_v21, 1  ;;  %v523_v23 = vrot.slane %v521_v14, 1  ;;  %v5480_v14 = vld [vmem:[%s8487_s1 + $0x224] sm:$0xf] }
  0x52   : > { %1258 = vmatmul.bf16.gmra.mxu2 %v6011_v33 }
  0x53   : > { %v6089_v41 = vsel %vm651_vm0, %v670_v36, %v671_v37  ;;  %v679_v36 = vrot.slane %v5403_v27, 1  ;;  %v680_v37 = vrot.slane %v407_v29, 1 }
  0x54   : > { %8608 = vst [vmem:[#allocation12_spill] sm:$0xff] %v6089_v41 }
  0x55   : > { %v6143_v44 = vsel %vm651_vm0, %v679_v36, %v680_v37 }
  0x56   : > { %8614 = vst [vmem:[#allocation18_spill] sm:$0xff] %v6143_v44 }
  0x5e   : > { %1085 = vmatmul.bf16.gmra.mxu0 %v5398_v34 }
  0x5f   : > { %1352 = vmatmul.bf16.gmra.mxu3 %v5398_v34  ;;  %v497_v34 = vshll.u32 %v404_v21, 16  ;;  %v4590_v21 = vor.u32 %v5482_v15, %v4587_v16  ;;  %v4579_v15 = vld [vmem:[%s8487_s1 + $0x228] sm:$0xf0]  ;;  %v682_v16 = vrot.slane %v5404_v47, 1 }
  0x60   : > { %v4582_v18 = vor.u32 %v5480_v14, %v4579_v15  ;;  %v4697_v14 = vld [vmem:[%s8487_s1 + $0x10] sm:$0xf]  ;;  %v5415_v15 = vld [vmem:[%s8487_s1 + $0x14] sm:$0xf0] }
  0x61   : > { %1174 = vmatmul.bf16.gmra.mxu1 %v6048_v62  ;;  %v499_v39 = vrot.slane %v497_v34, 1  ;;  %1422 = vmatpush.bf16.msrb.mxu0 %v4590_v21  ;;  %v533_v34 = vshll.u32 %v407_v29, 16  ;;  %v235_v29 = vld [vmem:[%s5949_s17 + $0x8c] sm:$0x1] }
  0x62   : > { %1263 = vmatmul.bf16.gmra.mxu2 %v6045_v61  ;;  %v391_v36 = vunpack.c.l.b16 %v235_v29 }
  0x63   : > { %v6092_v42 = vsel %vm416_vm1, %v495_v38, %v499_v39  ;;  %v531_v39 = vor.u32 %v530_v32, %v526_v31  ;;  %v535_v40 = vrot.slane %v533_v34, 1  ;;  %v5405_v34 = vld [vmem:[%s5949_s17 + $0x84] sm:$0xff] }
  0x64   : > { %8609 = vst [vmem:[#allocation13_spill] sm:$0xff] %v6092_v42 }
  0x65   : > { %v6146_v46 = vsel %vm416_vm1, %v531_v39, %v535_v40  ;;  %1423 = vmatpush.bf16.msrb.mxu0 %v4582_v18  ;;  %v409_v40 = vpack.c.b16 %v391_v36, %v391_v36  ;;  %v5494_v36 = vld [vmem:[%s8487_s1 + $0x294] sm:$0xf] }
  0x66   : > { %8615 = vst [vmem:[#allocation19_spill] sm:$0xff] %v6146_v46 }
  0x67   : > { %v686_v59 = vrot.slane %v409_v40, 1 }
  0x6e   : > { %1090 = vmatmul.bf16.gmra.mxu0 %v5399_v63 }
  0x6f   : > { %1357 = vmatmul.bf16.gmra.mxu3 %v5399_v63  ;;  %v4713_v63 = vld [vmem:[%s8487_s1 + $0x30] sm:$0xf] }
  0x70   : > { %v4714_v4 = vor.u32 %v5419_v0, %v4713_v63  ;;  %v4706_v63 = vor.u32 %v5417_v51, %v4705_v50  ;;  %v5433_v0 = vld [vmem:[%s8487_s1 + $0xa4] sm:$0xf0]  ;;  %v550_v50 = vshrl.u32 %v5405_v34, 16 }
  0x71   : > { %1179 = vmatmul.bf16.gmra.mxu1 %v6059_v13 }
  0x72   : > { %1268 = vmatmul.bf16.gmra.mxu2 %v6055_v11 }
  0x73   : > { %1840 = vmatpush.bf16.msrb.mxu2 %v4714_v4  ;;  %v5496_v4 = vld [vmem:[%s8487_s1 + $0x2a4] sm:$0xf] }
  0x74   : > { %v4646_v6 = vor.u32 %v5496_v4, %v4643_v5  ;;  %v238_v5 = vld [vmem:[%s5949_s17 + $0x98] sm:$0x1] }
  0x76   : > { %1512 = vmatpush.bf16.msrb.mxu1 %v4646_v6 }
  0x77   : > { %1841 = vmatpush.bf16.msrb.mxu2 %v4706_v63 }
  0x7e   : > { %1095 = vmatmul.bf16.gmra.mxu0 %v5400_v12 }
  0x7f   : > { %1362 = vmatmul.bf16.gmra.mxu3 %v5400_v12  ;;  %v518_v12 = vrot.slane %v516_v3, 1  ;;  %v4770_v3 = vor.u32 %v5433_v0, %v4769_v52  ;;  %v557_v52 = vshll.u32 %v409_v40, 16 }
  0x81   : > { %1184 = vmatmul.bf16.gmra.mxu1 %v6092_v42  ;;  %v519_v22 = vor.u32 %v518_v12, %v514_v10  ;;  %1930 = vmatpush.bf16.msrb.mxu3 %v4770_v3 }
  0x82   : > { %1273 = vmatmul.bf16.gmra.mxu2 %v6089_v41 }
  0x83   : > { %v6136_v26 = vsel %vm416_vm1, %v519_v22, %v523_v23  ;;  %v543_v23 = vor.u32 %v542_v9, %v538_v8  ;;  %v5406_v9 = vld [vmem:[%s5949_s17 + $0x90] sm:$0xff] }
  0x84   : > { %8613 = vst [vmem:[#allocation17_spill] sm:$0xff] %v6136_v26 }
  0x8e   : > { %1100 = vmatmul.bf16.gmra.mxu0 %v5401_v43 }
  0x8f   : > { %1367 = vmatmul.bf16.gmra.mxu3 %v5401_v43  ;;  %v232_v43 = vld [vmem:[%s5949_s17 + $0x80] sm:$0x1] }
  0x90   : > { %v390_v48 = vunpack.c.l.b16 %v232_v43  ;;  %v552_v43 = vshll.u32 %v5405_v34, 16 }
  0x91   : > { %1189 = vmatmul.bf16.gmra.mxu1 %v6102_v56 }
  0x92   : > { %1278 = vmatmul.bf16.gmra.mxu2 %v6099_v55  ;;  %v554_v51 = vrot.slane %v552_v43, 1  ;;  %v562_v43 = vshrl.u32 %v5406_v9, 16 }
  0x94   : > { %v555_v0 = vor.u32 %v554_v51, %v550_v50  ;;  %v5478_v51 = vld [vmem:[%s8487_s1 + $0x214] sm:$0xf] }
  0x9e   : > { %1105 = vmatmul.bf16.gmra.mxu0 %v5402_v57 }
  0x9f   : > { %1372 = vmatmul.bf16.gmra.mxu3 %v5402_v57  ;;  %v408_v57 = vpack.c.b16 %v390_v48, %v390_v48 }
  0xa1   : > { %1194 = vmatmul.bf16.gmra.mxu1 %v6136_v26  ;;  %v545_v10 = vshll.u32 %v408_v57, 16  ;;  %v683_v17 = vrot.slane %v408_v57, 1  ;;  %v685_v57 = vrot.slane %v5405_v34, 1 }
  0xa2   : > { %1283 = vmatmul.bf16.gmra.mxu2 %v6133_v25 }
  0xa3   : > { %v547_v24 = vrot.slane %v545_v10, 1  ;;  %v6185_v30 = vsel %vm651_vm0, %v682_v16, %v683_v17  ;;  %v6203_v6 = vsel %vm651_vm0, %v685_v57, %v686_v59  ;;  %v392_v10 = vunpack.c.l.b16 %v238_v5  ;;  %v4761_v16 = vld [vmem:[%s8487_s1 + $0x90] sm:$0xf] }
  0xa4   : > { %8616 = vst [vmem:[#allocation20_spill] sm:$0xff] %v6185_v30 }
  0xa5   : > { %v6188_v32 = vsel %vm416_vm1, %v543_v23, %v547_v24  ;;  %8617 = vst [vmem:[#allocation21_spill] sm:$0xff] %v6203_v6  ;;  %v564_v23 = vshll.u32 %v5406_v9, 16  ;;  %v4698_v24 = vor.u32 %v5415_v15, %v4697_v14 }
  0xa7   : > { %1842 = vmatpush.bf16.msrb.mxu2 %v4698_v24 }
  0xab   : > { %v1071_v38 = vpop.f32.mrf.mxu0 }
  0xae   : > { %1110 = vmatmul.bf16.gmra.mxu0 %v5403_v27  ;;  %v1160_v45 = vpop.f32.mrf.mxu1 }
  0xaf   : > { %v1161_v49 = vadd.f32 %v1160_v45, %v1071_v38  ;;  %1377 = vmatmul.bf16.gmra.mxu3 %v5403_v27 }
  0xb1   : > { %1199 = vmatmul.bf16.gmra.mxu1 %v6146_v46 }
  0xb2   : > { %1288 = vmatmul.bf16.gmra.mxu2 %v6143_v44  ;;  %v6160_v54 = vpop.f32.mrf.mxu3 }
  0xb3   : > { %v1073_v2 = vpop.f32.mrf.mxu0 }
  0xb5   : > { %v1249_v53 = vpop.f32.mrf.mxu2 }
  0xb6   : > { %v6165_v1 = vadd.f32 %v1249_v53, %v1161_v49  ;;  %v1162_v7 = vpop.f32.mrf.mxu1 }
  0xb7   : > { %v1163_v12 = vadd.f32 %v1162_v7, %v1073_v2  ;;  %v559_v2 = vrot.slane %v557_v52, 1  ;;  %v4571_v52 = vld [vmem:[%s8487_s1 + $0x218] sm:$0xf0] }
  0xb8   : > { %v4574_v59 = vor.u32 %v5478_v51, %v4571_v52 }
  0xb9   : > { %v6206_v8 = vsel %vm416_vm1, %v555_v0, %v559_v2 }
  0xba   : > { %v6179_v22 = vpop.f32.mrf.mxu3  ;;  %1424 = vmatpush.bf16.msrb.mxu0 %v4574_v59 }
  0xbb   : > { %v1076_v28 = vpop.f32.mrf.mxu0 }
  0xbd   : > { %v1251_v21 = vpop.f32.mrf.mxu2 }
  0xbe   : > { %v6181_v27 = vadd.f32 %v1251_v21, %v1163_v12  ;;  %1115 = vmatmul.bf16.gmra.mxu0 %v5404_v47  ;;  %v1165_v31 = vpop.f32.mrf.mxu1  ;;  %v410_v21 = vpack.c.b16 %v392_v10, %v392_v10  ;;  %v241_v10 = vld [vmem:[%s5949_s17 + $0xa4] sm:$0x1] }
  0xbf   : > { %v1166_v37 = vadd.f32 %v1165_v31, %v1076_v28  ;;  %1382 = vmatmul.bf16.gmra.mxu3 %v5404_v47  ;;  %v5431_v28 = vld [vmem:[%s8487_s1 + $0x94] sm:$0xf0] }
  0xc0   : > { %v689_v57 = vrot.slane %v410_v21, 1 }
  0xc1   : > { %1204 = vmatmul.bf16.gmra.mxu1 %v6188_v32 }
  0xc2   : > { %1293 = vmatmul.bf16.gmra.mxu2 %v6185_v30  ;;  %v6193_v39 = vpop.f32.mrf.mxu3 }
  0xc3   : > { %v1078_v48 = vpop.f32.mrf.mxu0 }
  0xc5   : > { %v1254_v38 = vpop.f32.mrf.mxu2 }
  0xc6   : > { %v6195_v45 = vadd.f32 %v1254_v38, %v1166_v37  ;;  %v1167_v49 = vpop.f32.mrf.mxu1  ;;  %v4635_v37 = vld [vmem:[%s8487_s1 + $0x298] sm:$0xf0] }
  0xc7   : > { %v1168_v53 = vadd.f32 %v1167_v49, %v1078_v48  ;;  %v4638_v38 = vor.u32 %v5494_v36, %v4635_v37  ;;  %v566_v48 = vrot.slane %v564_v23, 1  ;;  %v569_v49 = vshll.u32 %v410_v21, 16 }
  0xc9   : > { %1513 = vmatpush.bf16.msrb.mxu1 %v4638_v38  ;;  %v567_v2 = vor.u32 %v566_v48, %v562_v43 }
  0xca   : > { %v6197_v63 = vpop.f32.mrf.mxu3 }
  0xcb   : > { %v1081_v4 = vpop.f32.mrf.mxu0 }
  0xcd   : > { %v1256_v47 = vpop.f32.mrf.mxu2 }
  0xce   : > { %v6199_v3 = vadd.f32 %v1256_v47, %v1168_v53  ;;  %1120 = vmatmul.bf16.gmra.mxu0 %v5405_v34  ;;  %v1170_v7 = vpop.f32.mrf.mxu1  ;;  %v688_v53 = vrot.slane %v5406_v9, 1 }
  0xcf   : > { %v1171_v12 = vadd.f32 %v1170_v7, %v1081_v4  ;;  %1387 = vmatmul.bf16.gmra.mxu3 %v5405_v34  ;;  %v4762_v34 = vor.u32 %v5431_v28, %v4761_v16  ;;  %v571_v4 = vrot.slane %v569_v49, 1  ;;  %v5407_v16 = vld [vmem:[%s5949_s17 + $0x9c] sm:$0xff] }
  0xd0   : > { %v574_v38 = vshrl.u32 %v5407_v16, 16  ;;  %v691_v49 = vrot.slane %v5407_v16, 1 }
  0xd1   : > { %1209 = vmatmul.bf16.gmra.mxu1 %v6206_v8  ;;  %1931 = vmatpush.bf16.msrb.mxu3 %v4762_v34  ;;  %v6248_v15 = vsel %vm416_vm1, %v567_v2, %v571_v4 }
  0xd2   : > { %1298 = vmatmul.bf16.gmra.mxu2 %v6203_v6  ;;  %v6220_v18 = vpop.f32.mrf.mxu3  ;;  %8619 = vst [vmem:[#allocation23_spill] sm:$0xff] %v6248_v15 }
  0xd3   : > { %v1083_v31 = vpop.f32.mrf.mxu0 }
  0xd5   : > { %v1259_v17 = vpop.f32.mrf.mxu2 }
  0xd6   : > { %v6225_v29 = vadd.f32 %v1259_v17, %v1171_v12  ;;  %v1172_v40 = vpop.f32.mrf.mxu1  ;;  %v6245_v12 = vsel %vm651_vm0, %v688_v53, %v689_v57  ;;  %v393_v17 = vunpack.c.l.b16 %v241_v10  ;;  %v6269_v10 = vld [vmem:[%s5949_s17 + $0xa8] sm:$0xff] }
  0xd7   : > { %v1173_v50 = vadd.f32 %v1172_v40, %v1083_v31  ;;  %8618 = vst [vmem:[#allocation22_spill] sm:$0xff] %v6245_v12  ;;  %v576_v31 = vshll.u32 %v5407_v16, 16 }
  0xd8   : > { %v411_v28 = vpack.c.b16 %v393_v17, %v393_v17  ;;  %8622 = vst [vmem:[#allocation26_spill] sm:$0xff] %v6269_v10 }
  0xd9   : > { %v578_v40 = vrot.slane %v576_v31, 1 }
  0xda   : > { %v6239_v0 = vpop.f32.mrf.mxu3  ;;  %v581_v43 = vshll.u32 %v411_v28, 16 }
  0xdb   : > { %v1086_v7 = vpop.f32.mrf.mxu0  ;;  %v579_v52 = vor.u32 %v578_v40, %v574_v38  ;;  %v5429_v40 = vld [vmem:[%s8487_s1 + $0x84] sm:$0xf0] }
  0xdc   : > { %v583_v53 = vrot.slane %v581_v43, 1 }
  0xdd   : > { %v1261_v47 = vpop.f32.mrf.mxu2 }
  0xde   : > { %v6241_v5 = vadd.f32 %v1261_v47, %v1173_v50  ;;  %1125 = vmatmul.bf16.gmra.mxu0 %v5406_v9  ;;  %v1175_v14 = vpop.f32.mrf.mxu1  ;;  %v692_v50 = vrot.slane %v411_v28, 1  ;;  %v244_v47 = vld [vmem:[%s5949_s17 + $0xb0] sm:$0x1]  ;;  %v4753_v28 = vld [vmem:[%s8487_s1 + $0x80] sm:$0xf] }
  0xdf   : > { %v1176_v21 = vadd.f32 %v1175_v14, %v1086_v7  ;;  %1392 = vmatmul.bf16.gmra.mxu3 %v5406_v9  ;;  %v6266_v7 = vsel %vm416_vm1, %v579_v52, %v583_v53  ;;  %v394_v14 = vunpack.c.l.b16 %v244_v47 }
  0xe0   : > { %v6263_v2 = vsel %vm651_vm0, %v691_v49, %v692_v50  ;;  %8621 = vst [vmem:[#allocation25_spill] sm:$0xff] %v6266_v7  ;;  %v4754_v49 = vor.u32 %v5429_v40, %v4753_v28  ;;  %v5492_v50 = vld [vmem:[%s8487_s1 + $0x284] sm:$0xf] }
  0xe1   : > { %1214 = vmatmul.bf16.gmra.mxu1 %v6248_v15  ;;  %8620 = vst [vmem:[#allocation24_spill] sm:$0xff] %v6263_v2 }
  0xe2   : > { %1303 = vmatmul.bf16.gmra.mxu2 %v6245_v12  ;;  %v6253_v24 = vpop.f32.mrf.mxu3  ;;  %1932 = vmatpush.bf16.msrb.mxu3 %v4754_v49 }
  0xe3   : > { %v1088_v36 = vpop.f32.mrf.mxu0 }
  0xe5   : > { %v1264_v23 = vpop.f32.mrf.mxu2 }
  0xe6   : > { %v6255_v34 = vadd.f32 %v1264_v23, %v1176_v21  ;;  %v1177_v37 = vpop.f32.mrf.mxu1  ;;  %v4689_v21 = vld [vmem:[%s8487_s1] sm:$0xf]  ;;  %v5413_v23 = vld [vmem:[%s8487_s1 + $0x4] sm:$0xf0] }
  0xe7   : > { %v1178_v48 = vadd.f32 %v1177_v37, %v1088_v36  ;;  %v412_v37 = vpack.c.b16 %v394_v14, %v394_v14  ;;  %v4690_v38 = vor.u32 %v5413_v23, %v4689_v21  ;;  %v4563_v21 = vld [vmem:[%s8487_s1 + $0x208] sm:$0xf0]  ;;  %v694_v23 = vrot.slane %v6269_v10, 1 }
  0xe9   : > { %1843 = vmatpush.bf16.msrb.mxu2 %v4690_v38  ;;  %v695_v28 = vrot.slane %v412_v37, 1 }
  0xea   : > { %v6257_v51 = vpop.f32.mrf.mxu3 }
  0xeb   : > { %v1091_v59 = vpop.f32.mrf.mxu0 }
  0xed   : > { %v1266_v9 = vpop.f32.mrf.mxu2 }
  0xee   : > { %v6259_v57 = vadd.f32 %v1266_v9, %v1178_v48  ;;  %1130 = vmatmul.bf16.gmra.mxu0 %v5407_v16  ;;  %v1180_v4 = vpop.f32.mrf.mxu1  ;;  %v4627_v9 = vld [vmem:[%s8487_s1 + $0x288] sm:$0xf0] }
  0xef   : > { %v1181_v17 = vadd.f32 %v1180_v4, %v1091_v59  ;;  %1397 = vmatmul.bf16.gmra.mxu3 %v5407_v16  ;;  %v588_v16 = vshll.u32 %v6269_v10, 16  ;;  %v4630_v52 = vor.u32 %v5492_v50, %v4627_v9  ;;  %v586_v59 = vshrl.u32 %v6269_v10, 16  ;;  %v247_v9 = vld [vmem:[%s5949_s17 + $0xbc] sm:$0x1] }
  0xf0   : > { %v593_v4 = vshll.u32 %v412_v37, 16  ;;  %v6317_v37 = vld [vmem:[%s5949_s17 + $0xb4] sm:$0xff] }
  0xf1   : > { %1219 = vmatmul.bf16.gmra.mxu1 %v6266_v7  ;;  %v590_v47 = vrot.slane %v588_v16, 1  ;;  %8628 = vst [vmem:[#allocation32_spill] sm:$0xff] %v6317_v37 }
  0xf2   : > { %1308 = vmatmul.bf16.gmra.mxu2 %v6263_v2  ;;  %v6282_v36 = vpop.f32.mrf.mxu3  ;;  %1514 = vmatpush.bf16.msrb.mxu1 %v4630_v52  ;;  %v595_v49 = vrot.slane %v593_v4, 1  ;;  %v6310_v52 = vsel %vm651_vm0, %v694_v23, %v695_v28 }
  0xf3   : > { %v1093_v48 = vpop.f32.mrf.mxu0  ;;  %v591_v16 = vor.u32 %v590_v47, %v586_v59  ;;  %8626 = vst [vmem:[#allocation30_spill] sm:$0xff] %v6310_v52 }
  0xf5   : > { %v1269_v31 = vpop.f32.mrf.mxu2 }
  0xf6   : > { %v6288_v43 = vadd.f32 %v1269_v31, %v1181_v17  ;;  %v1182_v53 = vpop.f32.mrf.mxu1  ;;  %v5476_v17 = vld [vmem:[%s8487_s1 + $0x204] sm:$0xf] }
  0xf7   : > { %v1183_v14 = vadd.f32 %v1182_v53, %v1093_v48  ;;  %v4566_v31 = vor.u32 %v5476_v17, %v4563_v21  ;;  %v395_v17 = vunpack.c.l.b16 %v247_v9  ;;  %v697_v9 = vrot.slane %v6317_v37, 1 }
  0xf8   : > { %8623 = vst [vmem:[#allocation27_spill] sm:$0xff] %v6288_v43  ;;  %v6314_v43 = vsel %vm416_vm1, %v591_v16, %v595_v49 }
  0xf9   : > { %1425 = vmatpush.bf16.msrb.mxu0 %v4566_v31  ;;  %8627 = vst [vmem:[#allocation31_spill] sm:$0xff] %v6314_v43  ;;  %v413_v4 = vpack.c.b16 %v395_v17, %v395_v17 }
  0xfa   : > { %v6304_v40 = vpop.f32.mrf.mxu3 }
  0xfb   : > { %8624 = vst [vmem:[#allocation28_spill] sm:$0xff] %v6304_v40  ;;  %v1096_v50 = vpop.f32.mrf.mxu0  ;;  %v605_v49 = vshll.u32 %v413_v4, 16 }
  0xfd   : > { %v1271_v38 = vpop.f32.mrf.mxu2 }
  0xfe   : > { %v6306_v48 = vadd.f32 %v1271_v38, %v1183_v14  ;;  %1135 = vmatmul.bf16.gmra.mxu0 %v6269_v10  ;;  %v1185_v53 = vpop.f32.mrf.mxu1  ;;  %v600_v14 = vshll.u32 %v6317_v37, 16  ;;  %v598_v38 = vshrl.u32 %v6317_v37, 16 }
  0xff   : > { %v1186_v21 = vadd.f32 %v1185_v53, %v1096_v50  ;;  %1402 = vmatmul.bf16.gmra.mxu3 %v6269_v10  ;;  %v698_v53 = vrot.slane %v413_v4, 1 }
 0x100   : > { %8625 = vst [vmem:[#allocation29_spill] sm:$0xff] %v6306_v48  ;;  %v602_v16 = vrot.slane %v600_v14, 1 }
 0x101   : > { %1224 = vmatmul.bf16.gmra.mxu1 %v6314_v43  ;;  %v607_v43 = vrot.slane %v605_v49, 1 }
 0x102   : > { %1313 = vmatmul.bf16.gmra.mxu2 %v6310_v52  ;;  %v6322_v47 = vpop.f32.mrf.mxu3  ;;  %v603_v17 = vor.u32 %v602_v16, %v598_v38  ;;  %v4811_v38 = vld [vmem:[%s8487_s1 + $0xf8] sm:$0xf0] }
 0x103   : > { %8629 = vst [vmem:[#allocation33_spill] sm:$0xff] %v6322_v47  ;;  %v1098_v28 = vpop.f32.mrf.mxu0 }
 0x105   : > { %v1274_v59 = vpop.f32.mrf.mxu2 }
 0x106   : > { %v6325_v23 = vadd.f32 %v1274_v59, %v1186_v21  ;;  %v1187_v31 = vpop.f32.mrf.mxu1  ;;  %v250_v59 = vld [vmem:[%s5949_s17 + $0xc8] sm:$0x1] }
 0x107   : > { %v1188_v50 = vadd.f32 %v1187_v31, %v1098_v28  ;;  %v6339_v28 = vsel %vm416_vm1, %v603_v17, %v607_v43  ;;  %v5410_v31 = vld [vmem:[%s5949_s17 + $0xc0] sm:$0xff]  ;;  %v396_v4 = vunpack.c.l.b16 %v250_v59  ;;  %v5458_v43 = vld [vmem:[%s8487_s1 + $0x174] sm:$0xf]  ;;  %v4875_v17 = vld [vmem:[%s8487_s1 + $0x178] sm:$0xf0] }
 0x108   : > { %8630 = vst [vmem:[#allocation34_spill] sm:$0xff] %v6325_v23  ;;  %v6335_v23 = vsel %vm651_vm0, %v697_v9, %v698_v53  ;;  %v612_v9 = vshll.u32 %v5410_v31, 16 }
 0x109   : > { %8633 = vst [vmem:[#allocation37_spill] sm:$0xff] %v6335_v23 }
 0x10a   : > { %v6329_v52 = vpop.f32.mrf.mxu3  ;;  %8634 = vst [vmem:[#allocation38_spill] sm:$0xff] %v6339_v28 }
 0x10b   : > { %8631 = vst [vmem:[#allocation35_spill] sm:$0xff] %v6329_v52  ;;  %v1101_v21 = vpop.f32.mrf.mxu0  ;;  %v6382_v52 = vld [vmem:[%s5949_s17] sm:$0xff] }
 0x10d   : > { %v1276_v10 = vpop.f32.mrf.mxu2 }
 0x10e   : > { %v6331_v47 = vadd.f32 %v1276_v10, %v1188_v50  ;;  %1140 = vmatmul.bf16.gmra.mxu0 %v6317_v37  ;;  %v1190_v14 = vpop.f32.mrf.mxu1  ;;  %v5442_v10 = vld [vmem:[%s8487_s1 + $0xf4] sm:$0xf]  ;;  %v414_v50 = vpack.c.b16 %v396_v4, %v396_v4 }
 0x10f   : > { %v1191_v48 = vadd.f32 %v1190_v14, %v1101_v21  ;;  %1407 = vmatmul.bf16.gmra.mxu3 %v6317_v37  ;;  %v4814_v53 = vor.u32 %v5442_v10, %v4811_v38  ;;  %v4878_v14 = vor.u32 %v5458_v43, %v4875_v17  ;;  %v5426_v37 = vld [vmem:[%s8487_s1 + $0x74] sm:$0xf]  ;;  %v610_v38 = vshrl.u32 %v5410_v31, 16  ;;  %v4873_v43 = vld [vmem:[%s8487_s1 + $0x170] sm:$0xf] }
 0x110   : > { %8632 = vst [vmem:[#allocation36_spill] sm:$0xff] %v6331_v47  ;;  %v700_v17 = vrot.slane %v5410_v31, 1 }
 0x111   : > { %1229 = vmatmul.bf16.gmra.mxu1 %v6339_v28  ;;  %2192 = vmatpush.bf16.msra.mxu2 %v4814_v53  ;;  %v614_v28 = vrot.slane %v612_v9, 1 }
 0x112   : > { %1318 = vmatmul.bf16.gmra.mxu2 %v6335_v23  ;;  %v6354_v49 = vpop.f32.mrf.mxu3  ;;  %v4747_v23 = vld [vmem:[%s8487_s1 + $0x78] sm:$0xf0]  ;;  %2281 = vmatpush.bf16.msra.mxu3 %v4878_v14 }
 0x113   : > { %8635 = vst [vmem:[#allocation39_spill] sm:$0xff] %v6354_v49  ;;  %v1103_v59 = vpop.f32.mrf.mxu0  ;;  %v4750_v4 = vor.u32 %v5426_v37, %v4747_v23  ;;  %v617_v49 = vshll.u32 %v414_v50, 16  ;;  %v202_v37 = vld [vmem:[%s5949_s17 + $0x8] sm:$0x1]  ;;  %v615_v9 = vor.u32 %v614_v28, %v610_v38 }
 0x114   : > { %v380_v40 = vunpack.c.l.b16 %v202_v37 }
 0x115   : > { %v1279_v16 = vpop.f32.mrf.mxu2  ;;  %2103 = vmatpush.bf16.msra.mxu1 %v4750_v4  ;;  %v619_v47 = vrot.slane %v617_v49, 1  ;;  %v420_v49 = vshll.u32 %v6382_v52, 16 }
 0x116   : > { %v6359_v21 = vadd.f32 %v1279_v16, %v1191_v48  ;;  %v1192_v10 = vpop.f32.mrf.mxu1  ;;  %v5459_v16 = vld [vmem:[%s8487_s1 + $0x174] sm:$0xf0]  ;;  %v6388_v28 = vpack.c.b16 %v380_v40, %v380_v40 }
 0x117   : > { %v1193_v48 = vadd.f32 %v1192_v10, %v1103_v59  ;;  %v4874_v53 = vor.u32 %v5459_v16, %v4873_v43 }
 0x118   : > { %8636 = vst [vmem:[#allocation40_spill] sm:$0xff] %v6359_v21  ;;  %v701_v21 = vrot.slane %v414_v50, 1  ;;  %v6385_v50 = vsel %vm416_vm1, %v615_v9, %v619_v47  ;;  %v422_v47 = vrot.slane %v420_v49, 1  ;;  %v5440_v49 = vld [vmem:[%s8487_s1 + $0xe4] sm:$0xf] }
 0x119   : > { %2014 = vmatpush.bf16.msra.mxu0 %v4874_v53  ;;  %8638 = vst [vmem:[#allocation42_spill] sm:$0xff] %v6385_v50 }
 0x11a   : > { %v6374_v14 = vpop.f32.mrf.mxu3  ;;  %v6379_v10 = vsel %vm651_vm0, %v700_v17, %v701_v21  ;;  %v418_v17 = vshrl.u32 %v6382_v52, 16 }
 0x11b   : > { %v1106_v59 = vpop.f32.mrf.mxu0  ;;  %8637 = vst [vmem:[#allocation41_spill] sm:$0xff] %v6379_v10 }
 0x11d   : > { %v1281_v23 = vpop.f32.mrf.mxu2 }
 0x11e   : > { %v6376_v4 = vadd.f32 %v1281_v23, %v1193_v48  ;;  %1145 = vmatmul.bf16.gmra.mxu0 %v5410_v31  ;;  %v1195_v2 = vpop.f32.mrf.mxu1 }
 0x11f   : > { %v1196_v43 = vadd.f32 %v1195_v2, %v1106_v59  ;;  %1412 = vmatmul.bf16.gmra.mxu3 %v5410_v31  ;;  %v425_v2 = vshll.u32 %v6388_v28, 16  ;;  %v423_v31 = vor.u32 %v422_v47, %v418_v17  ;;  %v5456_v17 = vld [vmem:[%s8487_s1 + $0x164] sm:$0xf] }
 0x121   : > { %1234 = vmatmul.bf16.gmra.mxu1 %v6385_v50  ;;  %v427_v40 = vrot.slane %v425_v2, 1 }
 0x122   : > { %1323 = vmatmul.bf16.gmra.mxu2 %v6379_v10  ;;  %v6392_v38 = vpop.f32.mrf.mxu3 }
 0x123   : > { %v1108_v16 = vpop.f32.mrf.mxu0  ;;  %v6403_v50 = vsel %vm416_vm1, %v423_v31, %v427_v40 }
 0x125   : > { %v1284_v21 = vpop.f32.mrf.mxu2 }
 0x126   : > { %v6394_v48 = vadd.f32 %v1284_v21, %v1196_v43  ;;  %v1197_v53 = vpop.f32.mrf.mxu1 }
 0x127   : > { %v1198_v37 = vadd.f32 %v1197_v53, %v1108_v16  ;;  %v4803_v16 = vld [vmem:[%s8487_s1 + $0xe8] sm:$0xf0] }
 0x128   : > { %v4806_v2 = vor.u32 %v5440_v49, %v4803_v16  ;;  %v4867_v53 = vld [vmem:[%s8487_s1 + $0x168] sm:$0xf0] }
 0x129   : > { %v4870_v40 = vor.u32 %v5456_v17, %v4867_v53  ;;  %v5457_v17 = vld [vmem:[%s8487_s1 + $0x164] sm:$0xf0] }
 0x12a   : > { %v6398_v9 = vpop.f32.mrf.mxu3  ;;  %2193 = vmatpush.bf16.msra.mxu2 %v4806_v2 }
 0x12b   : > { %v1111_v10 = vpop.f32.mrf.mxu0  ;;  %2282 = vmatpush.bf16.msra.mxu3 %v4870_v40  ;;  %v6443_v40 = vld [vmem:[%s5949_s17 + $0xc] sm:$0xff] }
 0x12c   : > { %8642 = vst [vmem:[#allocation46_spill] sm:$0xff] %v6443_v40 }
 0x12d   : > { %v1286_v23 = vpop.f32.mrf.mxu2 }
 0x12e   : > { %v6400_v59 = vadd.f32 %v1286_v23, %v1198_v37  ;;  %1426 = vmatmul.bf16.vlgmr.msrb.gmra.mxu0 %v5972_v60  ;;  %v1200_v43 = vpop.f32.mrf.mxu1  ;;  %v5424_v23 = vld [vmem:[%s8487_s1 + $0x64] sm:$0xf] }
 0x12f   : > { %v1201_v21 = vadd.f32 %v1200_v43, %v1111_v10  ;;  %1933 = vmatmul.bf16.vlgmr.msrb.gmra.mxu3 %v6403_v50  ;;  %v4739_v43 = vld [vmem:[%s8487_s1 + $0x68] sm:$0xf0] }
 0x131   : > { %1515 = vmatmul.bf16.vlgmr.msrb.gmra.mxu1 %v5968_v58  ;;  %v4742_v58 = vor.u32 %v5424_v23, %v4739_v43 }
 0x132   : > { %1844 = vmatmul.bf16.vlgmr.msrb.gmra.mxu2 %v6382_v52  ;;  %v6418_v10 = vpop.f32.mrf.mxu3 }
 0x133   : > { %v1113_v31 = vpop.f32.mrf.mxu0  ;;  %2104 = vmatpush.bf16.msra.mxu1 %v4742_v58 }
 0x135   : > { %v1289_v47 = vpop.f32.mrf.mxu2 }
 0x136   : > { %v6423_v37 = vadd.f32 %v1289_v47, %v1201_v21  ;;  %v1202_v49 = vpop.f32.mrf.mxu1  ;;  %v4865_v21 = vld [vmem:[%s8487_s1 + $0x160] sm:$0xf] }
 0x137   : > { %v1203_v16 = vadd.f32 %v1202_v49, %v1113_v31  ;;  %v4866_v47 = vor.u32 %v5457_v17, %v4865_v21 }
 0x138   : > { %8639 = vst [vmem:[#allocation43_spill] sm:$0xff] %v6423_v37 }
 0x139   : > { %2015 = vmatpush.bf16.msra.mxu0 %v4866_v47 }
 0x13a   : > { %v6437_v37 = vpop.f32.mrf.mxu3 }
 0x13b   : > { %8640 = vst [vmem:[#allocation44_spill] sm:$0xff] %v6437_v37  ;;  %v1116_v23 = vpop.f32.mrf.mxu0  ;;  %v6458_v37 = vld [vmem:[%s5949_s17 + $0x18] sm:$0xff] }
 0x13c   : > { %8644 = vst [vmem:[#allocation48_spill] sm:$0xff] %v6458_v37 }
 0x13d   : > { %v1291_v53 = vpop.f32.mrf.mxu2 }
 0x13e   : > { %v6439_v2 = vadd.f32 %v1291_v53, %v1203_v16  ;;  %1431 = vmatmul.bf16.gmra.mxu0 %v6004_v20  ;;  %v1205_v58 = vpop.f32.mrf.mxu1 }
 0x13f   : > { %v1206_v31 = vadd.f32 %v1205_v58, %v1116_v23  ;;  %1938 = vmatmul.bf16.gmra.mxu3 %v5972_v60 }
 0x140   : > { %8641 = vst [vmem:[#allocation45_spill] sm:$0xff] %v6439_v2 }
 0x141   : > { %1520 = vmatmul.bf16.gmra.mxu1 %v6001_v19  ;;  %v4731_v19 = vld [vmem:[%s8487_s1 + $0x58] sm:$0xf0] }
 0x142   : > { %1849 = vmatmul.bf16.gmra.mxu2 %v6443_v40  ;;  %v6448_v49 = vpop.f32.mrf.mxu3 }
 0x143   : > { %v1118_v16 = vpop.f32.mrf.mxu0 }
 0x145   : > { %v1294_v43 = vpop.f32.mrf.mxu2 }
 0x146   : > { %v6450_v21 = vadd.f32 %v1294_v43, %v1206_v31  ;;  %v1207_v17 = vpop.f32.mrf.mxu1  ;;  %v5438_v31 = vld [vmem:[%s8487_s1 + $0xd4] sm:$0xf]  ;;  %v4795_v43 = vld [vmem:[%s8487_s1 + $0xd8] sm:$0xf0] }
 0x147   : > { %v1208_v47 = vadd.f32 %v1207_v17, %v1118_v16 }
 0x14a   : > { %v6452_v2 = vpop.f32.mrf.mxu3 }
 0x14b   : > { %v1121_v58 = vpop.f32.mrf.mxu0 }
 0x14d   : > { %v1296_v53 = vpop.f32.mrf.mxu2 }
 0x14e   : > { %v6454_v23 = vadd.f32 %v1296_v53, %v1208_v47  ;;  %1436 = vmatmul.bf16.gmra.mxu0 %v6015_v35  ;;  %v1210_v40 = vpop.f32.mrf.mxu1  ;;  %v4798_v47 = vor.u32 %v5438_v31, %v4795_v43  ;;  %v4859_v53 = vld [vmem:[%s8487_s1 + $0x158] sm:$0xf0] }
 0x14f   : > { %v1211_v60 = vadd.f32 %v1210_v40, %v1121_v58  ;;  %1943 = vmatmul.bf16.gmra.mxu3 %v6004_v20  ;;  %v5454_v40 = vld [vmem:[%s8487_s1 + $0x154] sm:$0xf] }
 0x150   : > { %8643 = vst [vmem:[#allocation47_spill] sm:$0xff] %v6454_v23  ;;  %v5422_v20 = vld [vmem:[%s8487_s1 + $0x54] sm:$0xf]  ;;  %2194 = vmatpush.bf16.msra.mxu2 %v4798_v47 }
 0x151   : > { %1525 = vmatmul.bf16.gmra.mxu1 %v6011_v33  ;;  %v4734_v23 = vor.u32 %v5422_v20, %v4731_v19 }
 0x152   : > { %1854 = vmatmul.bf16.gmra.mxu2 %v6458_v37  ;;  %v6472_v17 = vpop.f32.mrf.mxu3  ;;  %v4862_v37 = vor.u32 %v5454_v40, %v4859_v53  ;;  %v5455_v40 = vld [vmem:[%s8487_s1 + $0x154] sm:$0xf0] }
 0x153   : > { %v1123_v33 = vpop.f32.mrf.mxu0  ;;  %2105 = vmatpush.bf16.msra.mxu1 %v4734_v23 }
 0x154   : > { %2283 = vmatpush.bf16.msra.mxu3 %v4862_v37  ;;  %v6497_v37 = vld [vmem:[%s5949_s17 + $0x24] sm:$0xff] }
 0x155   : > { %v1299_v16 = vpop.f32.mrf.mxu2  ;;  %8648 = vst [vmem:[#allocation52_spill] sm:$0xff] %v6497_v37 }
 0x156   : > { %v6477_v58 = vadd.f32 %v1299_v16, %v1211_v60  ;;  %v1212_v31 = vpop.f32.mrf.mxu1  ;;  %v4857_v60 = vld [vmem:[%s8487_s1 + $0x150] sm:$0xf] }
 0x157   : > { %v1213_v43 = vadd.f32 %v1212_v31, %v1123_v33  ;;  %v4858_v16 = vor.u32 %v5455_v40, %v4857_v60 }
 0x158   : > { %8645 = vst [vmem:[#allocation49_spill] sm:$0xff] %v6477_v58 }
 0x159   : > { %2016 = vmatpush.bf16.msra.mxu0 %v4858_v16 }
 0x15a   : > { %v6491_v58 = vpop.f32.mrf.mxu3 }
 0x15b   : > { %8646 = vst [vmem:[#allocation50_spill] sm:$0xff] %v6491_v58  ;;  %v1126_v19 = vpop.f32.mrf.mxu0  ;;  %v6512_v58 = vld [vmem:[%s5949_s17 + $0x30] sm:$0xff] }
 0x15c   : > { %8650 = vst [vmem:[#allocation54_spill] sm:$0xff] %v6512_v58 }
 0x15d   : > { %v1301_v53 = vpop.f32.mrf.mxu2 }
 0x15e   : > { %v6493_v47 = vadd.f32 %v1301_v53, %v1213_v43  ;;  %1441 = vmatmul.bf16.gmra.mxu0 %v6048_v62  ;;  %v1215_v20 = vpop.f32.mrf.mxu1 }
 0x15f   : > { %v1216_v33 = vadd.f32 %v1215_v20, %v1126_v19  ;;  %1948 = vmatmul.bf16.gmra.mxu3 %v6015_v35 }
 0x160   : > { %8647 = vst [vmem:[#allocation51_spill] sm:$0xff] %v6493_v47 }
 0x161   : > { %1530 = vmatmul.bf16.gmra.mxu1 %v6045_v61  ;;  %v4723_v61 = vld [vmem:[%s8487_s1 + $0x48] sm:$0xf0] }
 0x162   : > { %1859 = vmatmul.bf16.gmra.mxu2 %v6497_v37  ;;  %v6502_v31 = vpop.f32.mrf.mxu3 }
 0x163   : > { %v1128_v43 = vpop.f32.mrf.mxu0 }
 0x165   : > { %v1304_v23 = vpop.f32.mrf.mxu2 }
 0x166   : > { %v6504_v60 = vadd.f32 %v1304_v23, %v1216_v33  ;;  %v1217_v40 = vpop.f32.mrf.mxu1  ;;  %v5436_v33 = vld [vmem:[%s8487_s1 + $0xc4] sm:$0xf]  ;;  %v4787_v23 = vld [vmem:[%s8487_s1 + $0xc8] sm:$0xf0] }
 0x167   : > { %v1218_v16 = vadd.f32 %v1217_v40, %v1128_v43 }
 0x16a   : > { %v6506_v47 = vpop.f32.mrf.mxu3 }
 0x16b   : > { %v1131_v20 = vpop.f32.mrf.mxu0 }
 0x16d   : > { %v1306_v53 = vpop.f32.mrf.mxu2 }
 0x16e   : > { %v6508_v19 = vadd.f32 %v1306_v53, %v1218_v16  ;;  %1446 = vmatmul.bf16.gmra.mxu0 %v6059_v13  ;;  %v1220_v37 = vpop.f32.mrf.mxu1  ;;  %v4790_v16 = vor.u32 %v5436_v33, %v4787_v23  ;;  %v4851_v53 = vld [vmem:[%s8487_s1 + $0x148] sm:$0xf0] }
 0x16f   : > { %v1221_v35 = vadd.f32 %v1220_v37, %v1131_v20  ;;  %1953 = vmatmul.bf16.gmra.mxu3 %v6048_v62  ;;  %v5452_v37 = vld [vmem:[%s8487_s1 + $0x144] sm:$0xf] }
 0x170   : > { %8649 = vst [vmem:[#allocation53_spill] sm:$0xff] %v6508_v19  ;;  %v5420_v62 = vld [vmem:[%s8487_s1 + $0x44] sm:$0xf]  ;;  %2195 = vmatpush.bf16.msra.mxu2 %v4790_v16 }
 0x171   : > { %1535 = vmatmul.bf16.gmra.mxu1 %v6055_v11  ;;  %v4726_v19 = vor.u32 %v5420_v62, %v4723_v61 }
 0x172   : > { %1864 = vmatmul.bf16.gmra.mxu2 %v6512_v58  ;;  %v6526_v40 = vpop.f32.mrf.mxu3  ;;  %v4854_v58 = vor.u32 %v5452_v37, %v4851_v53  ;;  %v5453_v37 = vld [vmem:[%s8487_s1 + $0x144] sm:$0xf0] }
 0x173   : > { %v1133_v11 = vpop.f32.mrf.mxu0  ;;  %2106 = vmatpush.bf16.msra.mxu1 %v4726_v19 }
 0x174   : > { %2284 = vmatpush.bf16.msra.mxu3 %v4854_v58  ;;  %v6551_v58 = vld [vmem:[%s5949_s17 + $0x3c] sm:$0xff] }
 0x175   : > { %v1309_v43 = vpop.f32.mrf.mxu2  ;;  %8654 = vst [vmem:[#allocation58_spill] sm:$0xff] %v6551_v58 }
 0x176   : > { %v6531_v20 = vadd.f32 %v1309_v43, %v1221_v35  ;;  %v1222_v33 = vpop.f32.mrf.mxu1  ;;  %v4849_v35 = vld [vmem:[%s8487_s1 + $0x140] sm:$0xf] }
 0x177   : > { %v1223_v23 = vadd.f32 %v1222_v33, %v1133_v11  ;;  %v4850_v43 = vor.u32 %v5453_v37, %v4849_v35 }
 0x178   : > { %8651 = vst [vmem:[#allocation55_spill] sm:$0xff] %v6531_v20 }
 0x179   : > { %2017 = vmatpush.bf16.msra.mxu0 %v4850_v43 }
 0x17a   : > { %v6545_v20 = vpop.f32.mrf.mxu3 }
 0x17b   : > { %8652 = vst [vmem:[#allocation56_spill] sm:$0xff] %v6545_v20  ;;  %v1136_v61 = vpop.f32.mrf.mxu0  ;;  %v6566_v20 = vld [vmem:[%s5949_s17 + $0x48] sm:$0xff] }
 0x17c   : > { %8655 = vst [vmem:[#allocation59_spill] sm:$0xff] %v6566_v20 }
 0x17d   : > { %v1311_v53 = vpop.f32.mrf.mxu2 }
 0x17e   : > { %v6547_v16 = vadd.f32 %v1311_v53, %v1223_v23  ;;  %1451 = vmatmul.bf16.gmra.mxu0 %v6092_v42  ;;  %v1225_v62 = vpop.f32.mrf.mxu1 }
 0x17f   : > { %v1226_v11 = vadd.f32 %v1225_v62, %v1136_v61  ;;  %1958 = vmatmul.bf16.gmra.mxu3 %v6059_v13 }
 0x180   : > { %8653 = vst [vmem:[#allocation57_spill] sm:$0xff] %v6547_v16 }
 0x181   : > { %1540 = vmatmul.bf16.gmra.mxu1 %v6089_v41  ;;  %v4715_v41 = vld [vmem:[%s8487_s1 + $0x38] sm:$0xf0] }
 0x182   : > { %1869 = vmatmul.bf16.gmra.mxu2 %v6551_v58  ;;  %v6556_v33 = vpop.f32.mrf.mxu3 }
 0x183   : > { %v1138_v23 = vpop.f32.mrf.mxu0 }
 0x185   : > { %v1314_v19 = vpop.f32.mrf.mxu2 }
 0x186   : > { %v6558_v35 = vadd.f32 %v1314_v19, %v1226_v11  ;;  %v1227_v37 = vpop.f32.mrf.mxu1  ;;  %v5434_v11 = vld [vmem:[%s8487_s1 + $0xb4] sm:$0xf]  ;;  %v4779_v19 = vld [vmem:[%s8487_s1 + $0xb8] sm:$0xf0] }
 0x187   : > { %v1228_v43 = vadd.f32 %v1227_v37, %v1138_v23 }
 0x18a   : > { %v6560_v16 = vpop.f32.mrf.mxu3 }
 0x18b   : > { %v1141_v62 = vpop.f32.mrf.mxu0 }
 0x18d   : > { %v1316_v53 = vpop.f32.mrf.mxu2 }
 0x18e   : > { %v6562_v61 = vadd.f32 %v1316_v53, %v1228_v43  ;;  %1456 = vmatmul.bf16.gmra.mxu0 %v6102_v56  ;;  %v1230_v58 = vpop.f32.mrf.mxu1  ;;  %v4782_v43 = vor.u32 %v5434_v11, %v4779_v19  ;;  %v4843_v53 = vld [vmem:[%s8487_s1 + $0x138] sm:$0xf0] }
 0x18f   : > { %v1231_v13 = vadd.f32 %v1230_v58, %v1141_v62  ;;  %1963 = vmatmul.bf16.gmra.mxu3 %v6092_v42  ;;  %v5450_v58 = vld [vmem:[%s8487_s1 + $0x134] sm:$0xf] }
 0x190   : > { %2196 = vmatpush.bf16.msra.mxu2 %v4782_v43  ;;  %v5418_v42 = vld [vmem:[%s8487_s1 + $0x34] sm:$0xf] }
 0x191   : > { %1545 = vmatmul.bf16.gmra.mxu1 %v6099_v55  ;;  %v4718_v19 = vor.u32 %v5418_v42, %v4715_v41 }
 0x192   : > { %1874 = vmatmul.bf16.gmra.mxu2 %v6566_v20  ;;  %v6580_v37 = vpop.f32.mrf.mxu3  ;;  %v4846_v20 = vor.u32 %v5450_v58, %v4843_v53 }
 0x193   : > { %8656 = vst [vmem:[#allocation60_spill] sm:$0xff] %v6580_v37  ;;  %v1143_v55 = vpop.f32.mrf.mxu0  ;;  %2107 = vmatpush.bf16.msra.mxu1 %v4718_v19 }
 0x194   : > { %2285 = vmatpush.bf16.msra.mxu3 %v4846_v20  ;;  %v5451_v20 = vld [vmem:[%s8487_s1 + $0x134] sm:$0xf0] }
 0x195   : > { %v1319_v23 = vpop.f32.mrf.mxu2 }
 0x196   : > { %v6585_v62 = vadd.f32 %v1319_v23, %v1231_v13  ;;  %v1232_v11 = vpop.f32.mrf.mxu1  ;;  %v4841_v13 = vld [vmem:[%s8487_s1 + $0x130] sm:$0xf] }
 0x197   : > { %v1233_v37 = vadd.f32 %v1232_v11, %v1143_v55  ;;  %v4842_v58 = vor.u32 %v5451_v20, %v4841_v13  ;;  %v6605_v55 = vld [vmem:[%s5949_s17 + $0x54] sm:$0xff] }
 0x198   : > { %8657 = vst [vmem:[#allocation61_spill] sm:$0xff] %v6585_v62 }
 0x199   : > { %2018 = vmatpush.bf16.msra.mxu0 %v4842_v58  ;;  %8660 = vst [vmem:[#allocation64_spill] sm:$0xff] %v6605_v55 }
 0x19a   : > { %v6599_v43 = vpop.f32.mrf.mxu3 }
 0x19b   : > { %8658 = vst [vmem:[#allocation62_spill] sm:$0xff] %v6599_v43  ;;  %v1146_v62 = vpop.f32.mrf.mxu0  ;;  %v6623_v43 = vld [vmem:[%s5949_s17 + $0x60] sm:$0xff] }
 0x19c   : > { %8662 = vst [vmem:[#allocation66_spill] sm:$0xff] %v6623_v43 }
 0x19d   : > { %v1321_v23 = vpop.f32.mrf.mxu2 }
 0x19e   : > { %v6601_v53 = vadd.f32 %v1321_v23, %v1233_v37  ;;  %1461 = vmatmul.bf16.gmra.mxu0 %v6136_v26  ;;  %v1235_v41 = vpop.f32.mrf.mxu1 }
 0x19f   : > { %v1236_v42 = vadd.f32 %v1235_v41, %v1146_v62  ;;  %1968 = vmatmul.bf16.gmra.mxu3 %v6102_v56 }
 0x1a0   : > { %8659 = vst [vmem:[#allocation63_spill] sm:$0xff] %v6601_v53 }
 0x1a1   : > { %1550 = vmatmul.bf16.gmra.mxu1 %v6133_v25 }
 0x1a2   : > { %1879 = vmatmul.bf16.gmra.mxu2 %v6605_v55  ;;  %v6610_v19 = vpop.f32.mrf.mxu3 }
 0x1a3   : > { %v1148_v37 = vpop.f32.mrf.mxu0 }
 0x1a5   : > { %v1324_v11 = vpop.f32.mrf.mxu2 }
 0x1a6   : > { %v6612_v13 = vadd.f32 %v1324_v11, %v1236_v42  ;;  %v1237_v20 = vpop.f32.mrf.mxu1  ;;  %v5432_v42 = vld [vmem:[%s8487_s1 + $0xa4] sm:$0xf] }
 0x1a7   : > { %v1238_v58 = vadd.f32 %v1237_v20, %v1148_v37  ;;  %v4835_v20 = vld [vmem:[%s8487_s1 + $0x128] sm:$0xf0] }
 0x1aa   : > { %v6614_v53 = vpop.f32.mrf.mxu3 }
 0x1ab   : > { %v1427_v41 = vpop.f32.mrf.mxu0 }
 0x1ac   : > { %v1428_v55 = vadd.f32 %v1427_v41, %v6160_v54  ;;  %v4771_v54 = vld [vmem:[%s8487_s1 + $0xa8] sm:$0xf0] }
 0x1ad   : > { %v1326_v23 = vpop.f32.mrf.mxu2  ;;  %v4774_v37 = vor.u32 %v5432_v42, %v4771_v54  ;;  %v4707_v42 = vld [vmem:[%s8487_s1 + $0x28] sm:$0xf0] }
 0x1ae   : > { %v6616_v62 = vadd.f32 %v1326_v23, %v1238_v58  ;;  %1466 = vmatmul.bf16.gmra.mxu0 %v6146_v46  ;;  %v1516_v56 = vpop.f32.mrf.mxu1 }
 0x1af   : > { %v6620_v25 = vadd.f32 %v1516_v56, %v1428_v55  ;;  %1973 = vmatmul.bf16.gmra.mxu3 %v6136_v26  ;;  %v5448_v56 = vld [vmem:[%s8487_s1 + $0x124] sm:$0xf]  ;;  %2197 = vmatpush.bf16.msra.mxu2 %v4774_v37 }
 0x1b0   : > { %v4838_v41 = vor.u32 %v5448_v56, %v4835_v20  ;;  %v5449_v56 = vld [vmem:[%s8487_s1 + $0x124] sm:$0xf0] }
 0x1b1   : > { %8661 = vst [vmem:[#allocation65_spill] sm:$0xff] %v6620_v25  ;;  %1555 = vmatmul.bf16.gmra.mxu1 %v6143_v44  ;;  %v5416_v25 = vld [vmem:[%s8487_s1 + $0x24] sm:$0xf] }
 0x1b2   : > { %1884 = vmatmul.bf16.gmra.mxu2 %v6623_v43  ;;  %v1934_v11 = vpop.f32.mrf.mxu3  ;;  %2286 = vmatpush.bf16.msra.mxu3 %v4838_v41  ;;  %v4710_v26 = vor.u32 %v5416_v25, %v4707_v42  ;;  %v6666_v42 = vld [vmem:[%s5949_s17 + $0x6c] sm:$0xff] }
 0x1b3   : > { %v1429_v23 = vpop.f32.mrf.mxu0 }
 0x1b4   : > { %v1430_v44 = vadd.f32 %v1429_v23, %v6179_v22  ;;  %v4833_v22 = vld [vmem:[%s8487_s1 + $0x120] sm:$0xf]  ;;  %2108 = vmatpush.bf16.msra.mxu1 %v4710_v26 }
 0x1b5   : > { %v1845_v55 = vpop.f32.mrf.mxu2 }
 0x1b6   : > { %v1846_v58 = vadd.f32 %v1845_v55, %v6165_v1  ;;  %v1518_v54 = vpop.f32.mrf.mxu1  ;;  %v4834_v55 = vor.u32 %v5449_v56, %v4833_v22 }
 0x1b7   : > { %v6650_v1 = vadd.f32 %v1518_v54, %v1430_v44 }
 0x1b8   : > { %v6642_v43 = vadd.f32 %v1934_v11, %v1846_v58  ;;  %2019 = vmatpush.bf16.msra.mxu0 %v4834_v55 }
 0x1ba   : > { %v1936_v37 = vpop.f32.mrf.mxu3 }
 0x1bb   : > { %v1432_v58 = vpop.f32.mrf.mxu0 }
 0x1bc   : > { %v1433_v25 = vadd.f32 %v1432_v58, %v6193_v39 }
 0x1bd   : > { %v1847_v11 = vpop.f32.mrf.mxu2 }
 0x1be   : > { %v1848_v20 = vadd.f32 %v1847_v11, %v6181_v27  ;;  %1471 = vmatmul.bf16.gmra.mxu0 %v6188_v32  ;;  %v1521_v23 = vpop.f32.mrf.mxu1 }
 0x1bf   : > { %v6663_v41 = vadd.f32 %v1521_v23, %v1433_v25  ;;  %1978 = vmatmul.bf16.gmra.mxu3 %v6146_v46 }
 0x1c0   : > { %v6660_v44 = vadd.f32 %v1936_v37, %v1848_v20 }
 0x1c1   : > { %1560 = vmatmul.bf16.gmra.mxu1 %v6185_v30 }
 0x1c2   : > { %1889 = vmatmul.bf16.gmra.mxu2 %v6666_v42  ;;  %v1939_v27 = vpop.f32.mrf.mxu3 }
 0x1c3   : > { %v1434_v54 = vpop.f32.mrf.mxu0 }
 0x1c4   : > { %v1435_v22 = vadd.f32 %v1434_v54, %v6197_v63  ;;  %v6685_v63 = vld [vmem:[%s5949_s17 + $0x78] sm:$0xff] }
 0x1c5   : > { %v1850_v26 = vpop.f32.mrf.mxu2 }
 0x1c6   : > { %v1851_v39 = vadd.f32 %v1850_v26, %v6195_v45  ;;  %v1523_v55 = vpop.f32.mrf.mxu1 }
 0x1c7   : > { %v6675_v11 = vadd.f32 %v1523_v55, %v1435_v22  ;;  %v4827_v55 = vld [vmem:[%s8487_s1 + $0x118] sm:$0xf0] }
 0x1c8   : > { %v6673_v56 = vadd.f32 %v1939_v27, %v1851_v39  ;;  %v5446_v27 = vld [vmem:[%s8487_s1 + $0x114] sm:$0xf] }
 0x1ca   : > { %v1941_v20 = vpop.f32.mrf.mxu3 }
 0x1cb   : > { %v1437_v25 = vpop.f32.mrf.mxu0 }
 0x1cc   : > { %v1438_v23 = vadd.f32 %v1437_v25, %v6220_v18  ;;  %v4763_v18 = vld [vmem:[%s8487_s1 + $0x98] sm:$0xf0] }
 0x1cd   : > { %v1852_v37 = vpop.f32.mrf.mxu2 }
 0x1ce   : > { %v1853_v58 = vadd.f32 %v1852_v37, %v6199_v3  ;;  %1476 = vmatmul.bf16.gmra.mxu0 %v6206_v8  ;;  %v1526_v45 = vpop.f32.mrf.mxu1  ;;  %v5430_v3 = vld [vmem:[%s8487_s1 + $0x94] sm:$0xf] }
 0x1cf   : > { %v6682_v26 = vadd.f32 %v1526_v45, %v1438_v23  ;;  %1983 = vmatmul.bf16.gmra.mxu3 %v6188_v32  ;;  %v4766_v22 = vor.u32 %v5430_v3, %v4763_v18  ;;  %v5414_v45 = vld [vmem:[%s8487_s1 + $0x14] sm:$0xf]  ;;  %v4699_v3 = vld [vmem:[%s8487_s1 + $0x18] sm:$0xf0] }
 0x1d0   : > { %v6679_v30 = vadd.f32 %v1941_v20, %v1853_v58  ;;  %v4830_v58 = vor.u32 %v5446_v27, %v4827_v55  ;;  %v5447_v27 = vld [vmem:[%s8487_s1 + $0x114] sm:$0xf0] }
 0x1d1   : > { %1565 = vmatmul.bf16.gmra.mxu1 %v6203_v6  ;;  %2198 = vmatpush.bf16.msra.mxu2 %v4766_v22  ;;  %v4702_v6 = vor.u32 %v5414_v45, %v4699_v3  ;;  %v6728_v3 = vld [vmem:[%s5949_s17 + $0x84] sm:$0xff] }
 0x1d2   : > { %1894 = vmatmul.bf16.gmra.mxu2 %v6685_v63  ;;  %v1944_v54 = vpop.f32.mrf.mxu3  ;;  %2287 = vmatpush.bf16.msra.mxu3 %v4830_v58 }
 0x1d3   : > { %v1439_v20 = vpop.f32.mrf.mxu0  ;;  %2109 = vmatpush.bf16.msra.mxu1 %v4702_v6 }
 0x1d4   : > { %v1440_v25 = vadd.f32 %v1439_v20, %v6239_v0  ;;  %v4825_v0 = vld [vmem:[%s8487_s1 + $0x110] sm:$0xf] }
 0x1d5   : > { %v1855_v39 = vpop.f32.mrf.mxu2 }
 0x1d6   : > { %v1856_v37 = vadd.f32 %v1855_v39, %v6225_v29  ;;  %v1528_v18 = vpop.f32.mrf.mxu1  ;;  %v4826_v39 = vor.u32 %v5447_v27, %v4825_v0 }
 0x1d7   : > { %v6712_v29 = vadd.f32 %v1528_v18, %v1440_v25 }
 0x1d8   : > { %v6704_v23 = vadd.f32 %v1944_v54, %v1856_v37  ;;  %2020 = vmatpush.bf16.msra.mxu0 %v4826_v39 }
 0x1da   : > { %v1946_v22 = vpop.f32.mrf.mxu3 }
 0x1db   : > { %v1442_v37 = vpop.f32.mrf.mxu0 }
 0x1dc   : > { %v1443_v20 = vadd.f32 %v1442_v37, %v6253_v24 }
 0x1dd   : > { %v1857_v54 = vpop.f32.mrf.mxu2 }
 0x1de   : > { %v1858_v55 = vadd.f32 %v1857_v54, %v6241_v5  ;;  %1481 = vmatmul.bf16.gmra.mxu0 %v6248_v15  ;;  %v1531_v25 = vpop.f32.mrf.mxu1 }
 0x1df   : > { %v6725_v45 = vadd.f32 %v1531_v25, %v1443_v20  ;;  %1988 = vmatmul.bf16.gmra.mxu3 %v6206_v8 }
 0x1e0   : > { %v6722_v58 = vadd.f32 %v1946_v22, %v1858_v55 }
 0x1e1   : > { %1570 = vmatmul.bf16.gmra.mxu1 %v6245_v12 }
 0x1e2   : > { %1899 = vmatmul.bf16.gmra.mxu2 %v6728_v3  ;;  %v1949_v5 = vpop.f32.mrf.mxu3 }
 0x1e3   : > { %v1444_v18 = vpop.f32.mrf.mxu0 }
 0x1e4   : > { %v1445_v0 = vadd.f32 %v1444_v18, %v6257_v51  ;;  %v6747_v51 = vld [vmem:[%s5949_s17 + $0x90] sm:$0xff] }
 0x1e5   : > { %v1860_v6 = vpop.f32.mrf.mxu2  ;;  %8667 = vst [vmem:[#allocation71_spill] sm:$0xff] %v6747_v51 }
 0x1e6   : > { %v1861_v24 = vadd.f32 %v1860_v6, %v6255_v34  ;;  %v1533_v39 = vpop.f32.mrf.mxu1 }
 0x1e7   : > { %v6737_v54 = vadd.f32 %v1533_v39, %v1445_v0 }
 0x1e8   : > { %v6735_v27 = vadd.f32 %v1949_v5, %v1861_v24  ;;  %v8668_v5 = vld [vmem:[#allocation24_spill] sm:$0xff]  ;;  %v5444_v24 = vld [vmem:[%s8487_s1 + $0x104] sm:$0xf] }
 0x1e9   : > { %8664 = vst [vmem:[#allocation68_spill] sm:$0xff] %v6737_v54 }
 0x1ea   : > { %8663 = vst [vmem:[#allocation67_spill] sm:$0xff] %v6735_v27  ;;  %v1951_v55 = vpop.f32.mrf.mxu3  ;;  %v8684_v27 = vld [vmem:[#allocation38_spill] sm:$0xff] }
 0x1eb   : > { %v1447_v20 = vpop.f32.mrf.mxu0 }
 0x1ec   : > { %v1448_v25 = vadd.f32 %v1447_v20, %v6282_v36  ;;  %v4755_v36 = vld [vmem:[%s8487_s1 + $0x88] sm:$0xf0] }
 0x1ed   : > { %v1862_v22 = vpop.f32.mrf.mxu2 }
 0x1ee   : > { %v1863_v37 = vadd.f32 %v1862_v22, %v6259_v57  ;;  %1486 = vmatmul.bf16.gmra.mxu0 %v6266_v7  ;;  %v1536_v34 = vpop.f32.mrf.mxu1  ;;  %v5428_v57 = vld [vmem:[%s8487_s1 + $0x84] sm:$0xf]  ;;  %v4819_v22 = vld [vmem:[%s8487_s1 + $0x108] sm:$0xf0] }
 0x1ef   : > { %v6744_v6 = vadd.f32 %v1536_v34, %v1448_v25  ;;  %1993 = vmatmul.bf16.gmra.mxu3 %v6248_v15  ;;  %v4758_v39 = vor.u32 %v5428_v57, %v4755_v36  ;;  %v4822_v25 = vor.u32 %v5444_v24, %v4819_v22  ;;  %v8670_v34 = vld [vmem:[#allocation28_spill] sm:$0xff]  ;;  %v4691_v57 = vld [vmem:[%s8487_s1 + $0x8] sm:$0xf0]  ;;  %v4817_v24 = vld [vmem:[%s8487_s1 + $0x100] sm:$0xf] }
 0x1f0   : > { %v6741_v12 = vadd.f32 %v1951_v55, %v1863_v37  ;;  %v8669_v55 = vld [vmem:[#allocation27_spill] sm:$0xff] }
 0x1f1   : > { %8666 = vst [vmem:[#allocation70_spill] sm:$0xff] %v6744_v6  ;;  %1575 = vmatmul.bf16.gmra.mxu1 %v8668_v5  ;;  %2199 = vmatpush.bf16.msra.mxu2 %v4758_v39  ;;  %v5412_v6 = vld [vmem:[%s8487_s1 + $0x4] sm:$0xf] }
 0x1f2   : > { %8665 = vst [vmem:[#allocation69_spill] sm:$0xff] %v6741_v12  ;;  %1904 = vmatmul.bf16.gmra.mxu2 %v6747_v51  ;;  %v1954_v0 = vpop.f32.mrf.mxu3  ;;  %2288 = vmatpush.bf16.msra.mxu3 %v4822_v25  ;;  %v4694_v15 = vor.u32 %v5412_v6, %v4691_v57  ;;  %v8674_v6 = vld [vmem:[#allocation33_spill] sm:$0xff]  ;;  %v8676_v57 = vld [vmem:[#allocation31_spill] sm:$0xff] }
 0x1f3   : > { %v1449_v20 = vpop.f32.mrf.mxu0 }
 0x1f4   : > { %v1450_v5 = vadd.f32 %v1449_v20, %v8670_v34  ;;  %2110 = vmatpush.bf16.msra.mxu1 %v4694_v15  ;;  %v8679_v15 = vld [vmem:[#allocation30_spill] sm:$0xff] }
 0x1f5   : > { %v1865_v18 = vpop.f32.mrf.mxu2 }
 0x1f6   : > { %v1866_v37 = vadd.f32 %v1865_v18, %v8669_v55  ;;  %v1538_v36 = vpop.f32.mrf.mxu1 }
 0x1f7   : > { %v6774_v18 = vadd.f32 %v1538_v36, %v1450_v5 }
 0x1f8   : > { %v6766_v51 = vadd.f32 %v1954_v0, %v1866_v37  ;;  %v5445_v0 = vld [vmem:[%s8487_s1 + $0x104] sm:$0xf0]  ;;  %v8673_v37 = vld [vmem:[#allocation29_spill] sm:$0xff] }
 0x1f9   : > { %8672 = vst [vmem:[#allocation28_spill] sm:$0xff] %v6774_v18  ;;  %v4818_v39 = vor.u32 %v5445_v0, %v4817_v24 }
 0x1fa   : > { %8671 = vst [vmem:[#allocation27_spill] sm:$0xff] %v6766_v51  ;;  %v1956_v55 = vpop.f32.mrf.mxu3  ;;  %v6790_v51 = vld [vmem:[%s5949_s17 + $0x9c] sm:$0xff] }
 0x1fb   : > { %2021 = vmatpush.bf16.msra.mxu0 %v4818_v39  ;;  %v1452_v25 = vpop.f32.mrf.mxu0  ;;  %8678 = vst [vmem:[#allocation72_spill] sm:$0xff] %v6790_v51  ;;  %v8680_v39 = vld [vmem:[#allocation34_spill] sm:$0xff] }
 0x1fc   : > { %v1453_v34 = vadd.f32 %v1452_v25, %v8674_v6 }
 0x1fd   : > { %v1867_v22 = vpop.f32.mrf.mxu2 }
 0x1fe   : > { %v1868_v20 = vadd.f32 %v1867_v22, %v8673_v37  ;;  %1491 = vmatmul.bf16.gmra.mxu0 %v8676_v57  ;;  %v1541_v36 = vpop.f32.mrf.mxu1 }
 0x1ff   : > { %v6787_v18 = vadd.f32 %v1541_v36, %v1453_v34  ;;  %1998 = vmatmul.bf16.gmra.mxu3 %v6266_v7  ;;  %v8683_v7 = vld [vmem:[#allocation39_spill] sm:$0xff] }
 0x200   : > { %v6784_v5 = vadd.f32 %v1956_v55, %v1868_v20  ;;  %v8681_v55 = vld [vmem:[#allocation35_spill] sm:$0xff] }
 0x201   : > { %8677 = vst [vmem:[#allocation33_spill] sm:$0xff] %v6787_v18  ;;  %1580 = vmatmul.bf16.gmra.mxu1 %v8679_v15 }
 0x202   : > { %8675 = vst [vmem:[#allocation29_spill] sm:$0xff] %v6784_v5  ;;  %1909 = vmatmul.bf16.gmra.mxu2 %v6790_v51  ;;  %v1959_v0 = vpop.f32.mrf.mxu3  ;;  %v8682_v5 = vld [vmem:[#allocation36_spill] sm:$0xff] }
 0x203   : > { %v1454_v37 = vpop.f32.mrf.mxu0 }
 0x204   : > { %v1455_v20 = vadd.f32 %v1454_v37, %v8681_v55  ;;  %v8686_v37 = vld [vmem:[#allocation26_spill] sm:$0xff]  ;;  %v8688_v55 = vld [vmem:[#allocation40_spill] sm:$0xff] }
 0x205   : > { %v1870_v24 = vpop.f32.mrf.mxu2 }
 0x206   : > { %v1871_v22 = vadd.f32 %v1870_v24, %v8680_v39  ;;  %v1543_v6 = vpop.f32.mrf.mxu1 }
 0x207   : > { %v6799_v34 = vadd.f32 %v1543_v6, %v1455_v20 }
 0x208   : > { %v6797_v25 = vadd.f32 %v1959_v0, %v1871_v22  ;;  %v8687_v0 = vld [vmem:[#allocation37_spill] sm:$0xff] }
 0x209   : > { %v5035_v22 = vld [vmem:[%s8487_s1 + $0x4f8] sm:$0xf0] }
 0x20a   : > { %v1961_v18 = vpop.f32.mrf.mxu3 }
 0x20b   : > { %v1457_v12 = vpop.f32.mrf.mxu0 }
 0x20c   : > { %v1458_v54 = vadd.f32 %v1457_v12, %v8683_v7  ;;  %v5603_v12 = vld [vmem:[%s8487_s1 + $0x5f4] sm:$0xf0]  ;;  %v5570_v7 = vld [vmem:[%s8487_s1 + $0x4f4] sm:$0xf] }
 0x20d   : > { %v1872_v36 = vpop.f32.mrf.mxu2 }
 0x20e   : > { %v1873_v51 = vadd.f32 %v1872_v36, %v8682_v5  ;;  %1496 = vmatmul.bf16.gmra.mxu0 %v8684_v27  ;;  %v1546_v24 = vpop.f32.mrf.mxu1  ;;  %v5161_v5 = vld [vmem:[%s8487_s1 + $0x5f0] sm:$0xf]  ;;  %v5038_v36 = vor.u32 %v5570_v7, %v5035_v22  ;;  %v5571_v7 = vld [vmem:[%s8487_s1 + $0x4f4] sm:$0xf0] }
 0x20f   : > { %v6806_v39 = vadd.f32 %v1546_v24, %v1458_v54  ;;  %2003 = vmatmul.bf16.gmra.mxu3 %v8676_v57 }
 0x210   : > { %v6803_v15 = vadd.f32 %v1961_v18, %v1873_v51  ;;  %v5162_v18 = vor.u32 %v5603_v12, %v5161_v5  ;;  %3108 = vmatpush.bf16.msrb.mxu3 %v5038_v36  ;;  %v5587_v5 = vld [vmem:[%s8487_s1 + $0x574] sm:$0xf0] }
 0x211   : > { %8685 = vst [vmem:[#allocation34_spill] sm:$0xff] %v6806_v39  ;;  %1585 = vmatmul.bf16.gmra.mxu1 %v8687_v0  ;;  %v5097_v0 = vld [vmem:[%s8487_s1 + $0x570] sm:$0xf] }
 0x212   : > { %1914 = vmatmul.bf16.gmra.mxu2 %v8686_v37  ;;  %v1964_v51 = vpop.f32.mrf.mxu3  ;;  %v5098_v39 = vor.u32 %v5587_v5, %v5097_v0  ;;  %v8690_v5 = vld [vmem:[#allocation32_spill] sm:$0xff] }
 0x213   : > { %v1459_v6 = vpop.f32.mrf.mxu0  ;;  %3019 = vmatpush.bf16.msrb.mxu2 %v5162_v18 }
 0x214   : > { %v1460_v24 = vadd.f32 %v1459_v6, %v6374_v14  ;;  %v5033_v14 = vld [vmem:[%s8487_s1 + $0x4f0] sm:$0xf]  ;;  %2930 = vmatpush.bf16.msrb.mxu1 %v5098_v39  ;;  %v8689_v6 = vld [vmem:[#allocation42_spill] sm:$0xff]  ;;  %v8691_v39 = vld [vmem:[#allocation41_spill] sm:$0xff] }
 0x215   : > { %v1875_v54 = vpop.f32.mrf.mxu2 }
 0x216   : > { %v1876_v20 = vadd.f32 %v1875_v54, %v8688_v55  ;;  %v1548_v12 = vpop.f32.mrf.mxu1  ;;  %v5034_v54 = vor.u32 %v5571_v7, %v5033_v14 }
 0x217   : > { %v6833_v57 = vadd.f32 %v1548_v12, %v1460_v24 }
 0x218   : > { %v6825_v37 = vadd.f32 %v1964_v51, %v1876_v20  ;;  %2841 = vmatpush.bf16.msrb.mxu0 %v5034_v54 }
 0x21a   : > { %v1966_v18 = vpop.f32.mrf.mxu3 }
 0x21b   : > { %v1462_v55 = vpop.f32.mrf.mxu0 }
 0x21c   : > { %v1463_v0 = vadd.f32 %v1462_v55, %v6392_v38 }
 0x21d   : > { %v1877_v51 = vpop.f32.mrf.mxu2 }
 0x21e   : > { %v1878_v22 = vadd.f32 %v1877_v51, %v6376_v4  ;;  %1501 = vmatmul.bf16.gmra.mxu0 %v8689_v6  ;;  %v1551_v36 = vpop.f32.mrf.mxu1 }
 0x21f   : > { %v6846_v24 = vadd.f32 %v1551_v36, %v1463_v0  ;;  %2008 = vmatmul.bf16.gmra.mxu3 %v8684_v27 }
 0x220   : > { %v6843_v20 = vadd.f32 %v1966_v18, %v1878_v22  ;;  %v652_v18 = vrot.slane %v6382_v52, 1  ;;  %v653_v22 = vrot.slane %v6388_v28, 1  ;;  %v5153_v28 = vld [vmem:[%s8487_s1 + $0x5e0] sm:$0xf] }
 0x221   : > { %1590 = vmatmul.bf16.gmra.mxu1 %v8691_v39 }
 0x222   : > { %1919 = vmatmul.bf16.gmra.mxu2 %v8690_v5  ;;  %v1969_v14 = vpop.f32.mrf.mxu3  ;;  %v654_v5 = vsel %vm651_vm0, %v652_v18, %v653_v22  ;;  %v8693_v18 = vld [vmem:[#allocation44_spill] sm:$0xff] }
 0x223   : > { %v1464_v7 = vpop.f32.mrf.mxu0 }
 0x224   : > { %v1465_v38 = vadd.f32 %v1464_v7, %v6398_v9 }
 0x225   : > { %v1880_v12 = vpop.f32.mrf.mxu2 }
 0x226   : > { %v1881_v4 = vadd.f32 %v1880_v12, %v6394_v48  ;;  %v1553_v51 = vpop.f32.mrf.mxu1 }
 0x227   : > { %v6857_v55 = vadd.f32 %v1553_v51, %v1465_v38 }
 0x228   : > { %v6853_v54 = vadd.f32 %v1969_v14, %v1881_v4 }
 0x22a   : > { %v1971_v36 = vpop.f32.mrf.mxu3 }
 0x22b   : > { %v1467_v39 = vpop.f32.mrf.mxu0 }
 0x22c   : > { %v1468_v48 = vadd.f32 %v1467_v39, %v6418_v10  ;;  %v5568_v10 = vld [vmem:[%s8487_s1 + $0x4e4] sm:$0xf] }
 0x22d   : > { %v1882_v0 = vpop.f32.mrf.mxu2 }
 0x22e   : > { %v1883_v6 = vadd.f32 %v1882_v0, %v6400_v59  ;;  %2022 = vmatmul.bf16.vlgmr.msra.gmra.mxu0 %v654_v5  ;;  %v1556_v9 = vpop.f32.mrf.mxu1  ;;  %v5601_v59 = vld [vmem:[%s8487_s1 + $0x5e4] sm:$0xf0] }
 0x22f   : > { %v6864_v14 = vadd.f32 %v1556_v9, %v1468_v48  ;;  %2289 = vmatmul.bf16.vlgmr.msra.gmra.mxu3 %v654_v5  ;;  %v5154_v4 = vor.u32 %v5601_v59, %v5153_v28  ;;  %v5585_v5 = vld [vmem:[%s8487_s1 + $0x564] sm:$0xf0]  ;;  %v5025_v59 = vld [vmem:[%s8487_s1 + $0x4e0] sm:$0xf] }
 0x230   : > { %v6862_v12 = vadd.f32 %v1971_v36, %v1883_v6  ;;  %v5089_v36 = vld [vmem:[%s8487_s1 + $0x560] sm:$0xf] }
 0x231   : > { %2111 = vmatmul.bf16.vlgmr.msra.gmra.mxu1 %v6382_v52  ;;  %v8692_v52 = vld [vmem:[#allocation43_spill] sm:$0xff]  ;;  %3020 = vmatpush.bf16.msrb.mxu2 %v5154_v4  ;;  %v5090_v9 = vor.u32 %v5585_v5, %v5089_v36 }
 0x232   : > { %2200 = vmatmul.bf16.vlgmr.msra.gmra.mxu2 %v6403_v50  ;;  %v1974_v39 = vpop.f32.mrf.mxu3  ;;  %v5027_v50 = vld [vmem:[%s8487_s1 + $0x4e8] sm:$0xf0] }
 0x233   : > { %v1469_v38 = vpop.f32.mrf.mxu0  ;;  %v5030_v51 = vor.u32 %v5568_v10, %v5027_v50  ;;  %v5569_v10 = vld [vmem:[%s8487_s1 + $0x4e4] sm:$0xf0]  ;;  %2931 = vmatpush.bf16.msrb.mxu1 %v5090_v9  ;;  %v8694_v50 = vld [vmem:[#allocation45_spill] sm:$0xff] }
 0x234   : > { %v1470_v22 = vadd.f32 %v1469_v38, %v8693_v18  ;;  %v8695_v18 = vld [vmem:[#allocation2_spill] sm:$0xff]  ;;  %v8697_v5 = vld [vmem:[#allocation3_spill] sm:$0xff] }
 0x235   : > { %v1885_v6 = vpop.f32.mrf.mxu2  ;;  %3109 = vmatpush.bf16.msrb.mxu3 %v5030_v51 }
 0x236   : > { %v1886_v7 = vadd.f32 %v1885_v6, %v8692_v52  ;;  %v1558_v48 = vpop.f32.mrf.mxu1  ;;  %v5026_v6 = vor.u32 %v5569_v10, %v5025_v59 }
 0x237   : > { %v6890_v28 = vadd.f32 %v1558_v48, %v1470_v22  ;;  %v8698_v48 = vld [vmem:[#allocation46_spill] sm:$0xff] }
 0x238   : > { %v6882_v0 = vadd.f32 %v1974_v39, %v1886_v7  ;;  %2842 = vmatpush.bf16.msrb.mxu0 %v5026_v6 }
 0x23a   : > { %v1976_v4 = vpop.f32.mrf.mxu3 }
 0x23b   : > { %v1472_v7 = vpop.f32.mrf.mxu0 }
 0x23c   : > { %v1473_v38 = vadd.f32 %v1472_v7, %v6448_v49 }
 0x23d   : > { %v1887_v39 = vpop.f32.mrf.mxu2 }
 0x23e   : > { %v1888_v52 = vadd.f32 %v1887_v39, %v8694_v50  ;;  %2027 = vmatmul.bf16.gmra.mxu0 %v8695_v18  ;;  %v1561_v22 = vpop.f32.mrf.mxu1 }
 0x23f   : > { %v6903_v36 = vadd.f32 %v1561_v22, %v1473_v38  ;;  %2294 = vmatmul.bf16.gmra.mxu3 %v8695_v18  ;;  %v8701_v38 = vld [vmem:[#allocation47_spill] sm:$0xff] }
 0x240   : > { %v6900_v51 = vadd.f32 %v1976_v4, %v1888_v52 }
 0x241   : > { %8696 = vst [vmem:[#allocation35_spill] sm:$0xff] %v6903_v36  ;;  %2116 = vmatmul.bf16.gmra.mxu1 %v8698_v48  ;;  %v8703_v36 = vld [vmem:[#allocation4_spill] sm:$0xff] }
 0x242   : > { %2205 = vmatmul.bf16.gmra.mxu2 %v8697_v5  ;;  %v1979_v59 = vpop.f32.mrf.mxu3 }
 0x243   : > { %v1474_v6 = vpop.f32.mrf.mxu0 }
 0x244   : > { %v1475_v49 = vadd.f32 %v1474_v6, %v6452_v2  ;;  %v8705_v2 = vld [vmem:[#allocation5_spill] sm:$0xff] }
 0x245   : > { %v1890_v9 = vpop.f32.mrf.mxu2 }
 0x246   : > { %v1891_v10 = vadd.f32 %v1890_v9, %v6450_v21  ;;  %v1563_v4 = vpop.f32.mrf.mxu1 }
 0x247   : > { %v6912_v50 = vadd.f32 %v1563_v4, %v1475_v49  ;;  %v5019_v4 = vld [vmem:[%s8487_s1 + $0x4d8] sm:$0xf0] }
 0x248   : > { %v6910_v39 = vadd.f32 %v1979_v59, %v1891_v10  ;;  %v8706_v59 = vld [vmem:[#allocation48_spill] sm:$0xff] }
 0x249   : > { %8700 = vst [vmem:[#allocation39_spill] sm:$0xff] %v6912_v50  ;;  %v5145_v10 = vld [vmem:[%s8487_s1 + $0x5d0] sm:$0xf] }
 0x24a   : > { %8699 = vst [vmem:[#allocation36_spill] sm:$0xff] %v6910_v39  ;;  %v1981_v7 = vpop.f32.mrf.mxu3 }
 0x24b   : > { %v1477_v5 = vpop.f32.mrf.mxu0 }
 0x24c   : > { %v1478_v18 = vadd.f32 %v1477_v5, %v6472_v17  ;;  %v5599_v17 = vld [vmem:[%s8487_s1 + $0x5d4] sm:$0xf0]  ;;  %v5566_v5 = vld [vmem:[%s8487_s1 + $0x4d4] sm:$0xf] }
 0x24d   : > { %v1892_v52 = vpop.f32.mrf.mxu2  ;;  %v5146_v49 = vor.u32 %v5599_v17, %v5145_v10  ;;  %v5583_v10 = vld [vmem:[%s8487_s1 + $0x554] sm:$0xf0] }
 0x24e   : > { %v1893_v22 = vadd.f32 %v1892_v52, %v8701_v38  ;;  %2032 = vmatmul.bf16.gmra.mxu0 %v8703_v36  ;;  %v1566_v21 = vpop.f32.mrf.mxu1  ;;  %v8707_v52 = vld [vmem:[#allocation49_spill] sm:$0xff] }
 0x24f   : > { %v6919_v9 = vadd.f32 %v1566_v21, %v1478_v18  ;;  %2299 = vmatmul.bf16.gmra.mxu3 %v8703_v36  ;;  %v8708_v21 = vld [vmem:[#allocation50_spill] sm:$0xff]  ;;  %3021 = vmatpush.bf16.msrb.mxu2 %v5146_v49 }
 0x250   : > { %v6916_v48 = vadd.f32 %v1981_v7, %v1893_v22  ;;  %v5022_v22 = vor.u32 %v5566_v5, %v5019_v4  ;;  %v5017_v5 = vld [vmem:[%s8487_s1 + $0x4d0] sm:$0xf] }
 0x251   : > { %8704 = vst [vmem:[#allocation40_spill] sm:$0xff] %v6919_v9  ;;  %2121 = vmatmul.bf16.gmra.mxu1 %v8706_v59 }
 0x252   : > { %8702 = vst [vmem:[#allocation26_spill] sm:$0xff] %v6916_v48  ;;  %2210 = vmatmul.bf16.gmra.mxu2 %v8705_v2  ;;  %v1984_v6 = vpop.f32.mrf.mxu3  ;;  %3110 = vmatpush.bf16.msrb.mxu3 %v5022_v22  ;;  %v5081_v48 = vld [vmem:[%s8487_s1 + $0x550] sm:$0xf] }
 0x253   : > { %v1479_v38 = vpop.f32.mrf.mxu0  ;;  %v5082_v50 = vor.u32 %v5583_v10, %v5081_v48 }
 0x254   : > { %v1480_v59 = vadd.f32 %v1479_v38, %v8708_v21  ;;  %v8713_v21 = vld [vmem:[#allocation6_spill] sm:$0xff] }
 0x255   : > { %v1895_v18 = vpop.f32.mrf.mxu2  ;;  %2932 = vmatpush.bf16.msrb.mxu1 %v5082_v50  ;;  %v8716_v50 = vld [vmem:[#allocation52_spill] sm:$0xff] }
 0x256   : > { %v1896_v7 = vadd.f32 %v1895_v18, %v8707_v52  ;;  %v1568_v17 = vpop.f32.mrf.mxu1  ;;  %v5567_v18 = vld [vmem:[%s8487_s1 + $0x4d4] sm:$0xf0]  ;;  %v8711_v52 = vld [vmem:[#allocation51_spill] sm:$0xff] }
 0x257   : > { %v6946_v39 = vadd.f32 %v1568_v17, %v1480_v59  ;;  %v8715_v17 = vld [vmem:[#allocation7_spill] sm:$0xff] }
 0x258   : > { %v6938_v9 = vadd.f32 %v1984_v6, %v1896_v7  ;;  %v5018_v6 = vor.u32 %v5567_v18, %v5017_v5 }
 0x259   : > { %8710 = vst [vmem:[#allocation43_spill] sm:$0xff] %v6946_v39 }
 0x25a   : > { %8709 = vst [vmem:[#allocation32_spill] sm:$0xff] %v6938_v9  ;;  %v1986_v4 = vpop.f32.mrf.mxu3  ;;  %2843 = vmatpush.bf16.msrb.mxu0 %v5018_v6  ;;  %v8721_v9 = vld [vmem:[#allocation8_spill] sm:$0xff] }
 0x25b   : > { %v1482_v38 = vpop.f32.mrf.mxu0 }
 0x25c   : > { %v1483_v48 = vadd.f32 %v1482_v38, %v6502_v31 }
 0x25d   : > { %v1897_v49 = vpop.f32.mrf.mxu2 }
 0x25e   : > { %v1898_v7 = vadd.f32 %v1897_v49, %v8711_v52  ;;  %2037 = vmatmul.bf16.gmra.mxu0 %v8713_v21  ;;  %v1571_v59 = vpop.f32.mrf.mxu1 }
 0x25f   : > { %v6959_v10 = vadd.f32 %v1571_v59, %v1483_v48  ;;  %2304 = vmatmul.bf16.gmra.mxu3 %v8713_v21  ;;  %v8719_v59 = vld [vmem:[#allocation53_spill] sm:$0xff] }
 0x260   : > { %v6956_v22 = vadd.f32 %v1986_v4, %v1898_v7 }
 0x261   : > { %8714 = vst [vmem:[#allocation45_spill] sm:$0xff] %v6959_v10  ;;  %2126 = vmatmul.bf16.gmra.mxu1 %v8716_v50 }
 0x262   : > { %8712 = vst [vmem:[#allocation44_spill] sm:$0xff] %v6956_v22  ;;  %2215 = vmatmul.bf16.gmra.mxu2 %v8715_v17  ;;  %v1989_v18 = vpop.f32.mrf.mxu3 }
 0x263   : > { %v1484_v49 = vpop.f32.mrf.mxu0 }
 0x264   : > { %v1485_v31 = vadd.f32 %v1484_v49, %v6506_v47  ;;  %v8723_v47 = vld [vmem:[#allocation9_spill] sm:$0xff] }
 0x265   : > { %v1900_v5 = vpop.f32.mrf.mxu2 }
 0x266   : > { %v1901_v6 = vadd.f32 %v1900_v5, %v6504_v60  ;;  %v1573_v52 = vpop.f32.mrf.mxu1 }
 0x267   : > { %v6968_v7 = vadd.f32 %v1573_v52, %v1485_v31  ;;  %v5011_v31 = vld [vmem:[%s8487_s1 + $0x4c8] sm:$0xf0] }
 0x268   : > { %v6966_v4 = vadd.f32 %v1989_v18, %v1901_v6  ;;  %v8724_v18 = vld [vmem:[#allocation54_spill] sm:$0xff]  ;;  %v8725_v52 = vld [vmem:[#allocation55_spill] sm:$0xff] }
 0x269   : > { %8718 = vst [vmem:[#allocation47_spill] sm:$0xff] %v6968_v7  ;;  %v5137_v6 = vld [vmem:[%s8487_s1 + $0x5c0] sm:$0xf] }
 0x26a   : > { %8717 = vst [vmem:[#allocation46_spill] sm:$0xff] %v6966_v4  ;;  %v1991_v48 = vpop.f32.mrf.mxu3 }
 0x26b   : > { %v1487_v22 = vpop.f32.mrf.mxu0 }
 0x26c   : > { %v1488_v39 = vadd.f32 %v1487_v22, %v6526_v40  ;;  %v5597_v40 = vld [vmem:[%s8487_s1 + $0x5c4] sm:$0xf0]  ;;  %v5564_v22 = vld [vmem:[%s8487_s1 + $0x4c4] sm:$0xf] }
 0x26d   : > { %v1902_v38 = vpop.f32.mrf.mxu2  ;;  %v5138_v49 = vor.u32 %v5597_v40, %v5137_v6  ;;  %v5581_v6 = vld [vmem:[%s8487_s1 + $0x544] sm:$0xf0] }
 0x26e   : > { %v1903_v10 = vadd.f32 %v1902_v38, %v8719_v59  ;;  %2042 = vmatmul.bf16.gmra.mxu0 %v8721_v9  ;;  %v1576_v60 = vpop.f32.mrf.mxu1  ;;  %v5014_v59 = vor.u32 %v5564_v22, %v5011_v31  ;;  %v5009_v22 = vld [vmem:[%s8487_s1 + $0x4c0] sm:$0xf] }
 0x26f   : > { %v6975_v5 = vadd.f32 %v1576_v60, %v1488_v39  ;;  %2309 = vmatmul.bf16.gmra.mxu3 %v8721_v9  ;;  %v8726_v60 = vld [vmem:[#allocation56_spill] sm:$0xff]  ;;  %3022 = vmatpush.bf16.msrb.mxu2 %v5138_v49 }
 0x270   : > { %v6972_v50 = vadd.f32 %v1991_v48, %v1903_v10  ;;  %3111 = vmatpush.bf16.msrb.mxu3 %v5014_v59 }
 0x271   : > { %8722 = vst [vmem:[#allocation49_spill] sm:$0xff] %v6975_v5  ;;  %2131 = vmatmul.bf16.gmra.mxu1 %v8724_v18 }
 0x272   : > { %8720 = vst [vmem:[#allocation48_spill] sm:$0xff] %v6972_v50  ;;  %2220 = vmatmul.bf16.gmra.mxu2 %v8723_v47  ;;  %v1994_v10 = vpop.f32.mrf.mxu3  ;;  %v5073_v50 = vld [vmem:[%s8487_s1 + $0x540] sm:$0xf] }
 0x273   : > { %v1489_v48 = vpop.f32.mrf.mxu0  ;;  %v5074_v7 = vor.u32 %v5581_v6, %v5073_v50 }
 0x274   : > { %v1490_v18 = vadd.f32 %v1489_v48, %v8726_v60  ;;  %v8731_v60 = vld [vmem:[#allocation10_spill] sm:$0xff] }
 0x275   : > { %v1905_v39 = vpop.f32.mrf.mxu2  ;;  %2933 = vmatpush.bf16.msrb.mxu1 %v5074_v7  ;;  %v8734_v7 = vld [vmem:[#allocation58_spill] sm:$0xff] }
 0x276   : > { %v1906_v38 = vadd.f32 %v1905_v39, %v8725_v52  ;;  %v1578_v40 = vpop.f32.mrf.mxu1  ;;  %v5565_v39 = vld [vmem:[%s8487_s1 + $0x4c4] sm:$0xf0]  ;;  %v8729_v52 = vld [vmem:[#allocation57_spill] sm:$0xff] }
 0x277   : > { %v7002_v4 = vadd.f32 %v1578_v40, %v1490_v18  ;;  %v8733_v40 = vld [vmem:[#allocation11_spill] sm:$0xff] }
 0x278   : > { %v6994_v5 = vadd.f32 %v1994_v10, %v1906_v38  ;;  %v5010_v10 = vor.u32 %v5565_v39, %v5009_v22 }
 0x279   : > { %8728 = vst [vmem:[#allocation51_spill] sm:$0xff] %v7002_v4 }
 0x27a   : > { %8727 = vst [vmem:[#allocation50_spill] sm:$0xff] %v6994_v5  ;;  %v1996_v31 = vpop.f32.mrf.mxu3  ;;  %2844 = vmatpush.bf16.msrb.mxu0 %v5010_v10  ;;  %v8739_v5 = vld [vmem:[#allocation12_spill] sm:$0xff] }
 0x27b   : > { %v1492_v48 = vpop.f32.mrf.mxu0 }
 0x27c   : > { %v1493_v50 = vadd.f32 %v1492_v48, %v6556_v33 }
 0x27d   : > { %v1907_v49 = vpop.f32.mrf.mxu2 }
 0x27e   : > { %v1908_v38 = vadd.f32 %v1907_v49, %v8729_v52  ;;  %2047 = vmatmul.bf16.gmra.mxu0 %v8731_v60  ;;  %v1581_v18 = vpop.f32.mrf.mxu1 }
 0x27f   : > { %v7015_v6 = vadd.f32 %v1581_v18, %v1493_v50  ;;  %2314 = vmatmul.bf16.gmra.mxu3 %v8731_v60 }
 0x280   : > { %v7012_v59 = vadd.f32 %v1996_v31, %v1908_v38 }
 0x281   : > { %8732 = vst [vmem:[#allocation53_spill] sm:$0xff] %v7015_v6  ;;  %2136 = vmatmul.bf16.gmra.mxu1 %v8734_v7 }
 0x282   : > { %8730 = vst [vmem:[#allocation52_spill] sm:$0xff] %v7012_v59  ;;  %2225 = vmatmul.bf16.gmra.mxu2 %v8733_v40  ;;  %v1999_v39 = vpop.f32.mrf.mxu3  ;;  %v8737_v59 = vld [vmem:[#allocation60_spill] sm:$0xff] }
 0x283   : > { %v1494_v49 = vpop.f32.mrf.mxu0 }
 0x284   : > { %v1495_v33 = vadd.f32 %v1494_v49, %v6560_v16  ;;  %v8741_v16 = vld [vmem:[#allocation13_spill] sm:$0xff] }
 0x285   : > { %v1910_v22 = vpop.f32.mrf.mxu2 }
 0x286   : > { %v1911_v10 = vadd.f32 %v1910_v22, %v6558_v35  ;;  %v1583_v52 = vpop.f32.mrf.mxu1 }
 0x287   : > { %v7024_v38 = vadd.f32 %v1583_v52, %v1495_v33  ;;  %v5003_v33 = vld [vmem:[%s8487_s1 + $0x4b8] sm:$0xf0] }
 0x288   : > { %v7022_v31 = vadd.f32 %v1999_v39, %v1911_v10  ;;  %v8742_v39 = vld [vmem:[#allocation59_spill] sm:$0xff]  ;;  %v8743_v52 = vld [vmem:[#allocation61_spill] sm:$0xff] }
 0x289   : > { %8736 = vst [vmem:[#allocation54_spill] sm:$0xff] %v7024_v38 }
 0x28a   : > { %8735 = vst [vmem:[#allocation9_spill] sm:$0xff] %v7022_v31  ;;  %v2001_v50 = vpop.f32.mrf.mxu3 }
 0x28b   : > { %v1497_v6 = vpop.f32.mrf.mxu0 }
 0x28c   : > { %v1498_v4 = vadd.f32 %v1497_v6, %v8737_v59  ;;  %v5595_v59 = vld [vmem:[%s8487_s1 + $0x5b4] sm:$0xf0]  ;;  %v5562_v6 = vld [vmem:[%s8487_s1 + $0x4b4] sm:$0xf] }
 0x28d   : > { %v1912_v48 = vpop.f32.mrf.mxu2 }
 0x28e   : > { %v1913_v18 = vadd.f32 %v1912_v48, %v6562_v61  ;;  %2052 = vmatmul.bf16.gmra.mxu0 %v8739_v5  ;;  %v1586_v35 = vpop.f32.mrf.mxu1  ;;  %v5129_v61 = vld [vmem:[%s8487_s1 + $0x5b0] sm:$0xf] }
 0x28f   : > { %v7031_v22 = vadd.f32 %v1586_v35, %v1498_v4  ;;  %2319 = vmatmul.bf16.gmra.mxu3 %v8739_v5  ;;  %v5130_v49 = vor.u32 %v5595_v59, %v5129_v61  ;;  %v8744_v35 = vld [vmem:[#allocation62_spill] sm:$0xff]  ;;  %v8745_v61 = vld [vmem:[#allocation63_spill] sm:$0xff] }
 0x290   : > { %v7028_v7 = vadd.f32 %v2001_v50, %v1913_v18  ;;  %v5006_v18 = vor.u32 %v5562_v6, %v5003_v33  ;;  %v5579_v6 = vld [vmem:[%s8487_s1 + $0x534] sm:$0xf0] }
 0x291   : > { %8740 = vst [vmem:[#allocation56_spill] sm:$0xff] %v7031_v22  ;;  %2141 = vmatmul.bf16.gmra.mxu1 %v8742_v39  ;;  %3023 = vmatpush.bf16.msrb.mxu2 %v5130_v49 }
 0x292   : > { %8738 = vst [vmem:[#allocation55_spill] sm:$0xff] %v7028_v7  ;;  %2230 = vmatmul.bf16.gmra.mxu2 %v8741_v16  ;;  %v2004_v10 = vpop.f32.mrf.mxu3  ;;  %3112 = vmatpush.bf16.msrb.mxu3 %v5006_v18 }
 0x293   : > { %v1499_v50 = vpop.f32.mrf.mxu0 }
 0x294   : > { %v1500_v39 = vadd.f32 %v1499_v50, %v8744_v35  ;;  %v8749_v35 = vld [vmem:[#allocation15_spill] sm:$0xff] }
 0x295   : > { %v1915_v4 = vpop.f32.mrf.mxu2 }
 0x296   : > { %v1916_v48 = vadd.f32 %v1915_v4, %v8743_v52  ;;  %v1588_v7 = vpop.f32.mrf.mxu1  ;;  %v5065_v4 = vld [vmem:[%s8487_s1 + $0x530] sm:$0xf]  ;;  %v8747_v52 = vld [vmem:[#allocation14_spill] sm:$0xff] }
 0x297   : > { %v7052_v38 = vadd.f32 %v1588_v7, %v1500_v39  ;;  %v5066_v49 = vor.u32 %v5579_v6, %v5065_v4 }
 0x298   : > { %v7050_v22 = vadd.f32 %v2004_v10, %v1916_v48  ;;  %v5001_v10 = vld [vmem:[%s8487_s1 + $0x4b0] sm:$0xf] }
 0x299   : > { %2934 = vmatpush.bf16.msrb.mxu1 %v5066_v49 }
 0x29a   : > { %v2006_v16 = vpop.f32.mrf.mxu3 }
 0x29b   : > { %v1502_v5 = vpop.f32.mrf.mxu0 }
 0x29c   : > { %v1503_v7 = vadd.f32 %v1502_v5, %v6610_v19  ;;  %v8750_v19 = vld [vmem:[#allocation64_spill] sm:$0xff] }
 0x29d   : > { %v1917_v31 = vpop.f32.mrf.mxu2 }
 0x29e   : > { %v1918_v59 = vadd.f32 %v1917_v31, %v8745_v61  ;;  %v5563_v31 = vld [vmem:[%s8487_s1 + $0x4b4] sm:$0xf0]  ;;  %2057 = vmatmul.bf16.gmra.mxu0 %v8747_v52  ;;  %v1591_v50 = vpop.f32.mrf.mxu1 }
 0x29f   : > { %v5002_v48 = vor.u32 %v5563_v31, %v5001_v10  ;;  %v7071_v18 = vadd.f32 %v1591_v50, %v1503_v7  ;;  %2324 = vmatmul.bf16.gmra.mxu3 %v8747_v52 }
 0x2a0   : > { %v7068_v33 = vadd.f32 %v2006_v16, %v1918_v59 }
 0x2a1   : > { %8748 = vst [vmem:[#allocation58_spill] sm:$0xff] %v7071_v18  ;;  %2845 = vmatpush.bf16.msrb.mxu0 %v5002_v48  ;;  %2146 = vmatmul.bf16.gmra.mxu1 %v8750_v19  ;;  %v8754_v19 = vld [vmem:[#allocation16_spill] sm:$0xff] }
 0x2a2   : > { %8746 = vst [vmem:[#allocation57_spill] sm:$0xff] %v7068_v33  ;;  %2235 = vmatmul.bf16.gmra.mxu2 %v8749_v35  ;;  %v2009_v39 = vpop.f32.mrf.mxu3 }
 0x2a3   : > { %v1504_v16 = vpop.f32.mrf.mxu0 }
 0x2a4   : > { %v1505_v59 = vadd.f32 %v1504_v16, %v6614_v53  ;;  %v8755_v53 = vld [vmem:[#allocation17_spill] sm:$0xff] }
 0x2a5   : > { %v1920_v5 = vpop.f32.mrf.mxu2 }
 0x2a6   : > { %v1921_v61 = vadd.f32 %v1920_v5, %v6612_v13  ;;  %v1593_v6 = vpop.f32.mrf.mxu1  ;;  %v724_v13 = vld [vmem:[%s8488_s2] sm:$0x3]  ;;  %v8756_v5 = vld [vmem:[#allocation65_spill] sm:$0xff] }
 0x2a7   : > { %v7080_v10 = vadd.f32 %v1593_v6, %v1505_v59  ;;  %v7095_v6 = vperm.slane %v724_v13, 1 }
 0x2a8   : > { %v7078_v4 = vadd.f32 %v2009_v39, %v1921_v61  ;;  %v8757_v61 = vld [vmem:[#allocation66_spill] sm:$0xff] }
 0x2a9   : > { %8752 = vst [vmem:[#allocation59_spill] sm:$0xff] %v7080_v10 }
 0x2aa   : > { %8751 = vst [vmem:[#allocation60_spill] sm:$0xff] %v7078_v4  ;;  %v2011_v49 = vpop.f32.mrf.mxu3 }
 0x2ab   : > { %v2023_v50 = vpop.f32.mrf.mxu0  ;;  %8759 = vst [vmem:[#allocation63_spill] sm:$0xff] %v7095_v6 }
 0x2ad   : > { %v1922_v7 = vpop.f32.mrf.mxu2 }
 0x2ae   : > { %v1923_v31 = vadd.f32 %v1922_v7, %v6616_v62  ;;  %2062 = vmatmul.bf16.gmra.mxu0 %v8754_v19  ;;  %v2112_v18 = vpop.f32.mrf.mxu1  ;;  %v7093_v62 = vperm.slane %v724_v13, 0  ;;  %v2024_v7 = vadd.f32 %v2023_v50, %v6642_v43  ;;  %v4995_v13 = vld [vmem:[%s8487_s1 + $0x4a8] sm:$0xf0] }
 0x2af   : > { %2329 = vmatmul.bf16.gmra.mxu3 %v8754_v19  ;;  %v2113_v39 = vadd.f32 %v2112_v18, %v8756_v5  ;;  %v5593_v18 = vld [vmem:[%s8487_s1 + $0x5a4] sm:$0xf0]  ;;  %v5560_v5 = vld [vmem:[%s8487_s1 + $0x4a4] sm:$0xf] }
 0x2b0   : > { %v7083_v48 = vadd.f32 %v2011_v49, %v1923_v31  ;;  %8758 = vst [vmem:[#allocation62_spill] sm:$0xff] %v7093_v62  ;;  %v4998_v50 = vor.u32 %v5560_v5, %v4995_v13  ;;  %v5561_v13 = vld [vmem:[%s8487_s1 + $0x4a4] sm:$0xf0] }
 0x2b1   : > { %2151 = vmatmul.bf16.gmra.mxu1 %v8757_v61 }
 0x2b2   : > { %8753 = vst [vmem:[#allocation61_spill] sm:$0xff] %v7083_v48  ;;  %2240 = vmatmul.bf16.gmra.mxu2 %v8755_v53  ;;  %v2290_v59 = vpop.f32.mrf.mxu3  ;;  %v5121_v48 = vld [vmem:[%s8487_s1 + $0x5a0] sm:$0xf]  ;;  %3113 = vmatpush.bf16.msrb.mxu3 %v4998_v50 }
 0x2b3   : > { %v2025_v31 = vpop.f32.mrf.mxu0  ;;  %v5122_v61 = vor.u32 %v5593_v18, %v5121_v48 }
 0x2b5   : > { %v2201_v16 = vpop.f32.mrf.mxu2  ;;  %3024 = vmatpush.bf16.msrb.mxu2 %v5122_v61  ;;  %v5577_v61 = vld [vmem:[%s8487_s1 + $0x524] sm:$0xf0] }
 0x2b6   : > { %v2202_v49 = vadd.f32 %v2201_v16, %v2113_v39  ;;  %v2114_v39 = vpop.f32.mrf.mxu1  ;;  %v2375_v16 = vadd.f32 %v7093_v62, %v2024_v7  ;;  %v5057_v7 = vld [vmem:[%s8487_s1 + $0x520] sm:$0xf] }
 0x2b7   : > { %v2115_v18 = vadd.f32 %v2114_v39, %v6650_v1  ;;  %v5058_v1 = vor.u32 %v5577_v61, %v5057_v7 }
 0x2b8   : > { %v2291_v43 = vadd.f32 %v2290_v59, %v2202_v49  ;;  %v2026_v59 = vadd.f32 %v2025_v31, %v6660_v44 }
 0x2b9   : > { %2935 = vmatpush.bf16.msrb.mxu1 %v5058_v1 }
 0x2ba   : > { %v2376_v10 = vadd.f32 %v7095_v6, %v2291_v43  ;;  %v2292_v33 = vpop.f32.mrf.mxu3  ;;  %v2377_v50 = vadd.f32 %v7093_v62, %v2026_v59 }
 0x2bb   : > { %v2028_v5 = vpop.f32.mrf.mxu0 }
 0x2bc   : > { %v2439_v48 = vpack.c.bf16 %v2376_v10, %v2375_v16  ;;  %v4993_v10 = vld [vmem:[%s8487_s1 + $0x4a0] sm:$0xf] }
 0x2bd   : > { %v2203_v4 = vpop.f32.mrf.mxu2  ;;  %v4994_v31 = vor.u32 %v5561_v13, %v4993_v10 }
 0x2be   : > { %2471 = vst [vmem:[%s7116_s29] sm:$0xff] %v2439_v48  ;;  %v2204_v49 = vadd.f32 %v2203_v4, %v2115_v18  ;;  %v8760_v4 = vld [vmem:[#allocation18_spill] sm:$0xff]  ;;  %v2117_v43 = vpop.f32.mrf.mxu1 }
 0x2bf   : > { %2067 = vmatmul.bf16.gmra.mxu0 %v8760_v4  ;;  %2334 = vmatmul.bf16.gmra.mxu3 %v8760_v4  ;;  %v2118_v48 = vadd.f32 %v2117_v43, %v6663_v41 }
 0x2c0   : > { %v2293_v44 = vadd.f32 %v2292_v33, %v2204_v49  ;;  %2846 = vmatpush.bf16.msrb.mxu0 %v4994_v31  ;;  %v2029_v49 = vadd.f32 %v2028_v5, %v6673_v56  ;;  %v8761_v5 = vld [vmem:[#allocation20_spill] sm:$0xff] }
 0x2c1   : > { %2156 = vmatmul.bf16.gmra.mxu1 %v6666_v42 }
 0x2c2   : > { %v2378_v39 = vadd.f32 %v7095_v6, %v2293_v44  ;;  %2245 = vmatmul.bf16.gmra.mxu2 %v6146_v46  ;;  %v2295_v18 = vpop.f32.mrf.mxu3  ;;  %v2379_v1 = vadd.f32 %v7093_v62, %v2029_v49 }
 0x2c3   : > { %v2030_v59 = vpop.f32.mrf.mxu0 }
 0x2c4   : > { %v2440_v16 = vpack.c.bf16 %v2378_v39, %v2377_v50  ;;  %v2031_v42 = vadd.f32 %v2030_v59, %v6679_v30 }
 0x2c5   : > { %v2206_v33 = vpop.f32.mrf.mxu2 }
 0x2c6   : > { %2472 = vst [vmem:[%s7116_s29 + $0x8] sm:$0xff] %v2440_v16  ;;  %v2207_v7 = vadd.f32 %v2206_v33, %v2118_v48  ;;  %v2119_v10 = vpop.f32.mrf.mxu1  ;;  %v2381_v48 = vadd.f32 %v7093_v62, %v2031_v42 }
 0x2c7   : > { %v2120_v31 = vadd.f32 %v2119_v10, %v6675_v11  ;;  %v5113_v10 = vld [vmem:[%s8487_s1 + $0x590] sm:$0xf] }
 0x2c8   : > { %v2296_v61 = vadd.f32 %v2295_v18, %v2207_v7 }
 0x2ca   : > { %v2380_v13 = vadd.f32 %v7095_v6, %v2296_v61  ;;  %v2297_v43 = vpop.f32.mrf.mxu3 }
 0x2cb   : > { %v2033_v39 = vpop.f32.mrf.mxu0 }
 0x2cc   : > { %v2441_v44 = vpack.c.bf16 %v2380_v13, %v2379_v1  ;;  %v2034_v7 = vadd.f32 %v2033_v39, %v6704_v23  ;;  %v5591_v1 = vld [vmem:[%s8487_s1 + $0x594] sm:$0xf0] }
 0x2cd   : > { %v2208_v41 = vpop.f32.mrf.mxu2  ;;  %v5114_v13 = vor.u32 %v5591_v1, %v5113_v10 }
 0x2ce   : > { %2473 = vst [vmem:[%s7116_s29 + $0x20] sm:$0xff] %v2441_v44  ;;  %v2209_v50 = vadd.f32 %v2208_v41, %v2120_v31  ;;  %v2122_v16 = vpop.f32.mrf.mxu1  ;;  %v2383_v41 = vadd.f32 %v7093_v62, %v2034_v7  ;;  %v8762_v7 = vld [vmem:[#allocation21_spill] sm:$0xff] }
 0x2cf   : > { %2072 = vmatmul.bf16.gmra.mxu0 %v8761_v5  ;;  %2339 = vmatmul.bf16.gmra.mxu3 %v8761_v5  ;;  %v2123_v18 = vadd.f32 %v2122_v16, %v6682_v26  ;;  %v5558_v26 = vld [vmem:[%s8487_s1 + $0x494] sm:$0xf] }
 0x2d0   : > { %v2298_v56 = vadd.f32 %v2297_v43, %v2209_v50  ;;  %3025 = vmatpush.bf16.msrb.mxu2 %v5114_v13 }
 0x2d1   : > { %2161 = vmatmul.bf16.gmra.mxu1 %v6685_v63  ;;  %v4987_v63 = vld [vmem:[%s8487_s1 + $0x498] sm:$0xf0] }
 0x2d2   : > { %v2382_v33 = vadd.f32 %v7095_v6, %v2298_v56  ;;  %2250 = vmatmul.bf16.gmra.mxu2 %v6188_v32  ;;  %v2300_v49 = vpop.f32.mrf.mxu3  ;;  %v4990_v44 = vor.u32 %v5558_v26, %v4987_v63 }
 0x2d3   : > { %v2035_v61 = vpop.f32.mrf.mxu0 }
 0x2d4   : > { %v2442_v11 = vpack.c.bf16 %v2382_v33, %v2381_v48  ;;  %3114 = vmatpush.bf16.msrb.mxu3 %v4990_v44  ;;  %v2036_v16 = vadd.f32 %v2035_v61, %v6722_v58  ;;  %v8763_v44 = vld [vmem:[#allocation67_spill] sm:$0xff] }
 0x2d5   : > { %v2211_v30 = vpop.f32.mrf.mxu2 }
 0x2d6   : > { %2474 = vst [vmem:[%s7116_s29 + $0x28] sm:$0xff] %v2442_v11  ;;  %v2212_v59 = vadd.f32 %v2211_v30, %v2123_v18  ;;  %v2124_v31 = vpop.f32.mrf.mxu1  ;;  %v5049_v11 = vld [vmem:[%s8487_s1 + $0x510] sm:$0xf]  ;;  %v5575_v18 = vld [vmem:[%s8487_s1 + $0x514] sm:$0xf0]  ;;  %v2385_v10 = vadd.f32 %v7093_v62, %v2036_v16 }
 0x2d7   : > { %v2125_v50 = vadd.f32 %v2124_v31, %v6712_v29  ;;  %v5050_v30 = vor.u32 %v5575_v18, %v5049_v11  ;;  %v4985_v29 = vld [vmem:[%s8487_s1 + $0x490] sm:$0xf] }
 0x2d8   : > { %v2301_v23 = vadd.f32 %v2300_v49, %v2212_v59  ;;  %v5559_v49 = vld [vmem:[%s8487_s1 + $0x494] sm:$0xf0] }
 0x2d9   : > { %v4986_v59 = vor.u32 %v5559_v49, %v4985_v29  ;;  %2936 = vmatpush.bf16.msrb.mxu1 %v5050_v30 }
 0x2da   : > { %v2384_v43 = vadd.f32 %v7095_v6, %v2301_v23  ;;  %v2302_v56 = vpop.f32.mrf.mxu3 }
 0x2db   : > { %v2038_v33 = vpop.f32.mrf.mxu0  ;;  %2847 = vmatpush.bf16.msrb.mxu0 %v4986_v59 }
 0x2dc   : > { %v2443_v42 = vpack.c.bf16 %v2384_v43, %v2383_v41  ;;  %v2039_v31 = vadd.f32 %v2038_v33, %v8763_v44 }
 0x2dd   : > { %v2213_v39 = vpop.f32.mrf.mxu2 }
 0x2de   : > { %2475 = vst [vmem:[%s7116_s29 + $0x40] sm:$0xff] %v2443_v42  ;;  %v2214_v48 = vadd.f32 %v2213_v39, %v2125_v50  ;;  %v2127_v61 = vpop.f32.mrf.mxu1  ;;  %v2387_v39 = vadd.f32 %v7093_v62, %v2039_v31 }
 0x2df   : > { %2077 = vmatmul.bf16.gmra.mxu0 %v8762_v7  ;;  %2344 = vmatmul.bf16.gmra.mxu3 %v8762_v7  ;;  %v2128_v26 = vadd.f32 %v2127_v61, %v6725_v45 }
 0x2e0   : > { %v2303_v58 = vadd.f32 %v2302_v56, %v2214_v48  ;;  %v8764_v48 = vld [vmem:[#allocation68_spill] sm:$0xff] }
 0x2e1   : > { %2166 = vmatmul.bf16.gmra.mxu1 %v6728_v3  ;;  %v8765_v3 = vld [vmem:[#allocation69_spill] sm:$0xff] }
 0x2e2   : > { %v2386_v1 = vadd.f32 %v7095_v6, %v2303_v58  ;;  %2255 = vmatmul.bf16.gmra.mxu2 %v6206_v8  ;;  %v2305_v23 = vpop.f32.mrf.mxu3  ;;  %v8766_v58 = vld [vmem:[#allocation22_spill] sm:$0xff] }
 0x2e3   : > { %v2040_v43 = vpop.f32.mrf.mxu0 }
 0x2e4   : > { %v2444_v13 = vpack.c.bf16 %v2386_v1, %v2385_v10  ;;  %v2041_v30 = vadd.f32 %v2040_v43, %v8765_v3  ;;  %v8767_v1 = vld [vmem:[#allocation23_spill] sm:$0xff] }
 0x2e5   : > { %v2216_v63 = vpop.f32.mrf.mxu2 }
 0x2e6   : > { %2476 = vst [vmem:[%s7116_s29 + $0x48] sm:$0xff] %v2444_v13  ;;  %v2217_v41 = vadd.f32 %v2216_v63, %v2128_v26  ;;  %v2129_v50 = vpop.f32.mrf.mxu1  ;;  %v2389_v61 = vadd.f32 %v7093_v62, %v2041_v30  ;;  %v8768_v26 = vld [vmem:[#allocation70_spill] sm:$0xff] }
 0x2e7   : > { %v2130_v11 = vadd.f32 %v2129_v50, %v8764_v48  ;;  %v5556_v48 = vld [vmem:[%s8487_s1 + $0x484] sm:$0xf] }
 0x2e8   : > { %v2306_v42 = vadd.f32 %v2305_v23, %v2217_v41  ;;  %v8769_v23 = vld [vmem:[#allocation71_spill] sm:$0xff] }
 0x2e9   : > { %v8770_v41 = vld [vmem:[#allocation27_spill] sm:$0xff] }
 0x2ea   : > { %v2388_v56 = vadd.f32 %v7095_v6, %v2306_v42  ;;  %v2307_v18 = vpop.f32.mrf.mxu3 }
 0x2eb   : > { %v2043_v49 = vpop.f32.mrf.mxu0 }
 0x2ec   : > { %v2445_v16 = vpack.c.bf16 %v2388_v56, %v2387_v39  ;;  %v2044_v43 = vadd.f32 %v2043_v49, %v8770_v41  ;;  %v5105_v39 = vld [vmem:[%s8487_s1 + $0x580] sm:$0xf]  ;;  %v5589_v56 = vld [vmem:[%s8487_s1 + $0x584] sm:$0xf0] }
 0x2ed   : > { %v2218_v45 = vpop.f32.mrf.mxu2 }
 0x2ee   : > { %2477 = vst [vmem:[%s7116_s29 + $0x60] sm:$0xff] %v2445_v16  ;;  %v2219_v29 = vadd.f32 %v2218_v45, %v2130_v11  ;;  %v2132_v59 = vpop.f32.mrf.mxu1  ;;  %v5106_v16 = vor.u32 %v5589_v56, %v5105_v39  ;;  %v4979_v11 = vld [vmem:[%s8487_s1 + $0x488] sm:$0xf0]  ;;  %v2391_v30 = vadd.f32 %v7093_v62, %v2044_v43  ;;  %v4977_v43 = vld [vmem:[%s8487_s1 + $0x480] sm:$0xf]  ;;  %v8773_v39 = vld [vmem:[#allocation24_spill] sm:$0xff] }
 0x2ef   : > { %2082 = vmatmul.bf16.gmra.mxu0 %v8766_v58  ;;  %2349 = vmatmul.bf16.gmra.mxu3 %v8766_v58  ;;  %v2133_v63 = vadd.f32 %v2132_v59, %v8768_v26 }
 0x2f0   : > { %v2308_v33 = vadd.f32 %v2307_v18, %v2219_v29  ;;  %v4982_v18 = vor.u32 %v5556_v48, %v4979_v11  ;;  %3026 = vmatpush.bf16.msrb.mxu2 %v5106_v16 }
 0x2f1   : > { %2171 = vmatmul.bf16.gmra.mxu1 %v8769_v23 }
 0x2f2   : > { %v2390_v10 = vadd.f32 %v7095_v6, %v2308_v33  ;;  %2260 = vmatmul.bf16.gmra.mxu2 %v8767_v1  ;;  %v2310_v31 = vpop.f32.mrf.mxu3  ;;  %3115 = vmatpush.bf16.msrb.mxu3 %v4982_v18  ;;  %v8771_v33 = vld [vmem:[#allocation28_spill] sm:$0xff] }
 0x2f3   : > { %v2045_v50 = vpop.f32.mrf.mxu0 }
 0x2f4   : > { %v2446_v13 = vpack.c.bf16 %v2390_v10, %v2389_v61 }
 0x2f5   : > { %v2221_v44 = vpop.f32.mrf.mxu2 }
 0x2f6   : > { %2478 = vst [vmem:[%s7116_s29 + $0x68] sm:$0xff] %v2446_v13  ;;  %v2222_v42 = vadd.f32 %v2221_v44, %v2133_v63  ;;  %v2134_v3 = vpop.f32.mrf.mxu1  ;;  %v8772_v13 = vld [vmem:[#allocation29_spill] sm:$0xff]  ;;  %v5041_v44 = vld [vmem:[%s8487_s1 + $0x500] sm:$0xf] }
 0x2f7   : > { %v2135_v59 = vadd.f32 %v2134_v3, %v8771_v33  ;;  %v2046_v26 = vadd.f32 %v2045_v50, %v8772_v13  ;;  %v8775_v3 = vld [vmem:[#allocation33_spill] sm:$0xff] }
 0x2f8   : > { %v2311_v45 = vadd.f32 %v2310_v31, %v2222_v42  ;;  %v5573_v31 = vld [vmem:[%s8487_s1 + $0x504] sm:$0xf0] }
 0x2f9   : > { %v5042_v41 = vor.u32 %v5573_v31, %v5041_v44  ;;  %v5557_v42 = vld [vmem:[%s8487_s1 + $0x484] sm:$0xf0]  ;;  %v2393_v48 = vadd.f32 %v7093_v62, %v2046_v26 }
 0x2fa   : > { %v2392_v29 = vadd.f32 %v7095_v6, %v2311_v45  ;;  %v2312_v10 = vpop.f32.mrf.mxu3  ;;  %v4978_v56 = vor.u32 %v5557_v42, %v4977_v43  ;;  %v8774_v45 = vld [vmem:[#allocation25_spill] sm:$0xff] }
 0x2fb   : > { %v2048_v23 = vpop.f32.mrf.mxu0  ;;  %2937 = vmatpush.bf16.msrb.mxu1 %v5042_v41 }
 0x2fc   : > { %v2447_v49 = vpack.c.bf16 %v2392_v29, %v2391_v30  ;;  %2848 = vmatpush.bf16.msrb.mxu0 %v4978_v56  ;;  %v8776_v29 = vld [vmem:[#allocation72_spill] sm:$0xff] }
 0x2fd   : > { %v2223_v61 = vpop.f32.mrf.mxu2 }
 0x2fe   : > { %2479 = vst [vmem:[%s7116_s29 + $0x80] sm:$0xff] %v2447_v49  ;;  %v2224_v63 = vadd.f32 %v2223_v61, %v2135_v59  ;;  %v2137_v16 = vpop.f32.mrf.mxu1  ;;  %v2049_v59 = vadd.f32 %v2048_v23, %v6797_v25 }
 0x2ff   : > { %2087 = vmatmul.bf16.gmra.mxu0 %v8773_v39  ;;  %2354 = vmatmul.bf16.gmra.mxu3 %v8773_v39  ;;  %v2138_v30 = vadd.f32 %v2137_v16, %v8775_v3  ;;  %v8777_v16 = vld [vmem:[#allocation30_spill] sm:$0xff]  ;;  %v8778_v3 = vld [vmem:[#allocation31_spill] sm:$0xff] }
 0x300   : > { %v2313_v50 = vadd.f32 %v2312_v10, %v2224_v63  ;;  %v2395_v63 = vadd.f32 %v7093_v62, %v2049_v59 }
 0x301   : > { %2176 = vmatmul.bf16.gmra.mxu1 %v8776_v29 }
 0x302   : > { %v2394_v11 = vadd.f32 %v7095_v6, %v2313_v50  ;;  %2265 = vmatmul.bf16.gmra.mxu2 %v8774_v45  ;;  %v2315_v33 = vpop.f32.mrf.mxu3 }
 0x303   : > { %v2050_v10 = vpop.f32.mrf.mxu0 }
 0x304   : > { %v2448_v18 = vpack.c.bf16 %v2394_v11, %v2393_v48  ;;  %v2051_v50 = vadd.f32 %v2050_v10, %v6803_v15 }
 0x305   : > { %v2226_v49 = vpop.f32.mrf.mxu2 }
 0x306   : > { %2480 = vst [vmem:[%s7116_s29 + $0x88] sm:$0xff] %v2448_v18  ;;  %v2227_v61 = vadd.f32 %v2226_v49, %v2138_v30  ;;  %v2139_v26 = vpop.f32.mrf.mxu1  ;;  %v2397_v11 = vadd.f32 %v7093_v62, %v2051_v50  ;;  %v8779_v30 = vld [vmem:[#allocation34_spill] sm:$0xff]  ;;  %v7258_v49 = vld [vmem:[%s5949_s17 + $0xa8] sm:$0xff] }
 0x307   : > { %v2140_v41 = vadd.f32 %v2139_v26, %v6799_v34  ;;  %v5523_v26 = vld [vmem:[%s8487_s1 + $0x374] sm:$0xf0] }
 0x308   : > { %v2316_v13 = vadd.f32 %v2315_v33, %v2227_v61 }
 0x30a   : > { %v2396_v44 = vadd.f32 %v7095_v6, %v2316_v13  ;;  %v2317_v42 = vpop.f32.mrf.mxu3  ;;  %v5225_v13 = vld [vmem:[%s8487_s1 + $0x370] sm:$0xf] }
 0x30b   : > { %v2053_v25 = vpop.f32.mrf.mxu0 }
 0x30c   : > { %v2449_v31 = vpack.c.bf16 %v2396_v44, %v2395_v63  ;;  %v2054_v59 = vadd.f32 %v2053_v25, %v6825_v37  ;;  %v5226_v63 = vor.u32 %v5523_v26, %v5225_v13  ;;  %v5289_v44 = vld [vmem:[%s8487_s1 + $0x3f0] sm:$0xf]  ;;  %v5539_v37 = vld [vmem:[%s8487_s1 + $0x3f4] sm:$0xf0] }
 0x30d   : > { %v2228_v43 = vpop.f32.mrf.mxu2 }
 0x30e   : > { %2481 = vst [vmem:[%s7116_s29 + $0xa0] sm:$0xff] %v2449_v31  ;;  %v2229_v56 = vadd.f32 %v2228_v43, %v2140_v41  ;;  %v2142_v48 = vpop.f32.mrf.mxu1  ;;  %v5290_v41 = vor.u32 %v5539_v37, %v5289_v44  ;;  %3615 = vmatpush.bf16.msra.mxu2 %v5226_v63  ;;  %v7299_v37 = vld [vmem:[%s5949_s17 + $0xb4] sm:$0xff] }
 0x30f   : > { %2092 = vmatmul.bf16.gmra.mxu0 %v8777_v16  ;;  %2359 = vmatmul.bf16.gmra.mxu3 %v8777_v16  ;;  %v2143_v29 = vadd.f32 %v2142_v48, %v8779_v30  ;;  %v5602_v30 = vld [vmem:[%s8487_s1 + $0x5f4] sm:$0xf] }
 0x310   : > { %v2318_v23 = vadd.f32 %v2317_v42, %v2229_v56  ;;  %v2399_v42 = vadd.f32 %v7093_v62, %v2054_v59  ;;  %3704 = vmatpush.bf16.msra.mxu3 %v5290_v41  ;;  %v8780_v59 = vld [vmem:[#allocation37_spill] sm:$0xff] }
 0x311   : > { %2181 = vmatmul.bf16.gmra.mxu1 %v7258_v49 }
 0x312   : > { %v2398_v18 = vadd.f32 %v7095_v6, %v2318_v23  ;;  %2270 = vmatmul.bf16.gmra.mxu2 %v8778_v3  ;;  %v2320_v33 = vpop.f32.mrf.mxu3 }
 0x313   : > { %v2055_v10 = vpop.f32.mrf.mxu0 }
 0x314   : > { %v2450_v34 = vpack.c.bf16 %v2398_v18, %v2397_v11  ;;  %v2056_v11 = vadd.f32 %v2055_v10, %v6843_v20  ;;  %v5099_v20 = vld [vmem:[%s8487_s1 + $0x578] sm:$0xf0] }
 0x315   : > { %v2231_v15 = vpop.f32.mrf.mxu2 }
 0x316   : > { %2482 = vst [vmem:[%s7116_s29 + $0xa8] sm:$0xff] %v2450_v34  ;;  %v2232_v61 = vadd.f32 %v2231_v15, %v2143_v29  ;;  %v2144_v43 = vpop.f32.mrf.mxu1  ;;  %v5163_v29 = vld [vmem:[%s8487_s1 + $0x5f8] sm:$0xf0]  ;;  %v2401_v13 = vadd.f32 %v7093_v62, %v2056_v11 }
 0x317   : > { %v2145_v25 = vadd.f32 %v2144_v43, %v6833_v57  ;;  %v5166_v15 = vor.u32 %v5602_v30, %v5163_v29  ;;  %v5586_v57 = vld [vmem:[%s8487_s1 + $0x574] sm:$0xf] }
 0x318   : > { %v2321_v31 = vadd.f32 %v2320_v33, %v2232_v61  ;;  %v5102_v61 = vor.u32 %v5586_v57, %v5099_v20  ;;  %v5644_v57 = vld [vmem:[%s5949_s17 + $0x18] sm:$0xff] }
 0x319   : > { %3286 = vmatpush.bf16.msra.mxu1 %v5166_v15 }
 0x31a   : > { %v2400_v50 = vadd.f32 %v7095_v6, %v2321_v31  ;;  %v2322_v48 = vpop.f32.mrf.mxu3  ;;  %3197 = vmatpush.bf16.msra.mxu0 %v5102_v61 }
 0x31b   : > { %v2058_v34 = vpop.f32.mrf.mxu0 }
 0x31c   : > { %v2451_v56 = vpack.c.bf16 %v2400_v50, %v2399_v42  ;;  %v2059_v43 = vadd.f32 %v2058_v34, %v6853_v54 }
 0x31d   : > { %v2233_v23 = vpop.f32.mrf.mxu2 }
 0x31e   : > { %2483 = vst [vmem:[%s7116_s29 + $0xc0] sm:$0xff] %v2451_v56  ;;  %v2234_v18 = vadd.f32 %v2233_v23, %v2145_v25  ;;  %v2147_v10 = vpop.f32.mrf.mxu1  ;;  %v2403_v23 = vadd.f32 %v7093_v62, %v2059_v43 }
 0x31f   : > { %2097 = vmatmul.bf16.gmra.mxu0 %v8780_v59  ;;  %2364 = vmatmul.bf16.gmra.mxu3 %v8780_v59  ;;  %v2148_v44 = vadd.f32 %v2147_v10, %v6846_v24 }
 0x320   : > { %v2323_v33 = vadd.f32 %v2322_v48, %v2234_v18 }
 0x321   : > { %2186 = vmatmul.bf16.gmra.mxu1 %v7299_v37 }
 0x322   : > { %v2402_v26 = vadd.f32 %v7095_v6, %v2323_v33  ;;  %2275 = vmatmul.bf16.gmra.mxu2 %v8684_v27  ;;  %v2325_v41 = vpop.f32.mrf.mxu3 }
 0x323   : > { %v2060_v50 = vpop.f32.mrf.mxu0 }
 0x324   : > { %v2452_v63 = vpack.c.bf16 %v2402_v26, %v2401_v13  ;;  %v2061_v29 = vadd.f32 %v2060_v50, %v6862_v12 }
 0x325   : > { %v2236_v31 = vpop.f32.mrf.mxu2 }
 0x326   : > { %2484 = vst [vmem:[%s7116_s29 + $0xc8] sm:$0xff] %v2452_v63  ;;  %v2237_v42 = vadd.f32 %v2236_v31, %v2148_v44  ;;  %v2149_v25 = vpop.f32.mrf.mxu1  ;;  %v2405_v33 = vadd.f32 %v7093_v62, %v2061_v29  ;;  %v5217_v31 = vld [vmem:[%s8487_s1 + $0x360] sm:$0xf] }
 0x327   : > { %v2150_v11 = vadd.f32 %v2149_v25, %v6857_v55 }
 0x328   : > { %v2326_v56 = vadd.f32 %v2325_v41, %v2237_v42  ;;  %v5521_v41 = vld [vmem:[%s8487_s1 + $0x364] sm:$0xf0] }
 0x329   : > { %v5218_v43 = vor.u32 %v5521_v41, %v5217_v31  ;;  %v8782_v41 = vld [vmem:[#allocation36_spill] sm:$0xff] }
 0x32a   : > { %v2404_v48 = vadd.f32 %v7095_v6, %v2326_v56  ;;  %v2327_v30 = vpop.f32.mrf.mxu3 }
 0x32b   : > { %v2063_v54 = vpop.f32.mrf.mxu0  ;;  %3616 = vmatpush.bf16.msra.mxu2 %v5218_v43 }
 0x32c   : > { %v2453_v24 = vpack.c.bf16 %v2404_v48, %v2403_v23  ;;  %v2064_v26 = vadd.f32 %v2063_v54, %v6882_v0  ;;  %v5537_v0 = vld [vmem:[%s8487_s1 + $0x3e4] sm:$0xf0]  ;;  %v5600_v54 = vld [vmem:[%s8487_s1 + $0x5e4] sm:$0xf] }
 0x32d   : > { %v2238_v18 = vpop.f32.mrf.mxu2 }
 0x32e   : > { %2485 = vst [vmem:[%s7116_s29 + $0xe0] sm:$0xff] %v2453_v24  ;;  %v2239_v15 = vadd.f32 %v2238_v18, %v2150_v11  ;;  %v2152_v20 = vpop.f32.mrf.mxu1  ;;  %v2407_v25 = vadd.f32 %v7093_v62, %v2064_v26  ;;  %v8781_v26 = vld [vmem:[#allocation35_spill] sm:$0xff] }
 0x32f   : > { %2849 = vmatmul.bf16.vlgmr.msrb.gmra.mxu0 %v5644_v57  ;;  %3116 = vmatmul.bf16.vlgmr.msrb.gmra.mxu3 %v5644_v57  ;;  %v2153_v10 = vadd.f32 %v2152_v20, %v6864_v14  ;;  %v5281_v14 = vld [vmem:[%s8487_s1 + $0x3e0] sm:$0xf]  ;;  %v5091_v20 = vld [vmem:[%s8487_s1 + $0x568] sm:$0xf0] }
 0x330   : > { %v2328_v34 = vadd.f32 %v2327_v30, %v2239_v15  ;;  %v5282_v50 = vor.u32 %v5537_v0, %v5281_v14 }
 0x331   : > { %2938 = vmatmul.bf16.vlgmr.msrb.gmra.mxu1 %v8705_v2 }
 0x332   : > { %v2406_v61 = vadd.f32 %v7095_v6, %v2328_v34  ;;  %3027 = vmatmul.bf16.vlgmr.msrb.gmra.mxu2 %v8703_v36  ;;  %v2330_v13 = vpop.f32.mrf.mxu3  ;;  %3705 = vmatpush.bf16.msra.mxu3 %v5282_v50  ;;  %v5155_v34 = vld [vmem:[%s8487_s1 + $0x5e8] sm:$0xf0] }
 0x333   : > { %v2065_v44 = vpop.f32.mrf.mxu0  ;;  %v5158_v57 = vor.u32 %v5600_v54, %v5155_v34 }
 0x334   : > { %v2454_v55 = vpack.c.bf16 %v2406_v61, %v2405_v33  ;;  %v2066_v30 = vadd.f32 %v2065_v44, %v6900_v51  ;;  %v7347_v33 = vld [vmem:[%s5949_s17 + $0x24] sm:$0xff] }
 0x335   : > { %v2241_v12 = vpop.f32.mrf.mxu2  ;;  %3287 = vmatpush.bf16.msra.mxu1 %v5158_v57  ;;  %v7364_v57 = vld [vmem:[%s5949_s17 + $0x30] sm:$0xff] }
 0x336   : > { %2486 = vst [vmem:[%s7116_s29 + $0xe8] sm:$0xff] %v2454_v55  ;;  %v2242_v63 = vadd.f32 %v2241_v12, %v2153_v10  ;;  %v2154_v56 = vpop.f32.mrf.mxu1  ;;  %v2409_v10 = vadd.f32 %v7093_v62, %v2066_v30  ;;  %v8784_v30 = vld [vmem:[#allocation26_spill] sm:$0xff] }
 0x337   : > { %v2155_v24 = vadd.f32 %v2154_v56, %v6890_v28  ;;  %v5584_v28 = vld [vmem:[%s8487_s1 + $0x564] sm:$0xf] }
 0x338   : > { %v2331_v42 = vadd.f32 %v2330_v13, %v2242_v63  ;;  %v5094_v61 = vor.u32 %v5584_v28, %v5091_v20 }
 0x33a   : > { %v2408_v23 = vadd.f32 %v7095_v6, %v2331_v42  ;;  %v2332_v18 = vpop.f32.mrf.mxu3  ;;  %3198 = vmatpush.bf16.msra.mxu0 %v5094_v61 }
 0x33c   : > { %v2455_v48 = vpack.c.bf16 %v2408_v23, %v2407_v25  ;;  %v2068_v15 = vpop.f32.mrf.mxu0 }
 0x33d   : > { %v2243_v11 = vpop.f32.mrf.mxu2  ;;  %v2069_v43 = vadd.f32 %v2068_v15, %v8782_v41  ;;  %v5209_v41 = vld [vmem:[%s8487_s1 + $0x350] sm:$0xf] }
 0x33e   : > { %2487 = vst [vmem:[%s7116_s29 + $0x100] sm:$0xff] %v2455_v48  ;;  %v2244_v29 = vadd.f32 %v2243_v11, %v2155_v24  ;;  %v2157_v55 = vpop.f32.mrf.mxu1  ;;  %v8783_v48 = vld [vmem:[#allocation39_spill] sm:$0xff] }
 0x33f   : > { %2854 = vmatmul.bf16.gmra.mxu0 %v7347_v33  ;;  %3121 = vmatmul.bf16.gmra.mxu3 %v7347_v33  ;;  %v2158_v63 = vadd.f32 %v2157_v55, %v8781_v26  ;;  %v2411_v56 = vadd.f32 %v7093_v62, %v2069_v43  ;;  %v8785_v55 = vld [vmem:[#allocation40_spill] sm:$0xff]  ;;  %v5519_v43 = vld [vmem:[%s8487_s1 + $0x354] sm:$0xf0] }
 0x340   : > { %v2333_v51 = vadd.f32 %v2332_v18, %v2244_v29  ;;  %v8786_v26 = vld [vmem:[#allocation32_spill] sm:$0xff] }
 0x341   : > { %2943 = vmatmul.bf16.gmra.mxu1 %v8715_v17 }
 0x342   : > { %v2410_v12 = vadd.f32 %v7095_v6, %v2333_v51  ;;  %3032 = vmatmul.bf16.gmra.mxu2 %v8713_v21  ;;  %v2335_v31 = vpop.f32.mrf.mxu3 }
 0x344   : > { %v2456_v13 = vpack.c.bf16 %v2410_v12, %v2409_v10  ;;  %v2070_v0 = vpop.f32.mrf.mxu0 }
 0x345   : > { %v2246_v44 = vpop.f32.mrf.mxu2  ;;  %v2071_v29 = vadd.f32 %v2070_v0, %v8784_v30  ;;  %v5273_v0 = vld [vmem:[%s8487_s1 + $0x3d0] sm:$0xf] }
 0x346   : > { %2488 = vst [vmem:[%s7116_s29 + $0x108] sm:$0xff] %v2456_v13  ;;  %v2247_v14 = vadd.f32 %v2246_v44, %v2158_v63  ;;  %v2159_v50 = vpop.f32.mrf.mxu1 }
 0x347   : > { %v2160_v24 = vadd.f32 %v2159_v50, %v8783_v48  ;;  %v2413_v20 = vadd.f32 %v7093_v62, %v2071_v29 }
 0x348   : > { %v2336_v42 = vadd.f32 %v2335_v31, %v2247_v14  ;;  %v5210_v14 = vor.u32 %v5519_v43, %v5209_v41  ;;  %v8789_v43 = vld [vmem:[#allocation45_spill] sm:$0xff] }
 0x34a   : > { %v2412_v25 = vadd.f32 %v7095_v6, %v2336_v42  ;;  %v2337_v18 = vpop.f32.mrf.mxu3  ;;  %v5535_v42 = vld [vmem:[%s8487_s1 + $0x3d4] sm:$0xf0]  ;;  %3617 = vmatpush.bf16.msra.mxu2 %v5210_v14 }
 0x34c   : > { %v2457_v23 = vpack.c.bf16 %v2412_v25, %v2411_v56  ;;  %v2073_v15 = vpop.f32.mrf.mxu0  ;;  %v5274_v56 = vor.u32 %v5535_v42, %v5273_v0 }
 0x34d   : > { %v2248_v11 = vpop.f32.mrf.mxu2  ;;  %v2074_v63 = vadd.f32 %v2073_v15, %v8786_v26 }
 0x34e   : > { %2489 = vst [vmem:[%s7116_s29 + $0x120] sm:$0xff] %v2457_v23  ;;  %v2249_v54 = vadd.f32 %v2248_v11, %v2160_v24  ;;  %v2162_v28 = vpop.f32.mrf.mxu1  ;;  %3706 = vmatpush.bf16.msra.mxu3 %v5274_v56  ;;  %v8787_v11 = vld [vmem:[#allocation43_spill] sm:$0xff] }
 0x34f   : > { %2859 = vmatmul.bf16.gmra.mxu0 %v7364_v57  ;;  %3126 = vmatmul.bf16.gmra.mxu3 %v7364_v57  ;;  %v2163_v10 = vadd.f32 %v2162_v28, %v8785_v55  ;;  %v2415_v23 = vadd.f32 %v7093_v62, %v2074_v63  ;;  %v5582_v55 = vld [vmem:[%s8487_s1 + $0x554] sm:$0xf] }
 0x350   : > { %v2338_v34 = vadd.f32 %v2337_v18, %v2249_v54  ;;  %v8788_v54 = vld [vmem:[#allocation44_spill] sm:$0xff] }
 0x351   : > { %2948 = vmatmul.bf16.gmra.mxu1 %v8723_v47 }
 0x352   : > { %v2414_v51 = vadd.f32 %v7095_v6, %v2338_v34  ;;  %3037 = vmatmul.bf16.gmra.mxu2 %v8721_v9  ;;  %v2340_v13 = vpop.f32.mrf.mxu3 }
 0x354   : > { %v2458_v61 = vpack.c.bf16 %v2414_v51, %v2413_v20  ;;  %v2075_v31 = vpop.f32.mrf.mxu0  ;;  %v5598_v20 = vld [vmem:[%s8487_s1 + $0x5d4] sm:$0xf]  ;;  %v5147_v51 = vld [vmem:[%s8487_s1 + $0x5d8] sm:$0xf0] }
 0x355   : > { %v2251_v12 = vpop.f32.mrf.mxu2  ;;  %v2076_v15 = vadd.f32 %v2075_v31, %v8788_v54 }
 0x356   : > { %2490 = vst [vmem:[%s7116_s29 + $0x128] sm:$0xff] %v2458_v61  ;;  %v2252_v44 = vadd.f32 %v2251_v12, %v2163_v10  ;;  %v2164_v25 = vpop.f32.mrf.mxu1  ;;  %v5150_v61 = vor.u32 %v5598_v20, %v5147_v51  ;;  %v5083_v10 = vld [vmem:[%s8487_s1 + $0x558] sm:$0xf0]  ;;  %v8792_v20 = vld [vmem:[#allocation48_spill] sm:$0xff] }
 0x357   : > { %v2165_v18 = vadd.f32 %v2164_v25, %v8787_v11  ;;  %v5086_v26 = vor.u32 %v5582_v55, %v5083_v10  ;;  %v7422_v10 = vld [vmem:[%s5949_s17 + $0x48] sm:$0xff] }
 0x358   : > { %v2341_v50 = vadd.f32 %v2340_v13, %v2252_v44  ;;  %v7405_v13 = vld [vmem:[%s5949_s17 + $0x3c] sm:$0xff]  ;;  %3288 = vmatpush.bf16.msra.mxu1 %v5150_v61  ;;  %v2417_v44 = vadd.f32 %v7093_v62, %v2076_v15 }
 0x359   : > { %3199 = vmatpush.bf16.msra.mxu0 %v5086_v26 }
 0x35a   : > { %v2416_v48 = vadd.f32 %v7095_v6, %v2341_v50  ;;  %v2342_v29 = vpop.f32.mrf.mxu3  ;;  %v8790_v50 = vld [vmem:[#allocation46_spill] sm:$0xff] }
 0x35c   : > { %v2459_v24 = vpack.c.bf16 %v2416_v48, %v2415_v23  ;;  %v2078_v28 = vpop.f32.mrf.mxu0 }
 0x35d   : > { %v2253_v30 = vpop.f32.mrf.mxu2  ;;  %v2079_v56 = vadd.f32 %v2078_v28, %v8790_v50  ;;  %v8796_v50 = vld [vmem:[#allocation50_spill] sm:$0xff] }
 0x35e   : > { %2491 = vst [vmem:[%s7116_s29 + $0x140] sm:$0xff] %v2459_v24  ;;  %v2254_v34 = vadd.f32 %v2253_v30, %v2165_v18  ;;  %v2167_v63 = vpop.f32.mrf.mxu1 }
 0x35f   : > { %2864 = vmatmul.bf16.gmra.mxu0 %v7405_v13  ;;  %3131 = vmatmul.bf16.gmra.mxu3 %v7405_v13  ;;  %v2168_v14 = vadd.f32 %v2167_v63, %v8789_v43  ;;  %v2419_v11 = vadd.f32 %v7093_v62, %v2079_v56 }
 0x360   : > { %v2343_v12 = vadd.f32 %v2342_v29, %v2254_v34  ;;  %v8791_v29 = vld [vmem:[#allocation47_spill] sm:$0xff] }
 0x361   : > { %2953 = vmatmul.bf16.gmra.mxu1 %v8733_v40 }
 0x362   : > { %v2418_v31 = vadd.f32 %v7095_v6, %v2343_v12  ;;  %3042 = vmatmul.bf16.gmra.mxu2 %v8731_v60  ;;  %v2345_v42 = vpop.f32.mrf.mxu3 }
 0x364   : > { %v2460_v41 = vpack.c.bf16 %v2418_v31, %v2417_v44  ;;  %v2080_v23 = vpop.f32.mrf.mxu0  ;;  %v8793_v44 = vld [vmem:[#allocation12_spill] sm:$0xff] }
 0x365   : > { %v2256_v0 = vpop.f32.mrf.mxu2  ;;  %v2081_v51 = vadd.f32 %v2080_v23, %v8792_v20 }
 0x366   : > { %2492 = vst [vmem:[%s7116_s29 + $0x148] sm:$0xff] %v2460_v41  ;;  %v2257_v25 = vadd.f32 %v2256_v0, %v2168_v14  ;;  %v2169_v24 = vpop.f32.mrf.mxu1  ;;  %v8794_v41 = vld [vmem:[#allocation49_spill] sm:$0xff] }
 0x367   : > { %v2170_v54 = vadd.f32 %v2169_v24, %v8791_v29  ;;  %v2421_v26 = vadd.f32 %v7093_v62, %v2081_v51  ;;  %v8795_v14 = vld [vmem:[#allocation13_spill] sm:$0xff]  ;;  %v5517_v24 = vld [vmem:[%s8487_s1 + $0x344] sm:$0xf0] }
 0x368   : > { %v2346_v48 = vadd.f32 %v2345_v42, %v2257_v25 }
 0x36a   : > { %v2420_v18 = vadd.f32 %v7095_v6, %v2346_v48  ;;  %v2347_v34 = vpop.f32.mrf.mxu3  ;;  %v5201_v48 = vld [vmem:[%s8487_s1 + $0x340] sm:$0xf] }
 0x36c   : > { %v2461_v30 = vpack.c.bf16 %v2420_v18, %v2419_v11  ;;  %v2083_v28 = vpop.f32.mrf.mxu0  ;;  %v5202_v11 = vor.u32 %v5517_v24, %v5201_v48  ;;  %v5265_v18 = vld [vmem:[%s8487_s1 + $0x3c0] sm:$0xf] }
 0x36d   : > { %v2258_v15 = vpop.f32.mrf.mxu2  ;;  %v2084_v56 = vadd.f32 %v2083_v28, %v8796_v50  ;;  %v5580_v50 = vld [vmem:[%s8487_s1 + $0x544] sm:$0xf] }
 0x36e   : > { %2493 = vst [vmem:[%s7116_s29 + $0x160] sm:$0xff] %v2461_v30  ;;  %v2259_v61 = vadd.f32 %v2258_v15, %v2170_v54  ;;  %v2172_v12 = vpop.f32.mrf.mxu1  ;;  %v5533_v30 = vld [vmem:[%s8487_s1 + $0x3c4] sm:$0xf0]  ;;  %3618 = vmatpush.bf16.msra.mxu2 %v5202_v11 }
 0x36f   : > { %2869 = vmatmul.bf16.gmra.mxu0 %v7422_v10  ;;  %3136 = vmatmul.bf16.gmra.mxu3 %v7422_v10  ;;  %v2173_v43 = vadd.f32 %v2172_v12, %v8794_v41  ;;  %v5266_v54 = vor.u32 %v5533_v30, %v5265_v18 }
 0x370   : > { %v2348_v55 = vadd.f32 %v2347_v34, %v2259_v61  ;;  %v2423_v34 = vadd.f32 %v7093_v62, %v2084_v56  ;;  %v8797_v61 = vld [vmem:[#allocation51_spill] sm:$0xff] }
 0x371   : > { %2958 = vmatmul.bf16.gmra.mxu1 %v8795_v14  ;;  %3707 = vmatpush.bf16.msra.mxu3 %v5266_v54  ;;  %v5075_v56 = vld [vmem:[%s8487_s1 + $0x548] sm:$0xf0] }
 0x372   : > { %v2422_v63 = vadd.f32 %v7095_v6, %v2348_v55  ;;  %3047 = vmatmul.bf16.gmra.mxu2 %v8793_v44  ;;  %v2350_v42 = vpop.f32.mrf.mxu3  ;;  %v5078_v48 = vor.u32 %v5580_v50, %v5075_v56  ;;  %v8802_v56 = vld [vmem:[#allocation55_spill] sm:$0xff] }
 0x374   : > { %v2462_v31 = vpack.c.bf16 %v2422_v63, %v2421_v26  ;;  %v2085_v23 = vpop.f32.mrf.mxu0  ;;  %v8798_v26 = vld [vmem:[#allocation52_spill] sm:$0xff]  ;;  %3200 = vmatpush.bf16.msra.mxu0 %v5078_v48 }
 0x375   : > { %v2261_v0 = vpop.f32.mrf.mxu2  ;;  %v2086_v63 = vadd.f32 %v2085_v23, %v8798_v26  ;;  %v7463_v23 = vld [vmem:[%s5949_s17 + $0x54] sm:$0xff] }
 0x376   : > { %2494 = vst [vmem:[%s7116_s29 + $0x168] sm:$0xff] %v2462_v31  ;;  %v2262_v25 = vadd.f32 %v2261_v0, %v2173_v43  ;;  %v2174_v15 = vpop.f32.mrf.mxu1  ;;  %v5596_v43 = vld [vmem:[%s8487_s1 + $0x5c4] sm:$0xf]  ;;  %v5139_v0 = vld [vmem:[%s8487_s1 + $0x5c8] sm:$0xf0] }
 0x377   : > { %v2175_v28 = vadd.f32 %v2174_v15, %v8797_v61  ;;  %v2425_v11 = vadd.f32 %v7093_v62, %v2086_v63 }
 0x378   : > { %v2351_v29 = vadd.f32 %v2350_v42, %v2262_v25  ;;  %v5142_v42 = vor.u32 %v5596_v43, %v5139_v0  ;;  %v8801_v43 = vld [vmem:[#allocation54_spill] sm:$0xff] }
 0x37a   : > { %v2424_v20 = vadd.f32 %v7095_v6, %v2351_v29  ;;  %v2352_v12 = vpop.f32.mrf.mxu3  ;;  %3289 = vmatpush.bf16.msra.mxu1 %v5142_v42  ;;  %v8799_v29 = vld [vmem:[#allocation53_spill] sm:$0xff] }
 0x37c   : > { %v2463_v51 = vpack.c.bf16 %v2424_v20, %v2423_v34  ;;  %v2088_v41 = vpop.f32.mrf.mxu0  ;;  %v8800_v20 = vld [vmem:[#allocation9_spill] sm:$0xff] }
 0x37d   : > { %v2263_v55 = vpop.f32.mrf.mxu2 }
 0x37e   : > { %2495 = vst [vmem:[%s7116_s29 + $0x180] sm:$0xff] %v2463_v51  ;;  %v2264_v31 = vadd.f32 %v2263_v55, %v2175_v28  ;;  %v2177_v24 = vpop.f32.mrf.mxu1  ;;  %v2089_v51 = vadd.f32 %v2088_v41, %v8800_v20 }
 0x37f   : > { %2874 = vmatmul.bf16.gmra.mxu0 %v7463_v23  ;;  %3141 = vmatmul.bf16.gmra.mxu3 %v7463_v23  ;;  %v2178_v54 = vadd.f32 %v2177_v24, %v8799_v29 }
 0x380   : > { %v2353_v25 = vadd.f32 %v2352_v12, %v2264_v31  ;;  %v2427_v26 = vadd.f32 %v7093_v62, %v2089_v51 }
 0x381   : > { %2963 = vmatmul.bf16.gmra.mxu1 %v8749_v35 }
 0x382   : > { %v2426_v18 = vadd.f32 %v7095_v6, %v2353_v25  ;;  %3052 = vmatmul.bf16.gmra.mxu2 %v8747_v52  ;;  %v2355_v34 = vpop.f32.mrf.mxu3 }
 0x384   : > { %v2464_v30 = vpack.c.bf16 %v2426_v18, %v2425_v11  ;;  %v2090_v28 = vpop.f32.mrf.mxu0  ;;  %v7480_v11 = vld [vmem:[%s5949_s17 + $0x60] sm:$0xff] }
 0x385   : > { %v2266_v15 = vpop.f32.mrf.mxu2  ;;  %v2091_v25 = vadd.f32 %v2090_v28, %v8802_v56 }
 0x386   : > { %2496 = vst [vmem:[%s7116_s29 + $0x188] sm:$0xff] %v2464_v30  ;;  %v2267_v61 = vadd.f32 %v2266_v15, %v2178_v54  ;;  %v2179_v12 = vpop.f32.mrf.mxu1  ;;  %v8803_v15 = vld [vmem:[#allocation56_spill] sm:$0xff] }
 0x387   : > { %v2180_v0 = vadd.f32 %v2179_v12, %v8801_v43  ;;  %v2429_v30 = vadd.f32 %v7093_v62, %v2091_v25  ;;  %v5193_v12 = vld [vmem:[%s8487_s1 + $0x330] sm:$0xf]  ;;  %v5531_v43 = vld [vmem:[%s8487_s1 + $0x3b4] sm:$0xf0] }
 0x388   : > { %v2356_v55 = vadd.f32 %v2355_v34, %v2267_v61 }
 0x38a   : > { %v2428_v63 = vadd.f32 %v7095_v6, %v2356_v55  ;;  %v2357_v50 = vpop.f32.mrf.mxu3 }
 0x38c   : > { %v2465_v31 = vpack.c.bf16 %v2428_v63, %v2427_v26  ;;  %v2093_v41 = vpop.f32.mrf.mxu0  ;;  %v5515_v26 = vld [vmem:[%s8487_s1 + $0x334] sm:$0xf0] }
 0x38d   : > { %v2268_v42 = vpop.f32.mrf.mxu2  ;;  %v2094_v61 = vadd.f32 %v2093_v41, %v7050_v22  ;;  %v5194_v63 = vor.u32 %v5515_v26, %v5193_v12  ;;  %v5594_v22 = vld [vmem:[%s8487_s1 + $0x5b4] sm:$0xf]  ;;  %v7521_v26 = vld [vmem:[%s5949_s17 + $0x6c] sm:$0xff] }
 0x38e   : > { %2497 = vst [vmem:[%s7116_s29 + $0x1a0] sm:$0xff] %v2465_v31  ;;  %v2269_v48 = vadd.f32 %v2268_v42, %v2180_v0  ;;  %v2182_v18 = vpop.f32.mrf.mxu1  ;;  %v5257_v31 = vld [vmem:[%s8487_s1 + $0x3b0] sm:$0xf] }
 0x38f   : > { %2879 = vmatmul.bf16.gmra.mxu0 %v7480_v11  ;;  %3146 = vmatmul.bf16.gmra.mxu3 %v7480_v11  ;;  %v2183_v34 = vadd.f32 %v2182_v18, %v8803_v15  ;;  %v5258_v42 = vor.u32 %v5531_v43, %v5257_v31  ;;  %v5067_v18 = vld [vmem:[%s8487_s1 + $0x538] sm:$0xf0] }
 0x390   : > { %v2358_v24 = vadd.f32 %v2357_v50, %v2269_v48  ;;  %v5131_v50 = vld [vmem:[%s8487_s1 + $0x5b8] sm:$0xf0]  ;;  %3619 = vmatpush.bf16.msra.mxu2 %v5194_v63  ;;  %v2431_v48 = vadd.f32 %v7093_v62, %v2094_v61 }
 0x391   : > { %2968 = vmatmul.bf16.gmra.mxu1 %v8755_v53  ;;  %v5134_v25 = vor.u32 %v5594_v22, %v5131_v50  ;;  %3708 = vmatpush.bf16.msra.mxu3 %v5258_v42  ;;  %v8805_v22 = vld [vmem:[#allocation58_spill] sm:$0xff]  ;;  %v8806_v50 = vld [vmem:[#allocation60_spill] sm:$0xff] }
 0x392   : > { %v2430_v29 = vadd.f32 %v7095_v6, %v2358_v24  ;;  %3057 = vmatmul.bf16.gmra.mxu2 %v8754_v19  ;;  %v2360_v51 = vpop.f32.mrf.mxu3  ;;  %v5578_v24 = vld [vmem:[%s8487_s1 + $0x534] sm:$0xf] }
 0x393   : > { %3290 = vmatpush.bf16.msra.mxu1 %v5134_v25 }
 0x394   : > { %v2466_v54 = vpack.c.bf16 %v2430_v29, %v2429_v30  ;;  %v2095_v55 = vpop.f32.mrf.mxu0  ;;  %v5070_v30 = vor.u32 %v5578_v24, %v5067_v18 }
 0x395   : > { %v2271_v20 = vpop.f32.mrf.mxu2 }
 0x396   : > { %2498 = vst [vmem:[%s7116_s29 + $0x1a8] sm:$0xff] %v2466_v54  ;;  %v2272_v28 = vadd.f32 %v2271_v20, %v2183_v34  ;;  %v2184_v56 = vpop.f32.mrf.mxu1  ;;  %3201 = vmatpush.bf16.msra.mxu0 %v5070_v30  ;;  %v8804_v20 = vld [vmem:[#allocation57_spill] sm:$0xff] }
 0x397   : > { %v2185_v54 = vadd.f32 %v2184_v56, %v7052_v38 }
 0x398   : > { %v2361_v0 = vadd.f32 %v2360_v51, %v2272_v28  ;;  %v2096_v51 = vadd.f32 %v2095_v55, %v8804_v20 }
 0x39a   : > { %v2432_v41 = vadd.f32 %v7095_v6, %v2361_v0  ;;  %v2362_v34 = vpop.f32.mrf.mxu3  ;;  %v2433_v31 = vadd.f32 %v7093_v62, %v2096_v51  ;;  %v8808_v51 = vld [vmem:[#allocation61_spill] sm:$0xff] }
 0x39c   : > { %v2467_v29 = vpack.c.bf16 %v2432_v41, %v2431_v48  ;;  %v2098_v28 = vpop.f32.mrf.mxu0 }
 0x39d   : > { %v2273_v15 = vpop.f32.mrf.mxu2  ;;  %v2099_v56 = vadd.f32 %v2098_v28, %v8806_v50  ;;  %v5513_v50 = vld [vmem:[%s8487_s1 + $0x324] sm:$0xf0] }
 0x39e   : > { %2499 = vst [vmem:[%s7116_s29 + $0x1c0] sm:$0xff] %v2467_v29  ;;  %v2274_v61 = vadd.f32 %v2273_v15, %v2185_v54  ;;  %v2187_v63 = vpop.f32.mrf.mxu1  ;;  %v8807_v54 = vld [vmem:[#allocation59_spill] sm:$0xff] }
 0x39f   : > { %2884 = vmatmul.bf16.gmra.mxu0 %v7521_v26  ;;  %3151 = vmatmul.bf16.gmra.mxu3 %v7521_v26  ;;  %v2188_v55 = vadd.f32 %v2187_v63, %v8805_v22  ;;  %v2435_v18 = vadd.f32 %v7093_v62, %v2099_v56  ;;  %v5249_v56 = vld [vmem:[%s8487_s1 + $0x3a0] sm:$0xf] }
 0x3a0   : > { %v2363_v12 = vadd.f32 %v2362_v34, %v2274_v61 }
 0x3a1   : > { %2973 = vmatmul.bf16.gmra.mxu1 %v6146_v46 }
 0x3a2   : > { %v2434_v43 = vadd.f32 %v7095_v6, %v2363_v12  ;;  %3062 = vmatmul.bf16.gmra.mxu2 %v8760_v4  ;;  %v2365_v42 = vpop.f32.mrf.mxu3 }
 0x3a4   : > { %v2468_v38 = vpack.c.bf16 %v2434_v43, %v2433_v31  ;;  %v2100_v48 = vpop.f32.mrf.mxu0  ;;  %v7538_v31 = vld [vmem:[%s5949_s17 + $0x78] sm:$0xff] }
 0x3a5   : > { %v2276_v0 = vpop.f32.mrf.mxu2  ;;  %v2101_v61 = vadd.f32 %v2100_v48, %v8808_v51 }
 0x3a6   : > { %2500 = vst [vmem:[%s7116_s29 + $0x1c8] sm:$0xff] %v2468_v38  ;;  %v2277_v25 = vadd.f32 %v2276_v0, %v2188_v55  ;;  %v2189_v24 = vpop.f32.mrf.mxu1 }
 0x3a7   : > { %v2190_v15 = vadd.f32 %v2189_v24, %v8807_v54  ;;  %v2437_v38 = vadd.f32 %v7093_v62, %v2101_v61  ;;  %v5529_v24 = vld [vmem:[%s8487_s1 + $0x3a4] sm:$0xf0]  ;;  %v5592_v54 = vld [vmem:[%s8487_s1 + $0x5a4] sm:$0xf] }
 0x3a8   : > { %v2366_v41 = vadd.f32 %v2365_v42, %v2277_v25  ;;  %v5185_v42 = vld [vmem:[%s8487_s1 + $0x320] sm:$0xf]  ;;  %v5576_v61 = vld [vmem:[%s8487_s1 + $0x524] sm:$0xf] }
 0x3aa   : > { %v2436_v30 = vadd.f32 %v7095_v6, %v2366_v41  ;;  %v2367_v20 = vpop.f32.mrf.mxu3  ;;  %v5186_v41 = vor.u32 %v5513_v50, %v5185_v42 }
 0x3ac   : > { %v2469_v29 = vpack.c.bf16 %v2436_v30, %v2435_v18  ;;  %v2850_v63 = vpop.f32.mrf.mxu0  ;;  %3620 = vmatpush.bf16.msra.mxu2 %v5186_v41 }
 0x3ad   : > { %v2278_v34 = vpop.f32.mrf.mxu2 }
 0x3ae   : > { %2501 = vst [vmem:[%s7116_s29 + $0x1e0] sm:$0xff] %v2469_v29  ;;  %v2279_v12 = vadd.f32 %v2278_v34, %v2190_v15  ;;  %v2939_v43 = vpop.f32.mrf.mxu1  ;;  %v5250_v29 = vor.u32 %v5529_v24, %v5249_v56  ;;  %v5123_v15 = vld [vmem:[%s8487_s1 + $0x5a8] sm:$0xf0] }
 0x3af   : > { %2889 = vmatmul.bf16.gmra.mxu0 %v7538_v31  ;;  %v2940_v55 = vadd.f32 %v2939_v43, %v2850_v63  ;;  %3156 = vmatmul.bf16.gmra.mxu3 %v7538_v31  ;;  %v5126_v34 = vor.u32 %v5592_v54, %v5123_v15 }
 0x3b0   : > { %v2368_v28 = vadd.f32 %v2367_v20, %v2279_v12  ;;  %3709 = vmatpush.bf16.msra.mxu3 %v5250_v29  ;;  %v5059_v12 = vld [vmem:[%s8487_s1 + $0x528] sm:$0xf0] }
 0x3b1   : > { %2978 = vmatmul.bf16.gmra.mxu1 %v6188_v32  ;;  %v5062_v63 = vor.u32 %v5576_v61, %v5059_v12  ;;  %v5177_v12 = vld [vmem:[%s8487_s1 + $0x310] sm:$0xf] }
 0x3b2   : > { %v2438_v22 = vadd.f32 %v7095_v6, %v2368_v28  ;;  %3067 = vmatmul.bf16.gmra.mxu2 %v8761_v5  ;;  %v7555_v48 = vpop.f32.mrf.mxu3  ;;  %3291 = vmatpush.bf16.msra.mxu1 %v5126_v34 }
 0x3b3   : > { %3202 = vmatpush.bf16.msra.mxu0 %v5062_v63  ;;  %v5511_v63 = vld [vmem:[%s8487_s1 + $0x314] sm:$0xf0] }
 0x3b4   : > { %v2470_v0 = vpack.c.bf16 %v2438_v22, %v2437_v38  ;;  %v2852_v30 = vpop.f32.mrf.mxu0 }
 0x3b5   : > { %v3028_v25 = vpop.f32.mrf.mxu2 }
 0x3b6   : > { %2502 = vst [vmem:[%s7116_s29 + $0x1e8] sm:$0xff] %v2470_v0  ;;  %v7561_v18 = vadd.f32 %v3028_v25, %v2940_v55  ;;  %v2941_v20 = vpop.f32.mrf.mxu1  ;;  %v7580_v55 = vld [vmem:[%s5949_s17 + $0x84] sm:$0xff] }
 0x3b7   : > { %v2942_v51 = vadd.f32 %v2941_v20, %v2852_v30  ;;  %v7595_v20 = vld [vmem:[%s5949_s17 + $0x90] sm:$0xff] }
 0x3b8   : > { %8809 = vst [vmem:[#allocation64_spill] sm:$0xff] %v7595_v20 }
 0x3ba   : > { %v7575_v43 = vpop.f32.mrf.mxu3 }
 0x3bc   : > { %v2855_v22 = vpop.f32.mrf.mxu0 }
 0x3bd   : > { %v3030_v28 = vpop.f32.mrf.mxu2 }
 0x3be   : > { %v7577_v38 = vadd.f32 %v3030_v28, %v2942_v51  ;;  %v2944_v0 = vpop.f32.mrf.mxu1  ;;  %v5241_v28 = vld [vmem:[%s8487_s1 + $0x390] sm:$0xf] }
 0x3bf   : > { %2894 = vmatmul.bf16.gmra.mxu0 %v7580_v55  ;;  %v2945_v42 = vadd.f32 %v2944_v0, %v2855_v22  ;;  %3161 = vmatmul.bf16.gmra.mxu3 %v7580_v55 }
 0x3c1   : > { %2983 = vmatmul.bf16.gmra.mxu1 %v6206_v8 }
 0x3c2   : > { %3072 = vmatmul.bf16.gmra.mxu2 %v8762_v7  ;;  %v7586_v56 = vpop.f32.mrf.mxu3 }
 0x3c4   : > { %v2857_v41 = vpop.f32.mrf.mxu0 }
 0x3c5   : > { %v3033_v50 = vpop.f32.mrf.mxu2 }
 0x3c6   : > { %v7588_v25 = vadd.f32 %v3033_v50, %v2945_v42  ;;  %v2946_v24 = vpop.f32.mrf.mxu1  ;;  %v5178_v42 = vor.u32 %v5511_v63, %v5177_v12  ;;  %v5527_v50 = vld [vmem:[%s8487_s1 + $0x394] sm:$0xf0] }
 0x3c7   : > { %v2947_v30 = vadd.f32 %v2946_v24, %v2857_v41 }
 0x3c8   : > { %3621 = vmatpush.bf16.msra.mxu2 %v5178_v42 }
 0x3ca   : > { %v7590_v54 = vpop.f32.mrf.mxu3 }
 0x3cc   : > { %v2860_v34 = vpop.f32.mrf.mxu0 }
 0x3cd   : > { %v3035_v29 = vpop.f32.mrf.mxu2 }
 0x3ce   : > { %v7592_v15 = vadd.f32 %v3035_v29, %v2947_v30  ;;  %v2949_v51 = vpop.f32.mrf.mxu1  ;;  %v5242_v30 = vor.u32 %v5527_v50, %v5241_v28  ;;  %v5590_v29 = vld [vmem:[%s8487_s1 + $0x594] sm:$0xf]  ;;  %v5051_v28 = vld [vmem:[%s8487_s1 + $0x518] sm:$0xf0] }
 0x3cf   : > { %2899 = vmatmul.bf16.gmra.mxu0 %v7595_v20  ;;  %v2950_v61 = vadd.f32 %v2949_v51, %v2860_v34  ;;  %3166 = vmatmul.bf16.gmra.mxu3 %v7595_v20  ;;  %v5115_v34 = vld [vmem:[%s8487_s1 + $0x598] sm:$0xf0] }
 0x3d0   : > { %v5118_v51 = vor.u32 %v5590_v29, %v5115_v34  ;;  %3710 = vmatpush.bf16.msra.mxu3 %v5242_v30  ;;  %v7634_v30 = vld [vmem:[%s5949_s17 + $0x9c] sm:$0xff] }
 0x3d1   : > { %2988 = vmatmul.bf16.gmra.mxu1 %v8767_v1  ;;  %8810 = vst [vmem:[#allocation17_spill] sm:$0xff] %v7634_v30 }
 0x3d2   : > { %3077 = vmatmul.bf16.gmra.mxu2 %v8766_v58  ;;  %v7610_v0 = vpop.f32.mrf.mxu3  ;;  %3292 = vmatpush.bf16.msra.mxu1 %v5118_v51 }
 0x3d4   : > { %v2862_v24 = vpop.f32.mrf.mxu0 }
 0x3d5   : > { %v3038_v22 = vpop.f32.mrf.mxu2 }
 0x3d6   : > { %v7615_v41 = vadd.f32 %v3038_v22, %v2950_v61  ;;  %v2951_v12 = vpop.f32.mrf.mxu1  ;;  %v5574_v61 = vld [vmem:[%s8487_s1 + $0x514] sm:$0xf] }
 0x3d7   : > { %v2952_v63 = vadd.f32 %v2951_v12, %v2862_v24  ;;  %v5054_v22 = vor.u32 %v5574_v61, %v5051_v28 }
 0x3d9   : > { %3203 = vmatpush.bf16.msra.mxu0 %v5054_v22 }
 0x3da   : > { %v7629_v6 = vpop.f32.mrf.mxu3 }
 0x3dc   : > { %v2865_v42 = vpop.f32.mrf.mxu0 }
 0x3dd   : > { %v3040_v50 = vpop.f32.mrf.mxu2 }
 0x3de   : > { %v7631_v62 = vadd.f32 %v3040_v50, %v2952_v63  ;;  %v2954_v24 = vpop.f32.mrf.mxu1 }
 0x3df   : > { %2904 = vmatmul.bf16.gmra.mxu0 %v7634_v30  ;;  %v2955_v29 = vadd.f32 %v2954_v24, %v2865_v42  ;;  %3171 = vmatmul.bf16.gmra.mxu3 %v7634_v30 }
 0x3e1   : > { %2993 = vmatmul.bf16.gmra.mxu1 %v8774_v45 }
 0x3e2   : > { %3082 = vmatmul.bf16.gmra.mxu2 %v8773_v39  ;;  %v7640_v51 = vpop.f32.mrf.mxu3 }
 0x3e3   : > { %8811 = vst [vmem:[#allocation65_spill] sm:$0xff] %v7640_v51 }
 0x3e4   : > { %v2867_v63 = vpop.f32.mrf.mxu0 }
 0x3e5   : > { %v3043_v34 = vpop.f32.mrf.mxu2 }
 0x3e6   : > { %v7642_v12 = vadd.f32 %v3043_v34, %v2955_v29  ;;  %v2956_v61 = vpop.f32.mrf.mxu1  ;;  %v5169_v29 = vld [vmem:[%s8487_s1 + $0x300] sm:$0xf]  ;;  %v5509_v34 = vld [vmem:[%s8487_s1 + $0x304] sm:$0xf0] }
 0x3e7   : > { %v2957_v28 = vadd.f32 %v2956_v61, %v2867_v63  ;;  %v5233_v63 = vld [vmem:[%s8487_s1 + $0x380] sm:$0xf] }
 0x3e8   : > { %8812 = vst [vmem:[#allocation66_spill] sm:$0xff] %v7642_v12 }
 0x3ea   : > { %v7644_v50 = vpop.f32.mrf.mxu3 }
 0x3eb   : > { %8813 = vst [vmem:[#allocation21_spill] sm:$0xff] %v7644_v50 }
 0x3ec   : > { %v2870_v42 = vpop.f32.mrf.mxu0 }
 0x3ed   : > { %v3045_v22 = vpop.f32.mrf.mxu2 }
 0x3ee   : > { %v7646_v20 = vadd.f32 %v3045_v22, %v2957_v28  ;;  %v2959_v24 = vpop.f32.mrf.mxu1  ;;  %v5170_v22 = vor.u32 %v5509_v34, %v5169_v29 }
 0x3ef   : > { %2909 = vmatmul.bf16.gmra.mxu0 %v7258_v49  ;;  %v2960_v30 = vadd.f32 %v2959_v24, %v2870_v42  ;;  %3176 = vmatmul.bf16.gmra.mxu3 %v7258_v49  ;;  %v5525_v49 = vld [vmem:[%s8487_s1 + $0x384] sm:$0xf0] }
 0x3f0   : > { %8814 = vst [vmem:[#allocation67_spill] sm:$0xff] %v7646_v20  ;;  %v5107_v20 = vld [vmem:[%s8487_s1 + $0x588] sm:$0xf0]  ;;  %3622 = vmatpush.bf16.msra.mxu2 %v5170_v22 }
 0x3f1   : > { %2998 = vmatmul.bf16.gmra.mxu1 %v8778_v3  ;;  %v5588_v3 = vld [vmem:[%s8487_s1 + $0x584] sm:$0xf] }
 0x3f2   : > { %3087 = vmatmul.bf16.gmra.mxu2 %v8777_v16  ;;  %v7661_v28 = vpop.f32.mrf.mxu3  ;;  %v5234_v16 = vor.u32 %v5525_v49, %v5233_v63  ;;  %v5110_v50 = vor.u32 %v5588_v3, %v5107_v20  ;;  %v5043_v63 = vld [vmem:[%s8487_s1 + $0x508] sm:$0xf0] }
 0x3f3   : > { %8815 = vst [vmem:[#allocation68_spill] sm:$0xff] %v7661_v28 }
 0x3f4   : > { %v2872_v24 = vpop.f32.mrf.mxu0  ;;  %3711 = vmatpush.bf16.msra.mxu3 %v5234_v16  ;;  %3293 = vmatpush.bf16.msra.mxu1 %v5110_v50 }
 0x3f5   : > { %v3048_v61 = vpop.f32.mrf.mxu2 }
 0x3f6   : > { %v7666_v42 = vadd.f32 %v3048_v61, %v2960_v30  ;;  %v2961_v29 = vpop.f32.mrf.mxu1  ;;  %v5572_v30 = vld [vmem:[%s8487_s1 + $0x504] sm:$0xf] }
 0x3f7   : > { %v2962_v34 = vadd.f32 %v2961_v29, %v2872_v24  ;;  %v5046_v61 = vor.u32 %v5572_v30, %v5043_v63 }
 0x3f8   : > { %8816 = vst [vmem:[#allocation69_spill] sm:$0xff] %v7666_v42 }
 0x3f9   : > { %3204 = vmatpush.bf16.msra.mxu0 %v5046_v61 }
 0x3fa   : > { %v7680_v42 = vpop.f32.mrf.mxu3 }
 0x3fb   : > { %8817 = vst [vmem:[#allocation70_spill] sm:$0xff] %v7680_v42  ;;  %v5227_v42 = vld [vmem:[%s8487_s1 + $0x378] sm:$0xf0] }
 0x3fc   : > { %v2875_v3 = vpop.f32.mrf.mxu0 }
 0x3fd   : > { %v3050_v49 = vpop.f32.mrf.mxu2 }
 0x3fe   : > { %v7682_v28 = vadd.f32 %v3050_v49, %v2962_v34  ;;  %v2964_v16 = vpop.f32.mrf.mxu1 }
 0x3ff   : > { %2914 = vmatmul.bf16.gmra.mxu0 %v7299_v37  ;;  %v2965_v20 = vadd.f32 %v2964_v16, %v2875_v3  ;;  %3181 = vmatmul.bf16.gmra.mxu3 %v7299_v37  ;;  %v253_v16 = vld [vmem:[%s5949_s17 + $0xd4] sm:$0x1] }
 0x400   : > { %8818 = vst [vmem:[#allocation71_spill] sm:$0xff] %v7682_v28  ;;  %v397_v28 = vunpack.c.l.b16 %v253_v16 }
 0x401   : > { %3003 = vmatmul.bf16.gmra.mxu1 %v8684_v27  ;;  %v5411_v27 = vld [vmem:[%s5949_s17 + $0xcc] sm:$0xff] }
 0x402   : > { %3092 = vmatmul.bf16.gmra.mxu2 %v8780_v59  ;;  %v7688_v22 = vpop.f32.mrf.mxu3  ;;  %v7698_v59 = vld [vmem:[%s5949_s17 + $0xc0] sm:$0xff]  ;;  %v415_v16 = vpack.c.b16 %v397_v28, %v397_v28 }
 0x403   : > { %8819 = vst [vmem:[#allocation27_spill] sm:$0xff] %v7688_v22 }
 0x404   : > { %v2877_v29 = vpop.f32.mrf.mxu0  ;;  %8823 = vst [vmem:[#allocation72_spill] sm:$0xff] %v7698_v59  ;;  %v629_v12 = vshll.u32 %v415_v16, 16 }
 0x405   : > { %v3053_v50 = vpop.f32.mrf.mxu2 }
 0x406   : > { %v7690_v24 = vadd.f32 %v3053_v50, %v2965_v20  ;;  %v2966_v34 = vpop.f32.mrf.mxu1  ;;  %v8824_v20 = vld [vmem:[#allocation41_spill] sm:$0xff]  ;;  %v8825_v50 = vld [vmem:[#allocation42_spill] sm:$0xff] }
 0x407   : > { %v2967_v30 = vadd.f32 %v2966_v34, %v2877_v29  ;;  %v5538_v29 = vld [vmem:[%s8487_s1 + $0x3f4] sm:$0xf]  ;;  %v5291_v34 = vld [vmem:[%s8487_s1 + $0x3f8] sm:$0xf0] }
 0x408   : > { %8820 = vst [vmem:[#allocation28_spill] sm:$0xff] %v7690_v24  ;;  %v5522_v24 = vld [vmem:[%s8487_s1 + $0x374] sm:$0xf] }
 0x409   : > { %v5230_v28 = vor.u32 %v5522_v24, %v5227_v42 }
 0x40a   : > { %v7692_v61 = vpop.f32.mrf.mxu3 }
 0x40b   : > { %8821 = vst [vmem:[#allocation29_spill] sm:$0xff] %v7692_v61  ;;  %3882 = vmatpush.bf16.msrb.mxu1 %v5230_v28 }
 0x40c   : > { %v2880_v3 = vpop.f32.mrf.mxu0 }
 0x40d   : > { %v3055_v63 = vpop.f32.mrf.mxu2 }
 0x40e   : > { %v7694_v49 = vadd.f32 %v3055_v63, %v2967_v30  ;;  %v2969_v37 = vpop.f32.mrf.mxu1  ;;  %v5554_v30 = vld [vmem:[%s8487_s1 + $0x474] sm:$0xf] }
 0x40f   : > { %2919 = vmatmul.bf16.gmra.mxu0 %v7698_v59  ;;  %v2970_v22 = vadd.f32 %v2969_v37, %v2880_v3  ;;  %3186 = vmatmul.bf16.gmra.mxu3 %v7698_v59  ;;  %v624_v37 = vshll.u32 %v5411_v27, 16  ;;  %v5294_v59 = vor.u32 %v5538_v29, %v5291_v34  ;;  %v622_v34 = vshrl.u32 %v5411_v27, 16 }
 0x410   : > { %8822 = vst [vmem:[#allocation33_spill] sm:$0xff] %v7694_v49 }
 0x411   : > { %3008 = vmatmul.bf16.gmra.mxu1 %v8825_v50  ;;  %3971 = vmatpush.bf16.msrb.mxu2 %v5294_v59 }
 0x412   : > { %3097 = vmatmul.bf16.gmra.mxu2 %v8824_v20  ;;  %v7714_v3 = vpop.f32.mrf.mxu3  ;;  %v5355_v20 = vld [vmem:[%s8487_s1 + $0x478] sm:$0xf0] }
 0x413   : > { %8826 = vst [vmem:[#allocation34_spill] sm:$0xff] %v7714_v3  ;;  %v5358_v61 = vor.u32 %v5554_v30, %v5355_v20  ;;  %v626_v3 = vrot.slane %v624_v37, 1  ;;  %v5353_v20 = vld [vmem:[%s8487_s1 + $0x470] sm:$0xf]  ;;  %v5555_v30 = vld [vmem:[%s8487_s1 + $0x474] sm:$0xf0] }
 0x414   : > { %v2882_v49 = vpop.f32.mrf.mxu0  ;;  %v5354_v39 = vor.u32 %v5555_v30, %v5353_v20 }
 0x415   : > { %v3058_v63 = vpop.f32.mrf.mxu2  ;;  %4060 = vmatpush.bf16.msrb.mxu3 %v5358_v61  ;;  %v627_v24 = vor.u32 %v626_v3, %v622_v34  ;;  %v631_v61 = vrot.slane %v629_v12, 1 }
 0x416   : > { %v7719_v50 = vadd.f32 %v3058_v63, %v2970_v22  ;;  %v2971_v29 = vpop.f32.mrf.mxu1  ;;  %v703_v63 = vrot.slane %v5411_v27, 1  ;;  %3793 = vmatpush.bf16.msrb.mxu0 %v5354_v39 }
 0x417   : > { %v2972_v22 = vadd.f32 %v2971_v29, %v2882_v49  ;;  %v7741_v45 = vsel %vm416_vm1, %v627_v24, %v631_v61  ;;  %v7755_v24 = vld [vmem:[%s5949_s17 + $0xc] sm:$0xff] }
 0x418   : > { %8827 = vst [vmem:[#allocation35_spill] sm:$0xff] %v7719_v50  ;;  %v704_v50 = vrot.slane %v415_v16, 1  ;;  %v8829_v61 = vld [vmem:[#allocation3_spill] sm:$0xff] }
 0x419   : > { %8828 = vst [vmem:[#allocation36_spill] sm:$0xff] %v7755_v24 }
 0x41a   : > { %v7733_v42 = vpop.f32.mrf.mxu3  ;;  %v7738_v28 = vsel %vm651_vm0, %v703_v63, %v704_v50 }
 0x41c   : > { %v2885_v49 = vpop.f32.mrf.mxu0 }
 0x41d   : > { %v3060_v59 = vpop.f32.mrf.mxu2 }
 0x41e   : > { %v7735_v37 = vadd.f32 %v3060_v59, %v2972_v22  ;;  %v2974_v29 = vpop.f32.mrf.mxu1 }
 0x41f   : > { %2924 = vmatmul.bf16.gmra.mxu0 %v5411_v27  ;;  %v2975_v51 = vadd.f32 %v2974_v29, %v2885_v49  ;;  %3191 = vmatmul.bf16.gmra.mxu3 %v5411_v27  ;;  %v5283_v49 = vld [vmem:[%s8487_s1 + $0x3e8] sm:$0xf0]  ;;  %v5552_v29 = vld [vmem:[%s8487_s1 + $0x464] sm:$0xf] }
 0x421   : > { %3013 = vmatmul.bf16.gmra.mxu1 %v7741_v45 }
 0x422   : > { %3102 = vmatmul.bf16.gmra.mxu2 %v7738_v28  ;;  %v7745_v39 = vpop.f32.mrf.mxu3 }
 0x424   : > { %v2887_v16 = vpop.f32.mrf.mxu0 }
 0x425   : > { %v3063_v12 = vpop.f32.mrf.mxu2 }
 0x426   : > { %v7747_v3 = vadd.f32 %v3063_v12, %v2975_v51  ;;  %v2976_v50 = vpop.f32.mrf.mxu1  ;;  %v5536_v51 = vld [vmem:[%s8487_s1 + $0x3e4] sm:$0xf] }
 0x427   : > { %v2977_v34 = vadd.f32 %v2976_v50, %v2887_v16  ;;  %v5286_v50 = vor.u32 %v5536_v51, %v5283_v49 }
 0x429   : > { %3972 = vmatpush.bf16.msrb.mxu2 %v5286_v50 }
 0x42a   : > { %v7749_v20 = vpop.f32.mrf.mxu3 }
 0x42c   : > { %v2890_v63 = vpop.f32.mrf.mxu0 }
 0x42d   : > { %v3065_v22 = vpop.f32.mrf.mxu2 }
 0x42e   : > { %v7751_v30 = vadd.f32 %v3065_v22, %v2977_v34  ;;  %v2979_v59 = vpop.f32.mrf.mxu1  ;;  %v5347_v34 = vld [vmem:[%s8487_s1 + $0x468] sm:$0xf0] }
 0x42f   : > { %3205 = vmatmul.bf16.vlgmr.msra.gmra.mxu0 %v8705_v2  ;;  %v2980_v27 = vadd.f32 %v2979_v59, %v2890_v63  ;;  %3712 = vmatmul.bf16.vlgmr.msra.gmra.mxu3 %v8829_v61  ;;  %v5350_v59 = vor.u32 %v5552_v29, %v5347_v34  ;;  %v5553_v29 = vld [vmem:[%s8487_s1 + $0x464] sm:$0xf0] }
 0x431   : > { %3294 = vmatmul.bf16.vlgmr.msra.gmra.mxu1 %v8703_v36  ;;  %v5520_v36 = vld [vmem:[%s8487_s1 + $0x364] sm:$0xf]  ;;  %4061 = vmatpush.bf16.msrb.mxu3 %v5350_v59 }
 0x432   : > { %3623 = vmatmul.bf16.vlgmr.msra.gmra.mxu2 %v7755_v24  ;;  %v7769_v16 = vpop.f32.mrf.mxu3  ;;  %v5219_v24 = vld [vmem:[%s8487_s1 + $0x368] sm:$0xf0] }
 0x433   : > { %v5222_v61 = vor.u32 %v5520_v36, %v5219_v24 }
 0x434   : > { %v2892_v63 = vpop.f32.mrf.mxu0 }
 0x435   : > { %v3068_v12 = vpop.f32.mrf.mxu2  ;;  %3883 = vmatpush.bf16.msrb.mxu1 %v5222_v61 }
 0x436   : > { %v7774_v22 = vadd.f32 %v3068_v12, %v2980_v27  ;;  %v2981_v51 = vpop.f32.mrf.mxu1  ;;  %v5345_v27 = vld [vmem:[%s8487_s1 + $0x460] sm:$0xf] }
 0x437   : > { %v2982_v49 = vadd.f32 %v2981_v51, %v2892_v63  ;;  %v5346_v12 = vor.u32 %v5553_v29, %v5345_v27  ;;  %v7794_v63 = vld [vmem:[%s5949_s17 + $0x18] sm:$0xff] }
 0x438   : > { %8830 = vst [vmem:[#allocation39_spill] sm:$0xff] %v7774_v22 }
 0x439   : > { %3794 = vmatpush.bf16.msrb.mxu0 %v5346_v12  ;;  %8832 = vst [vmem:[#allocation40_spill] sm:$0xff] %v7794_v63 }
 0x43a   : > { %v7788_v22 = vpop.f32.mrf.mxu3 }
 0x43c   : > { %v2895_v36 = vpop.f32.mrf.mxu0 }
 0x43d   : > { %v3070_v34 = vpop.f32.mrf.mxu2 }
 0x43e   : > { %v7790_v50 = vadd.f32 %v3070_v34, %v2982_v49  ;;  %v2984_v24 = vpop.f32.mrf.mxu1 }
 0x43f   : > { %3210 = vmatmul.bf16.gmra.mxu0 %v8715_v17  ;;  %v2985_v61 = vadd.f32 %v2984_v24, %v2895_v36  ;;  %3717 = vmatmul.bf16.gmra.mxu3 %v8705_v2 }
 0x440   : > { %8831 = vst [vmem:[#allocation26_spill] sm:$0xff] %v7790_v50 }
 0x441   : > { %3299 = vmatmul.bf16.gmra.mxu1 %v8713_v21  ;;  %v5211_v21 = vld [vmem:[%s8487_s1 + $0x358] sm:$0xf0] }
 0x442   : > { %3628 = vmatmul.bf16.gmra.mxu2 %v7794_v63  ;;  %v7799_v51 = vpop.f32.mrf.mxu3 }
 0x444   : > { %v2897_v49 = vpop.f32.mrf.mxu0 }
 0x445   : > { %v3073_v59 = vpop.f32.mrf.mxu2 }
 0x446   : > { %v7801_v27 = vadd.f32 %v3073_v59, %v2985_v61  ;;  %v2986_v29 = vpop.f32.mrf.mxu1  ;;  %v5534_v61 = vld [vmem:[%s8487_s1 + $0x3d4] sm:$0xf]  ;;  %v5275_v59 = vld [vmem:[%s8487_s1 + $0x3d8] sm:$0xf0] }
 0x447   : > { %v2987_v12 = vadd.f32 %v2986_v29, %v2897_v49  ;;  %v5550_v49 = vld [vmem:[%s8487_s1 + $0x454] sm:$0xf] }
 0x44a   : > { %v7803_v50 = vpop.f32.mrf.mxu3 }
 0x44c   : > { %v2900_v24 = vpop.f32.mrf.mxu0 }
 0x44d   : > { %v3075_v34 = vpop.f32.mrf.mxu2 }
 0x44e   : > { %v7805_v36 = vadd.f32 %v3075_v34, %v2987_v12  ;;  %v2989_v63 = vpop.f32.mrf.mxu1  ;;  %v5339_v12 = vld [vmem:[%s8487_s1 + $0x458] sm:$0xf0] }
 0x44f   : > { %3215 = vmatmul.bf16.gmra.mxu0 %v8723_v47  ;;  %v2990_v2 = vadd.f32 %v2989_v63, %v2900_v24  ;;  %3722 = vmatmul.bf16.gmra.mxu3 %v8715_v17  ;;  %v5518_v17 = vld [vmem:[%s8487_s1 + $0x354] sm:$0xf] }
 0x450   : > { %8833 = vst [vmem:[#allocation32_spill] sm:$0xff] %v7805_v36  ;;  %v5214_v36 = vor.u32 %v5518_v17, %v5211_v21 }
 0x451   : > { %3304 = vmatmul.bf16.gmra.mxu1 %v8721_v9  ;;  %v5342_v9 = vor.u32 %v5550_v49, %v5339_v12  ;;  %v5551_v49 = vld [vmem:[%s8487_s1 + $0x454] sm:$0xf0] }
 0x452   : > { %3633 = vmatmul.bf16.gmra.mxu2 %v7347_v33  ;;  %v7820_v63 = vpop.f32.mrf.mxu3  ;;  %v5278_v33 = vor.u32 %v5534_v61, %v5275_v59  ;;  %3884 = vmatpush.bf16.msrb.mxu1 %v5214_v36 }
 0x453   : > { %8834 = vst [vmem:[#allocation43_spill] sm:$0xff] %v7820_v63  ;;  %4062 = vmatpush.bf16.msrb.mxu3 %v5342_v9 }
 0x454   : > { %v2902_v24 = vpop.f32.mrf.mxu0  ;;  %3973 = vmatpush.bf16.msrb.mxu2 %v5278_v33 }
 0x455   : > { %v3078_v29 = vpop.f32.mrf.mxu2 }
 0x456   : > { %v7825_v34 = vadd.f32 %v3078_v29, %v2990_v2  ;;  %v2991_v61 = vpop.f32.mrf.mxu1  ;;  %v5337_v2 = vld [vmem:[%s8487_s1 + $0x450] sm:$0xf] }
 0x457   : > { %v2992_v59 = vadd.f32 %v2991_v61, %v2902_v24  ;;  %v5338_v29 = vor.u32 %v5551_v49, %v5337_v2 }
 0x458   : > { %8835 = vst [vmem:[#allocation44_spill] sm:$0xff] %v7825_v34 }
 0x459   : > { %3795 = vmatpush.bf16.msrb.mxu0 %v5338_v29 }
 0x45a   : > { %v7839_v34 = vpop.f32.mrf.mxu3 }
 0x45c   : > { %v2905_v21 = vpop.f32.mrf.mxu0 }
 0x45d   : > { %v3080_v12 = vpop.f32.mrf.mxu2 }
 0x45e   : > { %v7841_v63 = vadd.f32 %v3080_v12, %v2992_v59  ;;  %v2994_v9 = vpop.f32.mrf.mxu1 }
 0x45f   : > { %3220 = vmatmul.bf16.gmra.mxu0 %v8733_v40  ;;  %v2995_v17 = vadd.f32 %v2994_v9, %v2905_v21  ;;  %3727 = vmatmul.bf16.gmra.mxu3 %v8723_v47 }
 0x461   : > { %3309 = vmatmul.bf16.gmra.mxu1 %v8731_v60  ;;  %v5203_v60 = vld [vmem:[%s8487_s1 + $0x348] sm:$0xf0] }
 0x462   : > { %3638 = vmatmul.bf16.gmra.mxu2 %v7364_v57  ;;  %v7847_v33 = vpop.f32.mrf.mxu3 }
 0x464   : > { %v2907_v61 = vpop.f32.mrf.mxu0 }
 0x465   : > { %v3083_v36 = vpop.f32.mrf.mxu2 }
 0x466   : > { %v7849_v24 = vadd.f32 %v3083_v36, %v2995_v17  ;;  %v2996_v2 = vpop.f32.mrf.mxu1  ;;  %v5532_v17 = vld [vmem:[%s8487_s1 + $0x3c4] sm:$0xf]  ;;  %v5267_v36 = vld [vmem:[%s8487_s1 + $0x3c8] sm:$0xf0] }
 0x467   : > { %v2997_v59 = vadd.f32 %v2996_v2, %v2907_v61  ;;  %v5548_v61 = vld [vmem:[%s8487_s1 + $0x444] sm:$0xf] }
 0x46a   : > { %v7851_v29 = vpop.f32.mrf.mxu3 }
 0x46c   : > { %v2910_v21 = vpop.f32.mrf.mxu0 }
 0x46d   : > { %v3085_v49 = vpop.f32.mrf.mxu2 }
 0x46e   : > { %v7853_v12 = vadd.f32 %v3085_v49, %v2997_v59  ;;  %v2999_v57 = vpop.f32.mrf.mxu1  ;;  %v5331_v49 = vld [vmem:[%s8487_s1 + $0x448] sm:$0xf0] }
 0x46f   : > { %3225 = vmatmul.bf16.gmra.mxu0 %v8795_v14  ;;  %v3000_v9 = vadd.f32 %v2999_v57, %v2910_v21  ;;  %3732 = vmatmul.bf16.gmra.mxu3 %v8733_v40  ;;  %v5516_v40 = vld [vmem:[%s8487_s1 + $0x344] sm:$0xf] }
 0x470   : > { %8836 = vst [vmem:[#allocation45_spill] sm:$0xff] %v7853_v12  ;;  %v5206_v12 = vor.u32 %v5516_v40, %v5203_v60 }
 0x471   : > { %3314 = vmatmul.bf16.gmra.mxu1 %v8793_v44  ;;  %v5334_v44 = vor.u32 %v5548_v61, %v5331_v49  ;;  %v5549_v61 = vld [vmem:[%s8487_s1 + $0x444] sm:$0xf0] }
 0x472   : > { %3643 = vmatmul.bf16.gmra.mxu2 %v7405_v13  ;;  %v7868_v59 = vpop.f32.mrf.mxu3  ;;  %v5270_v13 = vor.u32 %v5532_v17, %v5267_v36  ;;  %3885 = vmatpush.bf16.msrb.mxu1 %v5206_v12 }
 0x473   : > { %8837 = vst [vmem:[#allocation46_spill] sm:$0xff] %v7868_v59  ;;  %4063 = vmatpush.bf16.msrb.mxu3 %v5334_v44 }
 0x474   : > { %v2912_v57 = vpop.f32.mrf.mxu0  ;;  %3974 = vmatpush.bf16.msrb.mxu2 %v5270_v13 }
 0x475   : > { %v3088_v2 = vpop.f32.mrf.mxu2 }
 0x476   : > { %v7873_v21 = vadd.f32 %v3088_v2, %v3000_v9  ;;  %v3001_v17 = vpop.f32.mrf.mxu1  ;;  %v5329_v9 = vld [vmem:[%s8487_s1 + $0x440] sm:$0xf] }
 0x477   : > { %v3002_v36 = vadd.f32 %v3001_v17, %v2912_v57  ;;  %v5330_v2 = vor.u32 %v5549_v61, %v5329_v9 }
 0x478   : > { %8838 = vst [vmem:[#allocation47_spill] sm:$0xff] %v7873_v21 }
 0x479   : > { %3796 = vmatpush.bf16.msrb.mxu0 %v5330_v2 }
 0x47a   : > { %v7887_v21 = vpop.f32.mrf.mxu3 }
 0x47c   : > { %v2915_v60 = vpop.f32.mrf.mxu0 }
 0x47d   : > { %v3090_v49 = vpop.f32.mrf.mxu2 }
 0x47e   : > { %v7889_v59 = vadd.f32 %v3090_v49, %v3002_v36  ;;  %v3004_v40 = vpop.f32.mrf.mxu1 }
 0x47f   : > { %3230 = vmatmul.bf16.gmra.mxu0 %v8749_v35  ;;  %v3005_v44 = vadd.f32 %v3004_v40, %v2915_v60  ;;  %3737 = vmatmul.bf16.gmra.mxu3 %v8795_v14 }
 0x481   : > { %3319 = vmatmul.bf16.gmra.mxu1 %v8747_v52  ;;  %v5195_v52 = vld [vmem:[%s8487_s1 + $0x338] sm:$0xf0] }
 0x482   : > { %3648 = vmatmul.bf16.gmra.mxu2 %v7422_v10  ;;  %v7895_v13 = vpop.f32.mrf.mxu3 }
 0x484   : > { %v2917_v17 = vpop.f32.mrf.mxu0 }
 0x485   : > { %v3093_v12 = vpop.f32.mrf.mxu2 }
 0x486   : > { %v7897_v57 = vadd.f32 %v3093_v12, %v3005_v44  ;;  %v3006_v9 = vpop.f32.mrf.mxu1  ;;  %v5530_v44 = vld [vmem:[%s8487_s1 + $0x3b4] sm:$0xf]  ;;  %v5259_v12 = vld [vmem:[%s8487_s1 + $0x3b8] sm:$0xf0] }
 0x487   : > { %v3007_v36 = vadd.f32 %v3006_v9, %v2917_v17  ;;  %v5546_v17 = vld [vmem:[%s8487_s1 + $0x434] sm:$0xf] }
 0x48a   : > { %v7899_v2 = vpop.f32.mrf.mxu3 }
 0x48c   : > { %v2920_v60 = vpop.f32.mrf.mxu0 }
 0x48d   : > { %v3095_v61 = vpop.f32.mrf.mxu2 }
 0x48e   : > { %v7901_v49 = vadd.f32 %v3095_v61, %v3007_v36  ;;  %v3009_v10 = vpop.f32.mrf.mxu1  ;;  %v5323_v61 = vld [vmem:[%s8487_s1 + $0x438] sm:$0xf0] }
 0x48f   : > { %3235 = vmatmul.bf16.gmra.mxu0 %v8755_v53  ;;  %v3010_v40 = vadd.f32 %v3009_v10, %v2920_v60  ;;  %3742 = vmatmul.bf16.gmra.mxu3 %v8749_v35  ;;  %v5514_v35 = vld [vmem:[%s8487_s1 + $0x334] sm:$0xf] }
 0x491   : > { %3324 = vmatmul.bf16.gmra.mxu1 %v8754_v19  ;;  %v5326_v19 = vor.u32 %v5546_v17, %v5323_v61  ;;  %v5547_v17 = vld [vmem:[%s8487_s1 + $0x434] sm:$0xf0] }
 0x492   : > { %3653 = vmatmul.bf16.gmra.mxu2 %v7463_v23  ;;  %v7916_v36 = vpop.f32.mrf.mxu3  ;;  %v5262_v23 = vor.u32 %v5530_v44, %v5259_v12  ;;  %v5198_v44 = vor.u32 %v5514_v35, %v5195_v52 }
 0x493   : > { %8839 = vst [vmem:[#allocation48_spill] sm:$0xff] %v7916_v36  ;;  %4064 = vmatpush.bf16.msrb.mxu3 %v5326_v19 }
 0x494   : > { %v2922_v10 = vpop.f32.mrf.mxu0  ;;  %3975 = vmatpush.bf16.msrb.mxu2 %v5262_v23  ;;  %3886 = vmatpush.bf16.msrb.mxu1 %v5198_v44 }
 0x495   : > { %v3098_v9 = vpop.f32.mrf.mxu2 }
 0x496   : > { %v7921_v60 = vadd.f32 %v3098_v9, %v3010_v40  ;;  %v3011_v36 = vpop.f32.mrf.mxu1  ;;  %v5321_v40 = vld [vmem:[%s8487_s1 + $0x430] sm:$0xf] }
 0x497   : > { %v3012_v12 = vadd.f32 %v3011_v36, %v2922_v10  ;;  %v5322_v19 = vor.u32 %v5547_v17, %v5321_v40 }
 0x498   : > { %8840 = vst [vmem:[#allocation49_spill] sm:$0xff] %v7921_v60 }
 0x499   : > { %3797 = vmatpush.bf16.msrb.mxu0 %v5322_v19 }
 0x49a   : > { %v7935_v23 = vpop.f32.mrf.mxu3 }
 0x49c   : > { %v2925_v60 = vpop.f32.mrf.mxu0 }
 0x49d   : > { %v3100_v9 = vpop.f32.mrf.mxu2 }
 0x49e   : > { %v7937_v61 = vadd.f32 %v3100_v9, %v3012_v12  ;;  %v3014_v52 = vpop.f32.mrf.mxu1 }
 0x49f   : > { %3240 = vmatmul.bf16.gmra.mxu0 %v6146_v46  ;;  %v3015_v35 = vadd.f32 %v3014_v52, %v2925_v60  ;;  %3747 = vmatmul.bf16.gmra.mxu3 %v8755_v53 }
 0x4a0   : > { %8841 = vst [vmem:[#allocation13_spill] sm:$0xff] %v7937_v61 }
 0x4a1   : > { %3329 = vmatmul.bf16.gmra.mxu1 %v8760_v4 }
 0x4a2   : > { %3658 = vmatmul.bf16.gmra.mxu2 %v7480_v11  ;;  %v7943_v10 = vpop.f32.mrf.mxu3 }
 0x4a4   : > { %v2927_v40 = vpop.f32.mrf.mxu0 }
 0x4a5   : > { %v3103_v36 = vpop.f32.mrf.mxu2 }
 0x4a6   : > { %v7945_v44 = vadd.f32 %v3103_v36, %v3015_v35  ;;  %v3016_v17 = vpop.f32.mrf.mxu1  ;;  %v5528_v35 = vld [vmem:[%s8487_s1 + $0x3a4] sm:$0xf]  ;;  %v5251_v36 = vld [vmem:[%s8487_s1 + $0x3a8] sm:$0xf0] }
 0x4a7   : > { %v3017_v12 = vadd.f32 %v3016_v17, %v2927_v40 }
 0x4aa   : > { %v7947_v9 = vpop.f32.mrf.mxu3 }
 0x4ac   : > { %v3206_v60 = vpop.f32.mrf.mxu0 }
 0x4ad   : > { %v3105_v19 = vpop.f32.mrf.mxu2  ;;  %v3207_v11 = vadd.f32 %v3206_v60, %v7555_v48  ;;  %v5544_v48 = vld [vmem:[%s8487_s1 + $0x424] sm:$0xf] }
 0x4ae   : > { %v7949_v61 = vadd.f32 %v3105_v19, %v3017_v12  ;;  %v3295_v52 = vpop.f32.mrf.mxu1  ;;  %v5254_v12 = vor.u32 %v5528_v35, %v5251_v36  ;;  %v5187_v35 = vld [vmem:[%s8487_s1 + $0x328] sm:$0xf0] }
 0x4af   : > { %3245 = vmatmul.bf16.gmra.mxu0 %v6188_v32  ;;  %v7953_v4 = vadd.f32 %v3295_v52, %v3207_v11  ;;  %3752 = vmatmul.bf16.gmra.mxu3 %v6146_v46 }
 0x4b0   : > { %8842 = vst [vmem:[#allocation50_spill] sm:$0xff] %v7949_v61  ;;  %3976 = vmatpush.bf16.msrb.mxu2 %v5254_v12 }
 0x4b1   : > { %8843 = vst [vmem:[#allocation51_spill] sm:$0xff] %v7953_v4  ;;  %3334 = vmatmul.bf16.gmra.mxu1 %v8761_v5  ;;  %v5512_v4 = vld [vmem:[%s8487_s1 + $0x324] sm:$0xf] }
 0x4b2   : > { %3663 = vmatmul.bf16.gmra.mxu2 %v7521_v26  ;;  %v3713_v17 = vpop.f32.mrf.mxu3  ;;  %v5315_v26 = vld [vmem:[%s8487_s1 + $0x428] sm:$0xf0]  ;;  %v5190_v46 = vor.u32 %v5512_v4, %v5187_v35 }
 0x4b3   : > { %v5318_v11 = vor.u32 %v5544_v48, %v5315_v26 }
 0x4b4   : > { %v3208_v60 = vpop.f32.mrf.mxu0  ;;  %3887 = vmatpush.bf16.msrb.mxu1 %v5190_v46 }
 0x4b5   : > { %v3624_v40 = vpop.f32.mrf.mxu2  ;;  %v3209_v52 = vadd.f32 %v3208_v60, %v7575_v43  ;;  %4065 = vmatpush.bf16.msrb.mxu3 %v5318_v11  ;;  %v5545_v43 = vld [vmem:[%s8487_s1 + $0x424] sm:$0xf0] }
 0x4b6   : > { %v3625_v19 = vadd.f32 %v3624_v40, %v7561_v18  ;;  %v3297_v36 = vpop.f32.mrf.mxu1  ;;  %v5313_v18 = vld [vmem:[%s8487_s1 + $0x420] sm:$0xf] }
 0x4b7   : > { %v7980_v61 = vadd.f32 %v3297_v36, %v3209_v52  ;;  %v5314_v48 = vor.u32 %v5545_v43, %v5313_v18 }
 0x4b8   : > { %v7972_v5 = vadd.f32 %v3713_v17, %v3625_v19 }
 0x4b9   : > { %3798 = vmatpush.bf16.msrb.mxu0 %v5314_v48 }
 0x4ba   : > { %v3715_v17 = vpop.f32.mrf.mxu3 }
 0x4bc   : > { %v3211_v26 = vpop.f32.mrf.mxu0 }
 0x4bd   : > { %v3626_v40 = vpop.f32.mrf.mxu2  ;;  %v3212_v4 = vadd.f32 %v3211_v26, %v7586_v56 }
 0x4be   : > { %v3627_v12 = vadd.f32 %v3626_v40, %v7577_v38  ;;  %v3300_v60 = vpop.f32.mrf.mxu1 }
 0x4bf   : > { %3250 = vmatmul.bf16.gmra.mxu0 %v6206_v8  ;;  %v7993_v11 = vadd.f32 %v3300_v60, %v3212_v4  ;;  %3757 = vmatmul.bf16.gmra.mxu3 %v6188_v32 }
 0x4c0   : > { %v7990_v19 = vadd.f32 %v3715_v17, %v3627_v12 }
 0x4c1   : > { %3339 = vmatmul.bf16.gmra.mxu1 %v8762_v7 }
 0x4c2   : > { %3668 = vmatmul.bf16.gmra.mxu2 %v7538_v31  ;;  %v3718_v52 = vpop.f32.mrf.mxu3 }
 0x4c4   : > { %v3213_v35 = vpop.f32.mrf.mxu0 }
 0x4c5   : > { %v3629_v46 = vpop.f32.mrf.mxu2  ;;  %v3214_v56 = vadd.f32 %v3213_v35, %v7590_v54  ;;  %v5526_v54 = vld [vmem:[%s8487_s1 + $0x394] sm:$0xf] }
 0x4c6   : > { %v3630_v38 = vadd.f32 %v3629_v46, %v7588_v25  ;;  %v3302_v18 = vpop.f32.mrf.mxu1 }
 0x4c7   : > { %v8002_v43 = vadd.f32 %v3302_v18, %v3214_v56 }
 0x4c8   : > { %v8000_v36 = vadd.f32 %v3718_v52, %v3630_v38 }
 0x4ca   : > { %v3720_v40 = vpop.f32.mrf.mxu3 }
 0x4cc   : > { %v3216_v17 = vpop.f32.mrf.mxu0 }
 0x4cd   : > { %v3631_v48 = vpop.f32.mrf.mxu2  ;;  %v3217_v12 = vadd.f32 %v3216_v17, %v7610_v0  ;;  %v5542_v0 = vld [vmem:[%s8487_s1 + $0x414] sm:$0xf] }
 0x4ce   : > { %v3632_v31 = vadd.f32 %v3631_v48, %v7592_v15  ;;  %v3305_v25 = vpop.f32.mrf.mxu1  ;;  %v5243_v15 = vld [vmem:[%s8487_s1 + $0x398] sm:$0xf0] }
 0x4cf   : > { %3255 = vmatmul.bf16.gmra.mxu0 %v8767_v1  ;;  %v8009_v4 = vadd.f32 %v3305_v25, %v3217_v12  ;;  %3762 = vmatmul.bf16.gmra.mxu3 %v6206_v8  ;;  %v5246_v52 = vor.u32 %v5526_v54, %v5243_v15 }
 0x4d0   : > { %v8006_v26 = vadd.f32 %v3720_v40, %v3632_v31  ;;  %v5510_v40 = vld [vmem:[%s8487_s1 + $0x314] sm:$0xf]  ;;  %v5179_v31 = vld [vmem:[%s8487_s1 + $0x318] sm:$0xf0] }
 0x4d1   : > { %3344 = vmatmul.bf16.gmra.mxu1 %v8766_v58  ;;  %3977 = vmatpush.bf16.msrb.mxu2 %v5246_v52  ;;  %v5182_v12 = vor.u32 %v5510_v40, %v5179_v31  ;;  %v8844_v52 = vld [vmem:[#allocation65_spill] sm:$0xff]  ;;  %v8848_v40 = vld [vmem:[#allocation64_spill] sm:$0xff] }
 0x4d2   : > { %3673 = vmatmul.bf16.gmra.mxu2 %v7580_v55  ;;  %v3723_v46 = vpop.f32.mrf.mxu3  ;;  %v5307_v55 = vld [vmem:[%s8487_s1 + $0x418] sm:$0xf0]  ;;  %v8849_v31 = vld [vmem:[#allocation24_spill] sm:$0xff] }
 0x4d3   : > { %v5310_v56 = vor.u32 %v5542_v0, %v5307_v55  ;;  %3888 = vmatpush.bf16.msrb.mxu1 %v5182_v12 }
 0x4d4   : > { %v3218_v35 = vpop.f32.mrf.mxu0 }
 0x4d5   : > { %v3634_v60 = vpop.f32.mrf.mxu2  ;;  %v3219_v18 = vadd.f32 %v3218_v35, %v7629_v6  ;;  %4066 = vmatpush.bf16.msrb.mxu3 %v5310_v56  ;;  %v5305_v6 = vld [vmem:[%s8487_s1 + $0x410] sm:$0xf]  ;;  %v8846_v35 = vld [vmem:[#allocation25_spill] sm:$0xff] }
 0x4d6   : > { %v3635_v38 = vadd.f32 %v3634_v60, %v7615_v41  ;;  %v3307_v17 = vpop.f32.mrf.mxu1  ;;  %v5543_v41 = vld [vmem:[%s8487_s1 + $0x414] sm:$0xf0] }
 0x4d7   : > { %v8036_v25 = vadd.f32 %v3307_v17, %v3219_v18  ;;  %v5306_v54 = vor.u32 %v5543_v41, %v5305_v6  ;;  %v8850_v6 = vld [vmem:[#allocation66_spill] sm:$0xff] }
 0x4d8   : > { %v8028_v48 = vadd.f32 %v3723_v46, %v3635_v38 }
 0x4d9   : > { %3799 = vmatpush.bf16.msrb.mxu0 %v5306_v54  ;;  %v8851_v54 = vld [vmem:[#allocation21_spill] sm:$0xff] }
 0x4da   : > { %v3725_v0 = vpop.f32.mrf.mxu3 }
 0x4dc   : > { %v3221_v46 = vpop.f32.mrf.mxu0 }
 0x4dd   : > { %v3636_v15 = vpop.f32.mrf.mxu2  ;;  %v3222_v55 = vadd.f32 %v3221_v46, %v8844_v52 }
 0x4de   : > { %v3637_v60 = vadd.f32 %v3636_v15, %v7631_v62  ;;  %v3310_v56 = vpop.f32.mrf.mxu1 }
 0x4df   : > { %3260 = vmatmul.bf16.gmra.mxu0 %v8846_v35  ;;  %v8049_v18 = vadd.f32 %v3310_v56, %v3222_v55  ;;  %3767 = vmatmul.bf16.gmra.mxu3 %v8767_v1  ;;  %v8854_v56 = vld [vmem:[#allocation67_spill] sm:$0xff]  ;;  %v8855_v1 = vld [vmem:[#allocation68_spill] sm:$0xff] }
 0x4e0   : > { %v8046_v38 = vadd.f32 %v3725_v0, %v3637_v60 }
 0x4e1   : > { %8847 = vst [vmem:[#allocation53_spill] sm:$0xff] %v8049_v18  ;;  %3349 = vmatmul.bf16.gmra.mxu1 %v8849_v31 }
 0x4e2   : > { %8845 = vst [vmem:[#allocation52_spill] sm:$0xff] %v8046_v38  ;;  %3678 = vmatmul.bf16.gmra.mxu2 %v8848_v40  ;;  %v3728_v12 = vpop.f32.mrf.mxu3  ;;  %v8857_v38 = vld [vmem:[#allocation31_spill] sm:$0xff] }
 0x4e4   : > { %v3223_v41 = vpop.f32.mrf.mxu0 }
 0x4e5   : > { %v3639_v17 = vpop.f32.mrf.mxu2  ;;  %v3224_v15 = vadd.f32 %v3223_v41, %v8851_v54  ;;  %v8859_v41 = vld [vmem:[#allocation17_spill] sm:$0xff] }
 0x4e6   : > { %v3640_v62 = vadd.f32 %v3639_v17, %v8850_v6  ;;  %v3312_v60 = vpop.f32.mrf.mxu1 }
 0x4e7   : > { %v8058_v46 = vadd.f32 %v3312_v60, %v3224_v15  ;;  %v5299_v60 = vld [vmem:[%s8487_s1 + $0x408] sm:$0xf0] }
 0x4e8   : > { %v8056_v0 = vadd.f32 %v3728_v12, %v3640_v62  ;;  %v8860_v12 = vld [vmem:[#allocation30_spill] sm:$0xff] }
 0x4e9   : > { %8853 = vst [vmem:[#allocation54_spill] sm:$0xff] %v8058_v46  ;;  %v5524_v62 = vld [vmem:[%s8487_s1 + $0x384] sm:$0xf] }
 0x4ea   : > { %8852 = vst [vmem:[#allocation9_spill] sm:$0xff] %v8056_v0  ;;  %v3730_v55 = vpop.f32.mrf.mxu3  ;;  %v8876_v0 = vld [vmem:[#allocation42_spill] sm:$0xff] }
 0x4ec   : > { %v3226_v18 = vpop.f32.mrf.mxu0 }
 0x4ed   : > { %v3641_v52 = vpop.f32.mrf.mxu2  ;;  %v3227_v58 = vadd.f32 %v3226_v18, %v8855_v1  ;;  %v5235_v1 = vld [vmem:[%s8487_s1 + $0x388] sm:$0xf0]  ;;  %v5540_v18 = vld [vmem:[%s8487_s1 + $0x404] sm:$0xf] }
 0x4ee   : > { %v3642_v40 = vadd.f32 %v3641_v52, %v8854_v56  ;;  %v3315_v17 = vpop.f32.mrf.mxu1  ;;  %v5238_v15 = vor.u32 %v5524_v62, %v5235_v1  ;;  %v8861_v52 = vld [vmem:[#allocation69_spill] sm:$0xff]  ;;  %v5171_v62 = vld [vmem:[%s8487_s1 + $0x308] sm:$0xf0] }
 0x4ef   : > { %3265 = vmatmul.bf16.gmra.mxu0 %v8857_v38  ;;  %v8065_v6 = vadd.f32 %v3315_v17, %v3227_v58  ;;  %3772 = vmatmul.bf16.gmra.mxu3 %v8846_v35  ;;  %v8862_v17 = vld [vmem:[#allocation70_spill] sm:$0xff] }
 0x4f0   : > { %v8062_v31 = vadd.f32 %v3730_v55, %v3642_v40  ;;  %v5302_v40 = vor.u32 %v5540_v18, %v5299_v60  ;;  %3978 = vmatpush.bf16.msrb.mxu2 %v5238_v15  ;;  %v5297_v18 = vld [vmem:[%s8487_s1 + $0x400] sm:$0xf] }
 0x4f1   : > { %8858 = vst [vmem:[#allocation56_spill] sm:$0xff] %v8065_v6  ;;  %3354 = vmatmul.bf16.gmra.mxu1 %v8860_v12  ;;  %v5508_v6 = vld [vmem:[%s8487_s1 + $0x304] sm:$0xf] }
 0x4f2   : > { %8856 = vst [vmem:[#allocation55_spill] sm:$0xff] %v8062_v31  ;;  %3683 = vmatmul.bf16.gmra.mxu2 %v8859_v41  ;;  %v3733_v54 = vpop.f32.mrf.mxu3  ;;  %4067 = vmatpush.bf16.msrb.mxu3 %v5302_v40  ;;  %v5174_v35 = vor.u32 %v5508_v6, %v5171_v62  ;;  %v8866_v6 = vld [vmem:[#allocation27_spill] sm:$0xff]  ;;  %v8868_v62 = vld [vmem:[#allocation38_spill] sm:$0xff] }
 0x4f3   : > { %v8875_v31 = vld [vmem:[#allocation34_spill] sm:$0xff] }
 0x4f4   : > { %v3228_v56 = vpop.f32.mrf.mxu0  ;;  %3889 = vmatpush.bf16.msrb.mxu1 %v5174_v35  ;;  %v8871_v35 = vld [vmem:[#allocation37_spill] sm:$0xff] }
 0x4f5   : > { %v3644_v58 = vpop.f32.mrf.mxu2  ;;  %v3229_v41 = vadd.f32 %v3228_v56, %v8862_v17 }
 0x4f6   : > { %v3645_v55 = vadd.f32 %v3644_v58, %v8861_v52  ;;  %v3317_v1 = vpop.f32.mrf.mxu1 }
 0x4f7   : > { %v8092_v58 = vadd.f32 %v3317_v1, %v3229_v41 }
 0x4f8   : > { %v8084_v12 = vadd.f32 %v3733_v54, %v3645_v55  ;;  %v5541_v54 = vld [vmem:[%s8487_s1 + $0x404] sm:$0xf0] }
 0x4f9   : > { %8864 = vst [vmem:[#allocation58_spill] sm:$0xff] %v8092_v58  ;;  %v5298_v15 = vor.u32 %v5541_v54, %v5297_v18  ;;  %v8865_v55 = vld [vmem:[#allocation71_spill] sm:$0xff] }
 0x4fa   : > { %8863 = vst [vmem:[#allocation57_spill] sm:$0xff] %v8084_v12  ;;  %v3735_v52 = vpop.f32.mrf.mxu3  ;;  %v8108_v12 = vld [vmem:[%s5949_s17 + $0xa8] sm:$0xff] }
 0x4fb   : > { %3800 = vmatpush.bf16.msrb.mxu0 %v5298_v15  ;;  %8870 = vst [vmem:[#allocation61_spill] sm:$0xff] %v8108_v12  ;;  %v8872_v15 = vld [vmem:[#allocation28_spill] sm:$0xff] }
 0x4fc   : > { %v3231_v40 = vpop.f32.mrf.mxu0 }
 0x4fd   : > { %v3646_v60 = vpop.f32.mrf.mxu2  ;;  %v3232_v17 = vadd.f32 %v3231_v40, %v8866_v6 }
 0x4fe   : > { %v3647_v56 = vadd.f32 %v3646_v60, %v8865_v55  ;;  %v3320_v1 = vpop.f32.mrf.mxu1  ;;  %v8873_v55 = vld [vmem:[#allocation29_spill] sm:$0xff] }
 0x4ff   : > { %3270 = vmatmul.bf16.gmra.mxu0 %v8868_v62  ;;  %v8105_v58 = vadd.f32 %v3320_v1, %v3232_v17  ;;  %3777 = vmatmul.bf16.gmra.mxu3 %v8857_v38 }
 0x500   : > { %v8102_v41 = vadd.f32 %v3735_v52, %v3647_v56 }
 0x501   : > { %8869 = vst [vmem:[#allocation59_spill] sm:$0xff] %v8105_v58  ;;  %3359 = vmatmul.bf16.gmra.mxu1 %v8871_v35 }
 0x502   : > { %8867 = vst [vmem:[#allocation60_spill] sm:$0xff] %v8102_v41  ;;  %3688 = vmatmul.bf16.gmra.mxu2 %v8108_v12  ;;  %v3738_v54 = vpop.f32.mrf.mxu3  ;;  %v8874_v12 = vld [vmem:[#allocation33_spill] sm:$0xff] }
 0x504   : > { %v3233_v52 = vpop.f32.mrf.mxu0 }
 0x505   : > { %v3649_v18 = vpop.f32.mrf.mxu2  ;;  %v3234_v56 = vadd.f32 %v3233_v52, %v8873_v55  ;;  %v8127_v52 = vld [vmem:[%s5949_s17 + $0xb4] sm:$0xff]  ;;  %v8880_v55 = vld [vmem:[#allocation35_spill] sm:$0xff] }
 0x506   : > { %v3650_v60 = vadd.f32 %v3649_v18, %v8872_v15  ;;  %v3322_v6 = vpop.f32.mrf.mxu1  ;;  %8878 = vst [vmem:[#allocation64_spill] sm:$0xff] %v8127_v52 }
 0x507   : > { %v8117_v17 = vadd.f32 %v3322_v6, %v3234_v56 }
 0x508   : > { %v8115_v40 = vadd.f32 %v3738_v54, %v3650_v60  ;;  %v8879_v54 = vld [vmem:[#allocation41_spill] sm:$0xff] }
 0x50a   : > { %v3740_v58 = vpop.f32.mrf.mxu3 }
 0x50c   : > { %v3236_v38 = vpop.f32.mrf.mxu0 }
 0x50d   : > { %v3651_v1 = vpop.f32.mrf.mxu2  ;;  %v3237_v35 = vadd.f32 %v3236_v38, %v8875_v31 }
 0x50e   : > { %v3652_v41 = vadd.f32 %v3651_v1, %v8874_v12  ;;  %v3325_v18 = vpop.f32.mrf.mxu1 }
 0x50f   : > { %3275 = vmatmul.bf16.gmra.mxu0 %v8876_v0  ;;  %v8124_v15 = vadd.f32 %v3325_v18, %v3237_v35  ;;  %3782 = vmatmul.bf16.gmra.mxu3 %v8868_v62 }
 0x510   : > { %v8121_v46 = vadd.f32 %v3740_v58, %v3652_v41 }
 0x511   : > { %8877 = vst [vmem:[#allocation65_spill] sm:$0xff] %v8124_v15  ;;  %3364 = vmatmul.bf16.gmra.mxu1 %v8879_v54 }
 0x512   : > { %3693 = vmatmul.bf16.gmra.mxu2 %v8127_v52  ;;  %v3743_v12 = vpop.f32.mrf.mxu3 }
 0x514   : > { %v3238_v38 = vpop.f32.mrf.mxu0 }
 0x515   : > { %v3654_v60 = vpop.f32.mrf.mxu2  ;;  %v3239_v31 = vadd.f32 %v3238_v38, %v7733_v42  ;;  %v8881_v42 = vld [vmem:[#allocation72_spill] sm:$0xff] }
 0x516   : > { %v3655_v56 = vadd.f32 %v3654_v60, %v8880_v55  ;;  %v3327_v41 = vpop.f32.mrf.mxu1 }
 0x517   : > { %v8136_v35 = vadd.f32 %v3327_v41, %v3239_v31 }
 0x518   : > { %v8134_v58 = vadd.f32 %v3743_v12, %v3655_v56 }
 0x51a   : > { %v3745_v1 = vpop.f32.mrf.mxu3 }
 0x51c   : > { %v3241_v52 = vpop.f32.mrf.mxu0 }
 0x51d   : > { %v3656_v6 = vpop.f32.mrf.mxu2  ;;  %v3242_v15 = vadd.f32 %v3241_v52, %v7745_v39 }
 0x51e   : > { %v3657_v18 = vadd.f32 %v3656_v6, %v7735_v37  ;;  %v3330_v60 = vpop.f32.mrf.mxu1 }
 0x51f   : > { %3280 = vmatmul.bf16.gmra.mxu0 %v7741_v45  ;;  %v8143_v55 = vadd.f32 %v3330_v60, %v3242_v15  ;;  %3787 = vmatmul.bf16.gmra.mxu3 %v8876_v0  ;;  %v8882_v60 = vld [vmem:[#allocation2_spill] sm:$0xff] }
 0x520   : > { %v8140_v54 = vadd.f32 %v3745_v1, %v3657_v18 }
 0x521   : > { %3369 = vmatmul.bf16.gmra.mxu1 %v7738_v28 }
 0x522   : > { %3698 = vmatmul.bf16.gmra.mxu2 %v8881_v42  ;;  %v3748_v56 = vpop.f32.mrf.mxu3 }
 0x524   : > { %v3243_v38 = vpop.f32.mrf.mxu0 }
 0x525   : > { %v3659_v12 = vpop.f32.mrf.mxu2  ;;  %v3244_v39 = vadd.f32 %v3243_v38, %v7749_v20  ;;  %v8884_v20 = vld [vmem:[#allocation3_spill] sm:$0xff] }
 0x526   : > { %v3660_v37 = vadd.f32 %v3659_v12, %v7747_v3  ;;  %v3332_v31 = vpop.f32.mrf.mxu1  ;;  %v8885_v12 = vld [vmem:[#allocation36_spill] sm:$0xff]  ;;  %v8886_v38 = vld [vmem:[#allocation39_spill] sm:$0xff] }
 0x527   : > { %v8152_v45 = vadd.f32 %v3332_v31, %v3244_v39 }
 0x528   : > { %v8150_v52 = vadd.f32 %v3748_v56, %v3660_v37 }
 0x52a   : > { %v3750_v41 = vpop.f32.mrf.mxu3 }
 0x52c   : > { %v3246_v1 = vpop.f32.mrf.mxu0 }
 0x52d   : > { %v3661_v15 = vpop.f32.mrf.mxu2  ;;  %v3247_v18 = vadd.f32 %v3246_v1, %v7769_v16 }
 0x52e   : > { %v3662_v6 = vadd.f32 %v3661_v15, %v7751_v30  ;;  %v3335_v3 = vpop.f32.mrf.mxu1 }
 0x52f   : > { %3801 = vmatmul.bf16.vlgmr.msrb.gmra.mxu0 %v8882_v60  ;;  %v8159_v42 = vadd.f32 %v3335_v3, %v3247_v18  ;;  %4068 = vmatmul.bf16.vlgmr.msrb.gmra.mxu3 %v8882_v60  ;;  %v8887_v18 = vld [vmem:[#allocation26_spill] sm:$0xff] }
 0x530   : > { %v8156_v28 = vadd.f32 %v3750_v41, %v3662_v6 }
 0x531   : > { %8883 = vst [vmem:[#allocation66_spill] sm:$0xff] %v8159_v42  ;;  %3890 = vmatmul.bf16.vlgmr.msrb.gmra.mxu1 %v8885_v12  ;;  %v8889_v42 = vld [vmem:[#allocation4_spill] sm:$0xff] }
 0x532   : > { %3979 = vmatmul.bf16.vlgmr.msrb.gmra.mxu2 %v8884_v20  ;;  %v3753_v37 = vpop.f32.mrf.mxu3 }
 0x534   : > { %v3248_v39 = vpop.f32.mrf.mxu0 }
 0x535   : > { %v3664_v56 = vpop.f32.mrf.mxu2  ;;  %v3249_v16 = vadd.f32 %v3248_v39, %v7788_v22  ;;  %v8891_v22 = vld [vmem:[#allocation5_spill] sm:$0xff] }
 0x536   : > { %v3665_v30 = vadd.f32 %v3664_v56, %v8886_v38  ;;  %v3337_v15 = vpop.f32.mrf.mxu1 }
 0x537   : > { %v8168_v41 = vadd.f32 %v3337_v15, %v3249_v16 }
 0x538   : > { %v8166_v31 = vadd.f32 %v3753_v37, %v3665_v30  ;;  %v8892_v37 = vld [vmem:[#allocation40_spill] sm:$0xff] }
 0x53a   : > { %v3755_v1 = vpop.f32.mrf.mxu3 }
 0x53c   : > { %v3251_v20 = vpop.f32.mrf.mxu0 }
 0x53d   : > { %v3666_v6 = vpop.f32.mrf.mxu2  ;;  %v3252_v60 = vadd.f32 %v3251_v20, %v7799_v51 }
 0x53e   : > { %v3667_v3 = vadd.f32 %v3666_v6, %v8887_v18  ;;  %v3340_v56 = vpop.f32.mrf.mxu1 }
 0x53f   : > { %3806 = vmatmul.bf16.gmra.mxu0 %v8889_v42  ;;  %v8175_v38 = vadd.f32 %v3340_v56, %v3252_v60  ;;  %4073 = vmatmul.bf16.gmra.mxu3 %v8889_v42  ;;  %v8893_v60 = vld [vmem:[#allocation32_spill] sm:$0xff] }
 0x540   : > { %v8172_v12 = vadd.f32 %v3755_v1, %v3667_v3 }
 0x541   : > { %8890 = vst [vmem:[#allocation67_spill] sm:$0xff] %v8175_v38  ;;  %3895 = vmatmul.bf16.gmra.mxu1 %v8892_v37 }
 0x542   : > { %8888 = vst [vmem:[#allocation21_spill] sm:$0xff] %v8172_v12  ;;  %3984 = vmatmul.bf16.gmra.mxu2 %v8891_v22  ;;  %v3758_v39 = vpop.f32.mrf.mxu3  ;;  %v8894_v22 = vld [vmem:[#allocation43_spill] sm:$0xff]  ;;  %v8895_v12 = vld [vmem:[#allocation6_spill] sm:$0xff] }
 0x544   : > { %v3253_v15 = vpop.f32.mrf.mxu0 }
 0x545   : > { %v3669_v30 = vpop.f32.mrf.mxu2  ;;  %v3254_v51 = vadd.f32 %v3253_v15, %v7803_v50  ;;  %v8897_v50 = vld [vmem:[#allocation7_spill] sm:$0xff] }
 0x546   : > { %v3670_v16 = vadd.f32 %v3669_v30, %v7801_v27  ;;  %v3342_v1 = vpop.f32.mrf.mxu1 }
 0x547   : > { %v8184_v18 = vadd.f32 %v3342_v1, %v3254_v51  ;;  %v8898_v51 = vld [vmem:[#allocation44_spill] sm:$0xff] }
 0x548   : > { %v8182_v6 = vadd.f32 %v3758_v39, %v3670_v16  ;;  %v5661_v39 = vld [vmem:[%s5949_s17 + $0x24] sm:$0xff] }
 0x54a   : > { %v3760_v20 = vpop.f32.mrf.mxu3 }
 0x54c   : > { %v3256_v42 = vpop.f32.mrf.mxu0 }
 0x54d   : > { %v3671_v3 = vpop.f32.mrf.mxu2  ;;  %v3257_v37 = vadd.f32 %v3256_v42, %v8894_v22 }
 0x54e   : > { %v3672_v56 = vadd.f32 %v3671_v3, %v8893_v60  ;;  %v3345_v27 = vpop.f32.mrf.mxu1 }
 0x54f   : > { %3811 = vmatmul.bf16.gmra.mxu0 %v8895_v12  ;;  %v8191_v30 = vadd.f32 %v3345_v27, %v3257_v37  ;;  %4078 = vmatmul.bf16.gmra.mxu3 %v8895_v12 }
 0x550   : > { %v8188_v38 = vadd.f32 %v3760_v20, %v3672_v56 }
 0x551   : > { %8896 = vst [vmem:[#allocation68_spill] sm:$0xff] %v8191_v30  ;;  %3900 = vmatmul.bf16.gmra.mxu1 %v5661_v39  ;;  %v8899_v30 = vld [vmem:[#allocation8_spill] sm:$0xff] }
 0x552   : > { %3989 = vmatmul.bf16.gmra.mxu2 %v8897_v50  ;;  %v3763_v15 = vpop.f32.mrf.mxu3 }
 0x554   : > { %v3258_v3 = vpop.f32.mrf.mxu0 }
 0x555   : > { %v3674_v16 = vpop.f32.mrf.mxu2  ;;  %v3259_v20 = vadd.f32 %v3258_v3, %v7839_v34  ;;  %v5662_v34 = vld [vmem:[%s5949_s17 + $0x30] sm:$0xff] }
 0x556   : > { %v3675_v1 = vadd.f32 %v3674_v16, %v8898_v51  ;;  %v3347_v56 = vpop.f32.mrf.mxu1 }
 0x557   : > { %v8200_v42 = vadd.f32 %v3347_v56, %v3259_v20 }
 0x558   : > { %v8198_v60 = vadd.f32 %v3763_v15, %v3675_v1 }
 0x55a   : > { %v3765_v37 = vpop.f32.mrf.mxu3 }
 0x55c   : > { %v3261_v12 = vpop.f32.mrf.mxu0 }
 0x55d   : > { %v3676_v22 = vpop.f32.mrf.mxu2  ;;  %v3262_v50 = vadd.f32 %v3261_v12, %v7847_v33 }
 0x55e   : > { %v3677_v27 = vadd.f32 %v3676_v22, %v7841_v63  ;;  %v3350_v16 = vpop.f32.mrf.mxu1 }
 0x55f   : > { %3816 = vmatmul.bf16.gmra.mxu0 %v8899_v30  ;;  %v8207_v51 = vadd.f32 %v3350_v16, %v3262_v50  ;;  %4083 = vmatmul.bf16.gmra.mxu3 %v8899_v30  ;;  %v8902_v50 = vld [vmem:[#allocation46_spill] sm:$0xff] }
 0x560   : > { %v8204_v39 = vadd.f32 %v3765_v37, %v3677_v27 }
 0x561   : > { %8900 = vst [vmem:[#allocation17_spill] sm:$0xff] %v8207_v51  ;;  %3905 = vmatmul.bf16.gmra.mxu1 %v5662_v34  ;;  %v8903_v51 = vld [vmem:[#allocation10_spill] sm:$0xff] }
 0x562   : > { %3994 = vmatmul.bf16.gmra.mxu2 %v8723_v47  ;;  %v3768_v1 = vpop.f32.mrf.mxu3  ;;  %v8901_v47 = vld [vmem:[#allocation45_spill] sm:$0xff] }
 0x564   : > { %v3263_v3 = vpop.f32.mrf.mxu0 }
 0x565   : > { %v3679_v15 = vpop.f32.mrf.mxu2  ;;  %v3264_v33 = vadd.f32 %v3263_v3, %v7851_v29  ;;  %v8905_v29 = vld [vmem:[#allocation11_spill] sm:$0xff] }
 0x566   : > { %v3680_v63 = vadd.f32 %v3679_v15, %v7849_v24  ;;  %v3352_v56 = vpop.f32.mrf.mxu1 }
 0x567   : > { %v8216_v22 = vadd.f32 %v3352_v56, %v3264_v33  ;;  %v8906_v33 = vld [vmem:[#allocation47_spill] sm:$0xff] }
 0x568   : > { %v8214_v20 = vadd.f32 %v3768_v1, %v3680_v63  ;;  %v5663_v1 = vld [vmem:[%s5949_s17 + $0x3c] sm:$0xff] }
 0x56a   : > { %v3770_v27 = vpop.f32.mrf.mxu3 }
 0x56c   : > { %v3266_v30 = vpop.f32.mrf.mxu0 }
 0x56d   : > { %v3681_v37 = vpop.f32.mrf.mxu2  ;;  %v3267_v16 = vadd.f32 %v3266_v30, %v8902_v50 }
 0x56e   : > { %v3682_v12 = vadd.f32 %v3681_v37, %v8901_v47  ;;  %v3355_v24 = vpop.f32.mrf.mxu1 }
 0x56f   : > { %3821 = vmatmul.bf16.gmra.mxu0 %v8903_v51  ;;  %v8223_v15 = vadd.f32 %v3355_v24, %v3267_v16  ;;  %4088 = vmatmul.bf16.gmra.mxu3 %v8903_v51 }
 0x570   : > { %v8220_v34 = vadd.f32 %v3770_v27, %v3682_v12 }
 0x571   : > { %8904 = vst [vmem:[#allocation69_spill] sm:$0xff] %v8223_v15  ;;  %3910 = vmatmul.bf16.gmra.mxu1 %v5663_v1  ;;  %v8907_v15 = vld [vmem:[#allocation12_spill] sm:$0xff] }
 0x572   : > { %3999 = vmatmul.bf16.gmra.mxu2 %v8905_v29  ;;  %v3773_v3 = vpop.f32.mrf.mxu3 }
 0x574   : > { %v3268_v37 = vpop.f32.mrf.mxu0 }
 0x575   : > { %v3684_v63 = vpop.f32.mrf.mxu2  ;;  %v3269_v27 = vadd.f32 %v3268_v37, %v7887_v21  ;;  %v5664_v21 = vld [vmem:[%s5949_s17 + $0x48] sm:$0xff] }
 0x576   : > { %v3685_v56 = vadd.f32 %v3684_v63, %v8906_v33  ;;  %v3357_v12 = vpop.f32.mrf.mxu1 }
 0x577   : > { %v8232_v30 = vadd.f32 %v3357_v12, %v3269_v27 }
 0x578   : > { %v8230_v47 = vadd.f32 %v3773_v3, %v3685_v56 }
 0x57a   : > { %v3775_v16 = vpop.f32.mrf.mxu3 }
 0x57c   : > { %v3271_v51 = vpop.f32.mrf.mxu0 }
 0x57d   : > { %v3686_v50 = vpop.f32.mrf.mxu2  ;;  %v3272_v29 = vadd.f32 %v3271_v51, %v7895_v13  ;;  %v8908_v51 = vld [vmem:[#allocation48_spill] sm:$0xff] }
 0x57e   : > { %v3687_v24 = vadd.f32 %v3686_v50, %v7889_v59  ;;  %v3360_v63 = vpop.f32.mrf.mxu1 }
 0x57f   : > { %3826 = vmatmul.bf16.gmra.mxu0 %v8907_v15  ;;  %v8239_v33 = vadd.f32 %v3360_v63, %v3272_v29  ;;  %4093 = vmatmul.bf16.gmra.mxu3 %v8907_v15 }
 0x580   : > { %v8236_v1 = vadd.f32 %v3775_v16, %v3687_v24 }
 0x581   : > { %3915 = vmatmul.bf16.gmra.mxu1 %v5664_v21  ;;  %v8910_v21 = vld [vmem:[#allocation14_spill] sm:$0xff] }
 0x582   : > { %4004 = vmatmul.bf16.gmra.mxu2 %v8795_v14  ;;  %v3778_v56 = vpop.f32.mrf.mxu3 }
 0x584   : > { %v3273_v37 = vpop.f32.mrf.mxu0 }
 0x585   : > { %v3689_v3 = vpop.f32.mrf.mxu2  ;;  %v3274_v13 = vadd.f32 %v3273_v37, %v7899_v2  ;;  %v8912_v2 = vld [vmem:[#allocation15_spill] sm:$0xff] }
 0x586   : > { %v3690_v59 = vadd.f32 %v3689_v3, %v7897_v57  ;;  %v3362_v12 = vpop.f32.mrf.mxu1 }
 0x587   : > { %v8248_v50 = vadd.f32 %v3362_v12, %v3274_v13  ;;  %v8913_v13 = vld [vmem:[#allocation49_spill] sm:$0xff] }
 0x588   : > { %v8246_v27 = vadd.f32 %v3778_v56, %v3690_v59  ;;  %v5665_v56 = vld [vmem:[%s5949_s17 + $0x54] sm:$0xff] }
 0x58a   : > { %v3780_v24 = vpop.f32.mrf.mxu3 }
 0x58c   : > { %v3276_v15 = vpop.f32.mrf.mxu0 }
 0x58d   : > { %v3691_v16 = vpop.f32.mrf.mxu2  ;;  %v3277_v29 = vadd.f32 %v3276_v15, %v8908_v51 }
 0x58e   : > { %v3692_v14 = vadd.f32 %v3691_v16, %v7901_v49  ;;  %v3365_v57 = vpop.f32.mrf.mxu1 }
 0x58f   : > { %3831 = vmatmul.bf16.gmra.mxu0 %v8910_v21  ;;  %v8255_v3 = vadd.f32 %v3365_v57, %v3277_v29  ;;  %4098 = vmatmul.bf16.gmra.mxu3 %v8910_v21  ;;  %v8914_v57 = vld [vmem:[#allocation13_spill] sm:$0xff] }
 0x590   : > { %v8252_v63 = vadd.f32 %v3780_v24, %v3692_v14 }
 0x591   : > { %8911 = vst [vmem:[#allocation71_spill] sm:$0xff] %v8255_v3  ;;  %3920 = vmatmul.bf16.gmra.mxu1 %v5665_v56 }
 0x592   : > { %8909 = vst [vmem:[#allocation70_spill] sm:$0xff] %v8252_v63  ;;  %4009 = vmatmul.bf16.gmra.mxu2 %v8912_v2  ;;  %v3783_v37 = vpop.f32.mrf.mxu3  ;;  %v8915_v63 = vld [vmem:[#allocation16_spill] sm:$0xff] }
 0x594   : > { %v3278_v12 = vpop.f32.mrf.mxu0 }
 0x595   : > { %v3694_v59 = vpop.f32.mrf.mxu2  ;;  %v3279_v16 = vadd.f32 %v3278_v12, %v7935_v23  ;;  %v5666_v23 = vld [vmem:[%s5949_s17 + $0x60] sm:$0xff] }
 0x596   : > { %v3695_v49 = vadd.f32 %v3694_v59, %v8913_v13  ;;  %v3367_v14 = vpop.f32.mrf.mxu1 }
 0x597   : > { %v8264_v15 = vadd.f32 %v3367_v14, %v3279_v16 }
 0x598   : > { %v8262_v24 = vadd.f32 %v3783_v37, %v3695_v49 }
 0x59a   : > { %v3785_v29 = vpop.f32.mrf.mxu3 }
 0x59c   : > { %v3281_v21 = vpop.f32.mrf.mxu0 }
 0x59d   : > { %v3696_v51 = vpop.f32.mrf.mxu2  ;;  %v3282_v56 = vadd.f32 %v3281_v21, %v7943_v10 }
 0x59e   : > { %v3697_v2 = vadd.f32 %v3696_v51, %v8914_v57  ;;  %v3370_v59 = vpop.f32.mrf.mxu1 }
 0x59f   : > { %3836 = vmatmul.bf16.gmra.mxu0 %v8915_v63  ;;  %v8271_v13 = vadd.f32 %v3370_v59, %v3282_v56  ;;  %4103 = vmatmul.bf16.gmra.mxu3 %v8915_v63  ;;  %v8921_v59 = vld [vmem:[#allocation18_spill] sm:$0xff] }
 0x5a0   : > { %v8268_v3 = vadd.f32 %v3785_v29, %v3697_v2 }
 0x5a1   : > { %8916 = vst [vmem:[#allocation27_spill] sm:$0xff] %v8271_v13  ;;  %3925 = vmatmul.bf16.gmra.mxu1 %v5666_v23 }
 0x5a2   : > { %4014 = vmatmul.bf16.gmra.mxu2 %v8755_v53  ;;  %v3788_v49 = vpop.f32.mrf.mxu3  ;;  %v8919_v53 = vld [vmem:[#allocation50_spill] sm:$0xff] }
 0x5a4   : > { %v3283_v16 = vpop.f32.mrf.mxu0 }
 0x5a5   : > { %v3699_v37 = vpop.f32.mrf.mxu2  ;;  %v3284_v10 = vadd.f32 %v3283_v16, %v7947_v9  ;;  %v8923_v9 = vld [vmem:[#allocation51_spill] sm:$0xff] }
 0x5a6   : > { %v3700_v12 = vadd.f32 %v3699_v37, %v7945_v44  ;;  %v3372_v51 = vpop.f32.mrf.mxu1  ;;  %v8922_v44 = vld [vmem:[#allocation19_spill] sm:$0xff] }
 0x5a7   : > { %v8280_v29 = vadd.f32 %v3372_v51, %v3284_v10 }
 0x5a8   : > { %v8278_v14 = vadd.f32 %v3788_v49, %v3700_v12  ;;  %v5667_v49 = vld [vmem:[%s5949_s17 + $0x6c] sm:$0xff] }
 0x5a9   : > { %8918 = vst [vmem:[#allocation28_spill] sm:$0xff] %v8280_v29  ;;  %v8925_v29 = vld [vmem:[#allocation63_spill] sm:$0xff] }
 0x5aa   : > { %8917 = vst [vmem:[#allocation38_spill] sm:$0xff] %v8278_v14  ;;  %v3790_v2 = vpop.f32.mrf.mxu3 }
 0x5ac   : > { %v3802_v63 = vpop.f32.mrf.mxu0 }
 0x5ad   : > { %v3701_v57 = vpop.f32.mrf.mxu2  ;;  %v3803_v10 = vadd.f32 %v3802_v63, %v7972_v5 }
 0x5ae   : > { %v3702_v21 = vadd.f32 %v3701_v57, %v8919_v53  ;;  %v3891_v23 = vpop.f32.mrf.mxu1 }
 0x5af   : > { %3841 = vmatmul.bf16.gmra.mxu0 %v8921_v59  ;;  %4108 = vmatmul.bf16.gmra.mxu3 %v8921_v59  ;;  %v3892_v37 = vadd.f32 %v3891_v23, %v8923_v9 }
 0x5b0   : > { %v8283_v56 = vadd.f32 %v3790_v2, %v3702_v21  ;;  %v8924_v21 = vld [vmem:[#allocation62_spill] sm:$0xff] }
 0x5b1   : > { %3930 = vmatmul.bf16.gmra.mxu1 %v5667_v49 }
 0x5b2   : > { %8920 = vst [vmem:[#allocation29_spill] sm:$0xff] %v8283_v56  ;;  %4019 = vmatmul.bf16.gmra.mxu2 %v8922_v44  ;;  %v4069_v16 = vpop.f32.mrf.mxu3  ;;  %v4149_v56 = vadd.f32 %v3803_v10, %v8924_v21 }
 0x5b4   : > { %v3804_v57 = vpop.f32.mrf.mxu0 }
 0x5b5   : > { %v3980_v12 = vpop.f32.mrf.mxu2  ;;  %v3805_v49 = vadd.f32 %v3804_v57, %v7990_v19 }
 0x5b6   : > { %v3981_v51 = vadd.f32 %v3980_v12, %v3892_v37  ;;  %v3893_v53 = vpop.f32.mrf.mxu1  ;;  %v8926_v37 = vld [vmem:[#allocation20_spill] sm:$0xff] }
 0x5b7   : > { %v3894_v59 = vadd.f32 %v3893_v53, %v7980_v61 }
 0x5b8   : > { %v4070_v2 = vadd.f32 %v4069_v16, %v3981_v51  ;;  %v4151_v16 = vadd.f32 %v3805_v49, %v8924_v21 }
 0x5ba   : > { %v4150_v14 = vadd.f32 %v4070_v2, %v8925_v29  ;;  %v4071_v9 = vpop.f32.mrf.mxu3 }
 0x5bc   : > { %v4213_v44 = vpack.c.bf16 %v4150_v14, %v4149_v56  ;;  %v3807_v5 = vpop.f32.mrf.mxu0  ;;  %v5668_v56 = vld [vmem:[%s5949_s17 + $0x78] sm:$0xff] }
 0x5bd   : > { %v3982_v23 = vpop.f32.mrf.mxu2 }
 0x5be   : > { %5359 = vst [vmem:[%s7116_s29 + $0x10] sm:$0xff] %v4213_v44  ;;  %v3983_v13 = vadd.f32 %v3982_v23, %v3894_v59  ;;  %v3896_v12 = vpop.f32.mrf.mxu1 }
 0x5bf   : > { %3846 = vmatmul.bf16.gmra.mxu0 %v8926_v37  ;;  %4113 = vmatmul.bf16.gmra.mxu3 %v8926_v37  ;;  %v3897_v14 = vadd.f32 %v3896_v12, %v7993_v11 }
 0x5c0   : > { %v4072_v63 = vadd.f32 %v4071_v9, %v3983_v13  ;;  %v3808_v13 = vadd.f32 %v3807_v5, %v8000_v36 }
 0x5c1   : > { %3935 = vmatmul.bf16.gmra.mxu1 %v5668_v56 }
 0x5c2   : > { %v4152_v10 = vadd.f32 %v4072_v63, %v8925_v29  ;;  %4024 = vmatmul.bf16.gmra.mxu2 %v6188_v32  ;;  %v4074_v51 = vpop.f32.mrf.mxu3  ;;  %v4153_v59 = vadd.f32 %v3808_v13, %v8924_v21 }
 0x5c4   : > { %v4214_v61 = vpack.c.bf16 %v4152_v10, %v4151_v16  ;;  %v3809_v2 = vpop.f32.mrf.mxu0 }
 0x5c5   : > { %v3985_v19 = vpop.f32.mrf.mxu2  ;;  %v3810_v63 = vadd.f32 %v3809_v2, %v8006_v26 }
 0x5c6   : > { %5360 = vst [vmem:[%s7116_s29 + $0x18] sm:$0xff] %v4214_v61  ;;  %v3986_v57 = vadd.f32 %v3985_v19, %v3897_v14  ;;  %v3898_v44 = vpop.f32.mrf.mxu1  ;;  %v5669_v14 = vld [vmem:[%s5949_s17 + $0x84] sm:$0xff] }
 0x5c7   : > { %v3899_v9 = vadd.f32 %v3898_v44, %v8002_v43  ;;  %v4155_v16 = vadd.f32 %v3810_v63, %v8924_v21 }
 0x5c8   : > { %v4075_v53 = vadd.f32 %v4074_v51, %v3986_v57 }
 0x5ca   : > { %v4154_v32 = vadd.f32 %v4075_v53, %v8925_v29  ;;  %v4076_v49 = vpop.f32.mrf.mxu3 }
 0x5cc   : > { %v4215_v23 = vpack.c.bf16 %v4154_v32, %v4153_v59  ;;  %v3812_v36 = vpop.f32.mrf.mxu0  ;;  %v8927_v32 = vld [vmem:[#allocation52_spill] sm:$0xff] }
 0x5cd   : > { %v3987_v11 = vpop.f32.mrf.mxu2  ;;  %v3813_v19 = vadd.f32 %v3812_v36, %v8028_v48 }
 0x5ce   : > { %5361 = vst [vmem:[%s7116_s29 + $0x30] sm:$0xff] %v4215_v23  ;;  %v3988_v37 = vadd.f32 %v3987_v11, %v3899_v9  ;;  %v3901_v12 = vpop.f32.mrf.mxu1 }
 0x5cf   : > { %3851 = vmatmul.bf16.gmra.mxu0 %v8762_v7  ;;  %4118 = vmatmul.bf16.gmra.mxu3 %v8762_v7  ;;  %v3902_v61 = vadd.f32 %v3901_v12, %v8009_v4  ;;  %v4157_v53 = vadd.f32 %v3813_v19, %v8924_v21  ;;  %v8930_v12 = vld [vmem:[#allocation53_spill] sm:$0xff] }
 0x5d0   : > { %v4077_v5 = vadd.f32 %v4076_v49, %v3988_v37  ;;  %v8928_v49 = vld [vmem:[#allocation22_spill] sm:$0xff] }
 0x5d1   : > { %3940 = vmatmul.bf16.gmra.mxu1 %v5669_v14  ;;  %v8931_v14 = vld [vmem:[#allocation9_spill] sm:$0xff] }
 0x5d2   : > { %v4156_v10 = vadd.f32 %v4077_v5, %v8925_v29  ;;  %4029 = vmatmul.bf16.gmra.mxu2 %v6206_v8  ;;  %v4079_v56 = vpop.f32.mrf.mxu3  ;;  %v8929_v5 = vld [vmem:[#allocation23_spill] sm:$0xff] }
 0x5d4   : > { %v4216_v43 = vpack.c.bf16 %v4156_v10, %v4155_v16  ;;  %v3814_v13 = vpop.f32.mrf.mxu0  ;;  %v5670_v10 = vld [vmem:[%s5949_s17 + $0x90] sm:$0xff] }
 0x5d5   : > { %v3990_v26 = vpop.f32.mrf.mxu2  ;;  %v3815_v23 = vadd.f32 %v3814_v13, %v8927_v32 }
 0x5d6   : > { %5362 = vst [vmem:[%s7116_s29 + $0x38] sm:$0xff] %v4216_v43  ;;  %v3991_v51 = vadd.f32 %v3990_v26, %v3902_v61  ;;  %v3903_v2 = vpop.f32.mrf.mxu1 }
 0x5d7   : > { %v3904_v44 = vadd.f32 %v3903_v2, %v8036_v25  ;;  %v4159_v37 = vadd.f32 %v3815_v23, %v8924_v21 }
 0x5d8   : > { %v4080_v57 = vadd.f32 %v4079_v56, %v3991_v51 }
 0x5da   : > { %v4158_v8 = vadd.f32 %v4080_v57, %v8925_v29  ;;  %v4081_v59 = vpop.f32.mrf.mxu3 }
 0x5dc   : > { %v4217_v7 = vpack.c.bf16 %v4158_v8, %v4157_v53  ;;  %v3817_v48 = vpop.f32.mrf.mxu0  ;;  %v8932_v8 = vld [vmem:[#allocation54_spill] sm:$0xff] }
 0x5dd   : > { %v3992_v4 = vpop.f32.mrf.mxu2  ;;  %v3818_v26 = vadd.f32 %v3817_v48, %v8931_v14 }
 0x5de   : > { %5363 = vst [vmem:[%s7116_s29 + $0x50] sm:$0xff] %v4217_v7  ;;  %v3993_v9 = vadd.f32 %v3992_v4, %v3904_v44  ;;  %v3906_v63 = vpop.f32.mrf.mxu1 }
 0x5df   : > { %3856 = vmatmul.bf16.gmra.mxu0 %v8928_v49  ;;  %4123 = vmatmul.bf16.gmra.mxu3 %v8928_v49  ;;  %v3907_v16 = vadd.f32 %v3906_v63, %v8930_v12  ;;  %v4161_v57 = vadd.f32 %v3818_v26, %v8924_v21 }
 0x5e0   : > { %v4082_v11 = vadd.f32 %v4081_v59, %v3993_v9  ;;  %v8933_v59 = vld [vmem:[#allocation55_spill] sm:$0xff] }
 0x5e1   : > { %3945 = vmatmul.bf16.gmra.mxu1 %v5670_v10 }
 0x5e2   : > { %v4160_v36 = vadd.f32 %v4082_v11, %v8925_v29  ;;  %4034 = vmatmul.bf16.gmra.mxu2 %v8929_v5  ;;  %v4084_v61 = vpop.f32.mrf.mxu3  ;;  %v8934_v11 = vld [vmem:[#allocation24_spill] sm:$0xff] }
 0x5e4   : > { %v4218_v25 = vpack.c.bf16 %v4160_v36, %v4159_v37  ;;  %v3819_v19 = vpop.f32.mrf.mxu0  ;;  %v8935_v36 = vld [vmem:[#allocation25_spill] sm:$0xff] }
 0x5e5   : > { %v3995_v43 = vpop.f32.mrf.mxu2  ;;  %v3820_v32 = vadd.f32 %v3819_v19, %v8933_v59 }
 0x5e6   : > { %5364 = vst [vmem:[%s7116_s29 + $0x58] sm:$0xff] %v4218_v25  ;;  %v3996_v56 = vadd.f32 %v3995_v43, %v3907_v16  ;;  %v3908_v13 = vpop.f32.mrf.mxu1  ;;  %v8936_v25 = vld [vmem:[#allocation56_spill] sm:$0xff]  ;;  %v5671_v16 = vld [vmem:[%s5949_s17 + $0x9c] sm:$0xff] }
 0x5e7   : > { %v3909_v7 = vadd.f32 %v3908_v13, %v8932_v8  ;;  %v4163_v63 = vadd.f32 %v3820_v32, %v8924_v21 }
 0x5e8   : > { %v4085_v51 = vadd.f32 %v4084_v61, %v3996_v56  ;;  %v8937_v61 = vld [vmem:[#allocation57_spill] sm:$0xff] }
 0x5ea   : > { %v4162_v2 = vadd.f32 %v4085_v51, %v8925_v29  ;;  %v4086_v4 = vpop.f32.mrf.mxu3 }
 0x5ec   : > { %v4219_v53 = vpack.c.bf16 %v4162_v2, %v4161_v57  ;;  %v3822_v9 = vpop.f32.mrf.mxu0 }
 0x5ed   : > { %v3997_v44 = vpop.f32.mrf.mxu2  ;;  %v3823_v14 = vadd.f32 %v3822_v9, %v8937_v61 }
 0x5ee   : > { %5365 = vst [vmem:[%s7116_s29 + $0x70] sm:$0xff] %v4219_v53  ;;  %v3998_v23 = vadd.f32 %v3997_v44, %v3909_v7  ;;  %v3911_v49 = vpop.f32.mrf.mxu1  ;;  %v8938_v53 = vld [vmem:[#allocation58_spill] sm:$0xff] }
 0x5ef   : > { %3861 = vmatmul.bf16.gmra.mxu0 %v8934_v11  ;;  %4128 = vmatmul.bf16.gmra.mxu3 %v8934_v11  ;;  %v3912_v12 = vadd.f32 %v3911_v49, %v8936_v25  ;;  %v4165_v13 = vadd.f32 %v3823_v14, %v8924_v21 }
 0x5f0   : > { %v4087_v48 = vadd.f32 %v4086_v4, %v3998_v23  ;;  %v8939_v4 = vld [vmem:[#allocation60_spill] sm:$0xff] }
 0x5f1   : > { %3950 = vmatmul.bf16.gmra.mxu1 %v5671_v16 }
 0x5f2   : > { %v4164_v37 = vadd.f32 %v4087_v48, %v8925_v29  ;;  %4039 = vmatmul.bf16.gmra.mxu2 %v8935_v36  ;;  %v4089_v43 = vpop.f32.mrf.mxu3  ;;  %v8940_v48 = vld [vmem:[#allocation30_spill] sm:$0xff] }
 0x5f4   : > { %v4220_v5 = vpack.c.bf16 %v4164_v37, %v4163_v63  ;;  %v3824_v56 = vpop.f32.mrf.mxu0  ;;  %v8941_v37 = vld [vmem:[#allocation31_spill] sm:$0xff] }
 0x5f5   : > { %v4000_v10 = vpop.f32.mrf.mxu2  ;;  %v3825_v59 = vadd.f32 %v3824_v56, %v8939_v4  ;;  %v8944_v4 = vld [vmem:[#allocation37_spill] sm:$0xff] }
 0x5f6   : > { %5366 = vst [vmem:[%s7116_s29 + $0x78] sm:$0xff] %v4220_v5  ;;  %v4001_v26 = vadd.f32 %v4000_v10, %v3912_v12  ;;  %v3913_v51 = vpop.f32.mrf.mxu1  ;;  %v8942_v5 = vld [vmem:[#allocation59_spill] sm:$0xff]  ;;  %v8943_v12 = vld [vmem:[#allocation61_spill] sm:$0xff] }
 0x5f7   : > { %v3914_v8 = vadd.f32 %v3913_v51, %v8938_v53  ;;  %v4167_v49 = vadd.f32 %v3825_v59, %v8924_v21 }
 0x5f8   : > { %v4090_v19 = vadd.f32 %v4089_v43, %v4001_v26 }
 0x5fa   : > { %v4166_v57 = vadd.f32 %v4090_v19, %v8925_v29  ;;  %v4091_v44 = vpop.f32.mrf.mxu3 }
 0x5fc   : > { %v4221_v2 = vpack.c.bf16 %v4166_v57, %v4165_v13  ;;  %v3827_v23 = vpop.f32.mrf.mxu0 }
 0x5fd   : > { %v4002_v7 = vpop.f32.mrf.mxu2  ;;  %v3828_v43 = vadd.f32 %v3827_v23, %v8115_v40 }
 0x5fe   : > { %5367 = vst [vmem:[%s7116_s29 + $0x90] sm:$0xff] %v4221_v2  ;;  %v4003_v32 = vadd.f32 %v4002_v7, %v3914_v8  ;;  %v3916_v11 = vpop.f32.mrf.mxu1 }
 0x5ff   : > { %3866 = vmatmul.bf16.gmra.mxu0 %v8940_v48  ;;  %4133 = vmatmul.bf16.gmra.mxu3 %v8940_v48  ;;  %v3917_v25 = vadd.f32 %v3916_v11, %v8942_v5  ;;  %v4169_v19 = vadd.f32 %v3828_v43, %v8924_v21  ;;  %v8946_v11 = vld [vmem:[#allocation64_spill] sm:$0xff] }
 0x600   : > { %v4092_v9 = vadd.f32 %v4091_v44, %v4003_v32 }
 0x601   : > { %3955 = vmatmul.bf16.gmra.mxu1 %v8943_v12 }
 0x602   : > { %v4168_v63 = vadd.f32 %v4092_v9, %v8925_v29  ;;  %4044 = vmatmul.bf16.gmra.mxu2 %v8941_v37  ;;  %v4094_v10 = vpop.f32.mrf.mxu3  ;;  %v8945_v9 = vld [vmem:[#allocation65_spill] sm:$0xff] }
 0x604   : > { %v4222_v36 = vpack.c.bf16 %v4168_v63, %v4167_v49  ;;  %v3829_v14 = vpop.f32.mrf.mxu0 }
 0x605   : > { %v4005_v16 = vpop.f32.mrf.mxu2  ;;  %v3830_v8 = vadd.f32 %v3829_v14, %v8121_v46 }
 0x606   : > { %5368 = vst [vmem:[%s7116_s29 + $0x98] sm:$0xff] %v4222_v36  ;;  %v4006_v61 = vadd.f32 %v4005_v16, %v3917_v25  ;;  %v3918_v56 = vpop.f32.mrf.mxu1 }
 0x607   : > { %v3919_v57 = vadd.f32 %v3918_v56, %v8117_v17  ;;  %v4171_v32 = vadd.f32 %v3830_v8, %v8924_v21 }
 0x608   : > { %v4095_v26 = vadd.f32 %v4094_v10, %v4006_v61 }
 0x60a   : > { %v4170_v51 = vadd.f32 %v4095_v26, %v8925_v29  ;;  %v4096_v53 = vpop.f32.mrf.mxu3 }
 0x60c   : > { %v4223_v13 = vpack.c.bf16 %v4170_v51, %v4169_v19  ;;  %v3832_v44 = vpop.f32.mrf.mxu0  ;;  %v8947_v19 = vld [vmem:[#allocation41_spill] sm:$0xff] }
 0x60d   : > { %v4007_v2 = vpop.f32.mrf.mxu2  ;;  %v3833_v63 = vadd.f32 %v3832_v44, %v8134_v58 }
 0x60e   : > { %5369 = vst [vmem:[%s7116_s29 + $0xb0] sm:$0xff] %v4223_v13  ;;  %v4008_v7 = vadd.f32 %v4007_v2, %v3919_v57  ;;  %v3921_v59 = vpop.f32.mrf.mxu1 }
 0x60f   : > { %3871 = vmatmul.bf16.gmra.mxu0 %v8944_v4  ;;  %4138 = vmatmul.bf16.gmra.mxu3 %v8944_v4  ;;  %v3922_v48 = vadd.f32 %v3921_v59, %v8945_v9  ;;  %v4173_v12 = vadd.f32 %v3833_v63, %v8924_v21 }
 0x610   : > { %v4097_v40 = vadd.f32 %v4096_v53, %v4008_v7  ;;  %v5672_v53 = vld [vmem:[%s5949_s17 + $0xc0] sm:$0xff] }
 0x611   : > { %3960 = vmatmul.bf16.gmra.mxu1 %v8946_v11 }
 0x612   : > { %v4172_v23 = vadd.f32 %v4097_v40, %v8925_v29  ;;  %4049 = vmatmul.bf16.gmra.mxu2 %v8868_v62  ;;  %v4099_v49 = vpop.f32.mrf.mxu3 }
 0x614   : > { %v4224_v17 = vpack.c.bf16 %v4172_v23, %v4171_v32  ;;  %v3834_v36 = vpop.f32.mrf.mxu0 }
 0x615   : > { %v4010_v46 = vpop.f32.mrf.mxu2  ;;  %v3835_v14 = vadd.f32 %v3834_v36, %v8140_v54 }
 0x616   : > { %5370 = vst [vmem:[%s7116_s29 + $0xb8] sm:$0xff] %v4224_v17  ;;  %v4011_v37 = vadd.f32 %v4010_v46, %v3922_v48  ;;  %v3923_v25 = vpop.f32.mrf.mxu1 }
 0x617   : > { %v3924_v10 = vadd.f32 %v3923_v25, %v8136_v35  ;;  %v4175_v13 = vadd.f32 %v3835_v14, %v8924_v21 }
 0x618   : > { %v4100_v5 = vadd.f32 %v4099_v49, %v4011_v37 }
 0x61a   : > { %v4174_v62 = vadd.f32 %v4100_v5, %v8925_v29  ;;  %v4101_v61 = vpop.f32.mrf.mxu3  ;;  %v8948_v5 = vld [vmem:[#allocation66_spill] sm:$0xff] }
 0x61c   : > { %v4225_v16 = vpack.c.bf16 %v4174_v62, %v4173_v12  ;;  %v3837_v58 = vpop.f32.mrf.mxu0 }
 0x61d   : > { %v4012_v43 = vpop.f32.mrf.mxu2  ;;  %v3838_v7 = vadd.f32 %v3837_v58, %v8150_v52 }
 0x61e   : > { %5371 = vst [vmem:[%s7116_s29 + $0xd0] sm:$0xff] %v4225_v16  ;;  %v4013_v26 = vadd.f32 %v4012_v43, %v3924_v10  ;;  %v3926_v51 = vpop.f32.mrf.mxu1 }
 0x61f   : > { %3876 = vmatmul.bf16.gmra.mxu0 %v8947_v19  ;;  %4143 = vmatmul.bf16.gmra.mxu3 %v8947_v19  ;;  %v3927_v2 = vadd.f32 %v3926_v51, %v8143_v55  ;;  %v4177_v32 = vadd.f32 %v3838_v7, %v8924_v21  ;;  %v8949_v51 = vld [vmem:[#allocation21_spill] sm:$0xff]  ;;  %v8950_v7 = vld [vmem:[#allocation67_spill] sm:$0xff] }
 0x620   : > { %v4102_v56 = vadd.f32 %v4101_v61, %v4013_v26 }
 0x621   : > { %3965 = vmatmul.bf16.gmra.mxu1 %v5672_v53 }
 0x622   : > { %v4176_v57 = vadd.f32 %v4102_v56, %v8925_v29  ;;  %4054 = vmatmul.bf16.gmra.mxu2 %v8876_v0  ;;  %v4104_v8 = vpop.f32.mrf.mxu3 }
 0x624   : > { %v4226_v35 = vpack.c.bf16 %v4176_v57, %v4175_v13  ;;  %v3839_v40 = vpop.f32.mrf.mxu0 }
 0x625   : > { %v4015_v54 = vpop.f32.mrf.mxu2  ;;  %v3840_v48 = vadd.f32 %v3839_v40, %v8156_v28 }
 0x626   : > { %5372 = vst [vmem:[%s7116_s29 + $0xd8] sm:$0xff] %v4226_v35  ;;  %v4016_v44 = vadd.f32 %v4015_v54, %v3927_v2  ;;  %v3928_v59 = vpop.f32.mrf.mxu1 }
 0x627   : > { %v3929_v55 = vadd.f32 %v3928_v59, %v8152_v45  ;;  %v4179_v63 = vadd.f32 %v3840_v48, %v8924_v21 }
 0x628   : > { %v4105_v4 = vadd.f32 %v4104_v8, %v4016_v44 }
 0x62a   : > { %v4178_v0 = vadd.f32 %v4105_v4, %v8925_v29  ;;  %v4106_v9 = vpop.f32.mrf.mxu3 }
 0x62c   : > { %v4227_v23 = vpack.c.bf16 %v4178_v0, %v4177_v32  ;;  %v3842_v46 = vpop.f32.mrf.mxu0 }
 0x62d   : > { %v4017_v17 = vpop.f32.mrf.mxu2  ;;  %v3843_v45 = vadd.f32 %v3842_v46, %v8166_v31 }
 0x62e   : > { %5373 = vst [vmem:[%s7116_s29 + $0xf0] sm:$0xff] %v4227_v23  ;;  %v4018_v11 = vadd.f32 %v4017_v17, %v3929_v55  ;;  %v3931_v49 = vpop.f32.mrf.mxu1 }
 0x62f   : > { %v3932_v25 = vadd.f32 %v3931_v49, %v8948_v5  ;;  %v4181_v61 = vadd.f32 %v3843_v45, %v8924_v21 }
 0x630   : > { %v4107_v52 = vadd.f32 %v4106_v9, %v4018_v11 }
 0x632   : > { %v4180_v37 = vadd.f32 %v4107_v52, %v8925_v29  ;;  %v4109_v62 = vpop.f32.mrf.mxu3 }
 0x634   : > { %v4228_v36 = vpack.c.bf16 %v4180_v37, %v4179_v63  ;;  %v3844_v10 = vpop.f32.mrf.mxu0 }
 0x635   : > { %v4020_v12 = vpop.f32.mrf.mxu2  ;;  %v3845_v13 = vadd.f32 %v3844_v10, %v8949_v51 }
 0x636   : > { %5374 = vst [vmem:[%s7116_s29 + $0xf8] sm:$0xff] %v4228_v36  ;;  %v4021_v16 = vadd.f32 %v4020_v12, %v3932_v25  ;;  %v3933_v43 = vpop.f32.mrf.mxu1  ;;  %v8951_v12 = vld [vmem:[#allocation68_spill] sm:$0xff] }
 0x637   : > { %v3934_v58 = vadd.f32 %v3933_v43, %v8168_v41  ;;  %v4183_v53 = vadd.f32 %v3845_v13, %v8924_v21 }
 0x638   : > { %v4110_v28 = vadd.f32 %v4109_v62, %v4021_v16 }
 0x63a   : > { %v4182_v14 = vadd.f32 %v4110_v28, %v8925_v29  ;;  %v4111_v19 = vpop.f32.mrf.mxu3 }
 0x63c   : > { %v4229_v26 = vpack.c.bf16 %v4182_v14, %v4181_v61  ;;  %v3847_v35 = vpop.f32.mrf.mxu0 }
 0x63d   : > { %v4022_v56 = vpop.f32.mrf.mxu2  ;;  %v3848_v41 = vadd.f32 %v3847_v35, %v8182_v6 }
 0x63e   : > { %5375 = vst [vmem:[%s7116_s29 + $0x110] sm:$0xff] %v4229_v26  ;;  %v4023_v57 = vadd.f32 %v4022_v56, %v3934_v58  ;;  %v3936_v2 = vpop.f32.mrf.mxu1 }
 0x63f   : > { %v3937_v44 = vadd.f32 %v3936_v2, %v8950_v7  ;;  %v4185_v55 = vadd.f32 %v3848_v41, %v8924_v21 }
 0x640   : > { %v4112_v31 = vadd.f32 %v4111_v19, %v4023_v57 }
 0x642   : > { %v4184_v54 = vadd.f32 %v4112_v31, %v8925_v29  ;;  %v4114_v4 = vpop.f32.mrf.mxu3 }
 0x644   : > { %v4230_v8 = vpack.c.bf16 %v4184_v54, %v4183_v53  ;;  %v3849_v32 = vpop.f32.mrf.mxu0  ;;  %v8952_v54 = vld [vmem:[#allocation17_spill] sm:$0xff] }
 0x645   : > { %v4025_v40 = vpop.f32.mrf.mxu2  ;;  %v3850_v52 = vadd.f32 %v3849_v32, %v8188_v38 }
 0x646   : > { %5376 = vst [vmem:[%s7116_s29 + $0x118] sm:$0xff] %v4230_v8  ;;  %v4026_v59 = vadd.f32 %v4025_v40, %v3937_v44  ;;  %v3938_v23 = vpop.f32.mrf.mxu1 }
 0x647   : > { %v3939_v48 = vadd.f32 %v3938_v23, %v8184_v18  ;;  %v4187_v36 = vadd.f32 %v3850_v52, %v8924_v21 }
 0x648   : > { %v4115_v0 = vadd.f32 %v4114_v4, %v4026_v59 }
 0x64a   : > { %v4186_v17 = vadd.f32 %v4115_v0, %v8925_v29  ;;  %v4116_v46 = vpop.f32.mrf.mxu3 }
 0x64c   : > { %v4231_v9 = vpack.c.bf16 %v4186_v17, %v4185_v55  ;;  %v3852_v63 = vpop.f32.mrf.mxu0 }
 0x64d   : > { %v4027_v11 = vpop.f32.mrf.mxu2  ;;  %v3853_v18 = vadd.f32 %v3852_v63, %v8198_v60 }
 0x64e   : > { %5377 = vst [vmem:[%s7116_s29 + $0x130] sm:$0xff] %v4231_v9  ;;  %v4028_v49 = vadd.f32 %v4027_v11, %v3939_v48  ;;  %v3941_v37 = vpop.f32.mrf.mxu1 }
 0x64f   : > { %v3942_v62 = vadd.f32 %v3941_v37, %v8951_v12  ;;  %v4189_v61 = vadd.f32 %v3853_v18, %v8924_v21 }
 0x650   : > { %v4117_v6 = vadd.f32 %v4116_v46, %v4028_v49 }
 0x652   : > { %v4188_v5 = vadd.f32 %v4117_v6, %v8925_v29  ;;  %v4119_v16 = vpop.f32.mrf.mxu3  ;;  %v8953_v6 = vld [vmem:[#allocation69_spill] sm:$0xff] }
 0x654   : > { %v4232_v25 = vpack.c.bf16 %v4188_v5, %v4187_v36  ;;  %v3854_v28 = vpop.f32.mrf.mxu0 }
 0x655   : > { %v4030_v45 = vpop.f32.mrf.mxu2  ;;  %v3855_v51 = vadd.f32 %v3854_v28, %v8204_v39 }
 0x656   : > { %5378 = vst [vmem:[%s7116_s29 + $0x138] sm:$0xff] %v4232_v25  ;;  %v4031_v10 = vadd.f32 %v4030_v45, %v3942_v62  ;;  %v3943_v43 = vpop.f32.mrf.mxu1 }
 0x657   : > { %v3944_v58 = vadd.f32 %v3943_v43, %v8200_v42  ;;  %v4191_v31 = vadd.f32 %v3855_v51, %v8924_v21 }
 0x658   : > { %v4120_v38 = vadd.f32 %v4119_v16, %v4031_v10 }
 0x65a   : > { %v4190_v14 = vadd.f32 %v4120_v38, %v8925_v29  ;;  %v4121_v19 = vpop.f32.mrf.mxu3 }
 0x65c   : > { %v4233_v26 = vpack.c.bf16 %v4190_v14, %v4189_v61  ;;  %v3857_v57 = vpop.f32.mrf.mxu0 }
 0x65d   : > { %v4032_v56 = vpop.f32.mrf.mxu2  ;;  %v3858_v42 = vadd.f32 %v3857_v57, %v8214_v20 }
 0x65e   : > { %5379 = vst [vmem:[%s7116_s29 + $0x150] sm:$0xff] %v4233_v26  ;;  %v4033_v13 = vadd.f32 %v4032_v56, %v3944_v58  ;;  %v3946_v35 = vpop.f32.mrf.mxu1 }
 0x65f   : > { %v3947_v8 = vadd.f32 %v3946_v35, %v8952_v54  ;;  %v4193_v59 = vadd.f32 %v3858_v42, %v8924_v21 }
 0x660   : > { %v4122_v60 = vadd.f32 %v4121_v19, %v4033_v13 }
 0x662   : > { %v4192_v2 = vadd.f32 %v4122_v60, %v8925_v29  ;;  %v4124_v44 = vpop.f32.mrf.mxu3 }
 0x664   : > { %v4234_v53 = vpack.c.bf16 %v4192_v2, %v4191_v31  ;;  %v3859_v4 = vpop.f32.mrf.mxu0 }
 0x665   : > { %v4035_v7 = vpop.f32.mrf.mxu2  ;;  %v3860_v9 = vadd.f32 %v3859_v4, %v8220_v34 }
 0x666   : > { %5380 = vst [vmem:[%s7116_s29 + $0x158] sm:$0xff] %v4234_v53  ;;  %v4036_v40 = vadd.f32 %v4035_v7, %v3947_v8  ;;  %v3948_v41 = vpop.f32.mrf.mxu1 }
 0x667   : > { %v3949_v23 = vadd.f32 %v3948_v41, %v8216_v22  ;;  %v4195_v52 = vadd.f32 %v3860_v9, %v8924_v21 }
 0x668   : > { %v4125_v39 = vadd.f32 %v4124_v44, %v4036_v40 }
 0x66a   : > { %v4194_v32 = vadd.f32 %v4125_v39, %v8925_v29  ;;  %v4126_v17 = vpop.f32.mrf.mxu3 }
 0x66c   : > { %v4235_v0 = vpack.c.bf16 %v4194_v32, %v4193_v59  ;;  %v3862_v11 = vpop.f32.mrf.mxu0 }
 0x66d   : > { %v4037_v55 = vpop.f32.mrf.mxu2  ;;  %v3863_v22 = vadd.f32 %v3862_v11, %v8230_v47 }
 0x66e   : > { %5381 = vst [vmem:[%s7116_s29 + $0x170] sm:$0xff] %v4235_v0  ;;  %v4038_v48 = vadd.f32 %v4037_v55, %v3949_v23  ;;  %v3951_v46 = vpop.f32.mrf.mxu1  ;;  %v8955_v0 = vld [vmem:[#allocation71_spill] sm:$0xff] }
 0x66f   : > { %v3952_v37 = vadd.f32 %v3951_v46, %v8953_v6  ;;  %v4197_v45 = vadd.f32 %v3863_v22, %v8924_v21 }
 0x670   : > { %v4127_v20 = vadd.f32 %v4126_v17, %v4038_v48 }
 0x672   : > { %v4196_v49 = vadd.f32 %v4127_v20, %v8925_v29  ;;  %v4129_v5 = vpop.f32.mrf.mxu3 }
 0x674   : > { %v4236_v63 = vpack.c.bf16 %v4196_v49, %v4195_v52  ;;  %v3864_v12 = vpop.f32.mrf.mxu0 }
 0x675   : > { %v4040_v36 = vpop.f32.mrf.mxu2  ;;  %v3865_v43 = vadd.f32 %v3864_v12, %v8236_v1 }
 0x676   : > { %5382 = vst [vmem:[%s7116_s29 + $0x178] sm:$0xff] %v4236_v63  ;;  %v4041_v25 = vadd.f32 %v4040_v36, %v3952_v37  ;;  %v3953_v62 = vpop.f32.mrf.mxu1 }
 0x677   : > { %v3954_v10 = vadd.f32 %v3953_v62, %v8232_v30  ;;  %v4199_v58 = vadd.f32 %v3865_v43, %v8924_v21 }
 0x678   : > { %v4130_v34 = vadd.f32 %v4129_v5, %v4041_v25 }
 0x67a   : > { %v4198_v16 = vadd.f32 %v4130_v34, %v8925_v29  ;;  %v4131_v38 = vpop.f32.mrf.mxu3 }
 0x67c   : > { %v4237_v18 = vpack.c.bf16 %v4198_v16, %v4197_v45  ;;  %v3867_v14 = vpop.f32.mrf.mxu0  ;;  %v8956_v45 = vld [vmem:[#allocation27_spill] sm:$0xff] }
 0x67d   : > { %v4042_v28 = vpop.f32.mrf.mxu2  ;;  %v3868_v30 = vadd.f32 %v3867_v14, %v8246_v27 }
 0x67e   : > { %5383 = vst [vmem:[%s7116_s29 + $0x190] sm:$0xff] %v4237_v18  ;;  %v4043_v61 = vadd.f32 %v4042_v28, %v3954_v10  ;;  %v3956_v26 = vpop.f32.mrf.mxu1 }
 0x67f   : > { %v3957_v51 = vadd.f32 %v3956_v26, %v8239_v33  ;;  %v4201_v2 = vadd.f32 %v3868_v30, %v8924_v21  ;;  %v8954_v33 = vld [vmem:[#allocation70_spill] sm:$0xff] }
 0x680   : > { %v4132_v47 = vadd.f32 %v4131_v38, %v4043_v61 }
 0x682   : > { %v4200_v56 = vadd.f32 %v4132_v47, %v8925_v29  ;;  %v4134_v57 = vpop.f32.mrf.mxu3 }
 0x684   : > { %v4238_v19 = vpack.c.bf16 %v4200_v56, %v4199_v58  ;;  %v3869_v35 = vpop.f32.mrf.mxu0  ;;  %v8958_v58 = vld [vmem:[#allocation28_spill] sm:$0xff] }
 0x685   : > { %v4045_v13 = vpop.f32.mrf.mxu2  ;;  %v3870_v42 = vadd.f32 %v3869_v35, %v8954_v33 }
 0x686   : > { %5384 = vst [vmem:[%s7116_s29 + $0x198] sm:$0xff] %v4238_v19  ;;  %v4046_v60 = vadd.f32 %v4045_v13, %v3957_v51  ;;  %v3958_v31 = vpop.f32.mrf.mxu1  ;;  %v8959_v51 = vld [vmem:[#allocation29_spill] sm:$0xff] }
 0x687   : > { %v3959_v8 = vadd.f32 %v3958_v31, %v8248_v50  ;;  %v4203_v41 = vadd.f32 %v3870_v42, %v8924_v21 }
 0x688   : > { %v4135_v1 = vadd.f32 %v4134_v57, %v4046_v60 }
 0x68a   : > { %v4202_v53 = vadd.f32 %v4135_v1, %v8925_v29  ;;  %v4136_v44 = vpop.f32.mrf.mxu3 }
 0x68c   : > { %v4239_v54 = vpack.c.bf16 %v4202_v53, %v4201_v2  ;;  %v3872_v4 = vpop.f32.mrf.mxu0 }
 0x68d   : > { %v4047_v7 = vpop.f32.mrf.mxu2  ;;  %v3873_v50 = vadd.f32 %v3872_v4, %v8262_v24 }
 0x68e   : > { %5385 = vst [vmem:[%s7116_s29 + $0x1b0] sm:$0xff] %v4239_v54  ;;  %v4048_v40 = vadd.f32 %v4047_v7, %v3959_v8  ;;  %v3961_v39 = vpop.f32.mrf.mxu1 }
 0x68f   : > { %v3962_v23 = vadd.f32 %v3961_v39, %v8955_v0  ;;  %v4205_v46 = vadd.f32 %v3873_v50, %v8924_v21 }
 0x690   : > { %v4137_v27 = vadd.f32 %v4136_v44, %v4048_v40 }
 0x692   : > { %v4204_v59 = vadd.f32 %v4137_v27, %v8925_v29  ;;  %v4139_v17 = vpop.f32.mrf.mxu3 }
 0x694   : > { %v4240_v32 = vpack.c.bf16 %v4204_v59, %v4203_v41  ;;  %v3874_v48 = vpop.f32.mrf.mxu0 }
 0x695   : > { %v4050_v55 = vpop.f32.mrf.mxu2  ;;  %v3875_v36 = vadd.f32 %v3874_v48, %v8268_v3 }
 0x696   : > { %5386 = vst [vmem:[%s7116_s29 + $0x1b8] sm:$0xff] %v4240_v32  ;;  %v4051_v9 = vadd.f32 %v4050_v55, %v3962_v23  ;;  %v3963_v20 = vpop.f32.mrf.mxu1 }
 0x697   : > { %v3964_v63 = vadd.f32 %v3963_v20, %v8264_v15  ;;  %v4207_v12 = vadd.f32 %v3875_v36, %v8924_v21  ;;  %v8957_v15 = vld [vmem:[#allocation38_spill] sm:$0xff] }
 0x698   : > { %v4140_v11 = vadd.f32 %v4139_v17, %v4051_v9 }
 0x69a   : > { %v4206_v52 = vadd.f32 %v4140_v11, %v8925_v29  ;;  %v4141_v37 = vpop.f32.mrf.mxu3 }
 0x69c   : > { %v4241_v49 = vpack.c.bf16 %v4206_v52, %v4205_v46  ;;  %v3877_v24 = vpop.f32.mrf.mxu0 }
 0x69d   : > { %v4052_v6 = vpop.f32.mrf.mxu2  ;;  %v3878_v28 = vadd.f32 %v3877_v24, %v8957_v15 }
 0x69e   : > { %5387 = vst [vmem:[%s7116_s29 + $0x1d0] sm:$0xff] %v4241_v49  ;;  %v4053_v5 = vadd.f32 %v4052_v6, %v3964_v63  ;;  %v3966_v25 = vpop.f32.mrf.mxu1 }
 0x69f   : > { %v3967_v16 = vadd.f32 %v3966_v25, %v8956_v45  ;;  %v4209_v61 = vadd.f32 %v3878_v28, %v8924_v21 }
 0x6a0   : > { %v4142_v22 = vadd.f32 %v4141_v37, %v4053_v5 }
 0x6a2   : > { %v4208_v34 = vadd.f32 %v4142_v22, %v8925_v29  ;;  %v4144_v10 = vpop.f32.mrf.mxu3 }
 0x6a4   : > { %v4242_v62 = vpack.c.bf16 %v4208_v34, %v4207_v12  ;;  %v3879_v47 = vpop.f32.mrf.mxu0 }
 0x6a5   : > { %v4055_v18 = vpop.f32.mrf.mxu2  ;;  %v3880_v13 = vadd.f32 %v3879_v47, %v8959_v51 }
 0x6a6   : > { %5388 = vst [vmem:[%s7116_s29 + $0x1d8] sm:$0xff] %v4242_v62  ;;  %v4056_v38 = vadd.f32 %v4055_v18, %v3967_v16  ;;  %v3968_v3 = vpop.f32.mrf.mxu1 }
 0x6a7   : > { %v3969_v56 = vadd.f32 %v3968_v3, %v8958_v58  ;;  %v4211_v35 = vadd.f32 %v3880_v13, %v8924_v21 }
 0x6a8   : > { %v4145_v43 = vadd.f32 %v4144_v10, %v4056_v38 }
 0x6aa   : > { %v4210_v14 = vadd.f32 %v4145_v43, %v8925_v29  ;;  %v4146_v30 = vpop.f32.mrf.mxu3 }
 0x6ac   : > { %v4243_v26 = vpack.c.bf16 %v4210_v14, %v4209_v61 }
 0x6ad   : > { %v4057_v19 = vpop.f32.mrf.mxu2 }
 0x6ae   : > { %5389 = vst [vmem:[%s7116_s29 + $0x1f0] sm:$0xff] %v4243_v26  ;;  %v4058_v57 = vadd.f32 %v4057_v19, %v3969_v56 }
 0x6b0   : > { %v4147_v60 = vadd.f32 %v4146_v30, %v4058_v57 }
 0x6b2   : > { %v4212_v1 = vadd.f32 %v4147_v60, %v8925_v29 }
 0x6b4   : > { %v4244_v31 = vpack.c.bf16 %v4212_v1, %v4211_v35 }
 0x6b6   : > { %5390 = vst [vmem:[%s7116_s29 + $0x1f8] sm:$0xff] %v4244_v31 }
 0x6b7 PF: > { %s13_s14 = sadd.s32 1, %s5695_s14   ;;  %s8960_s12 = smov %s5691_s13 }
 0x6b8   : > { %p10_p5 = scmp.ge.s32.totalorder %s13_s14, 4   ;;  %s8961_s13 = smov %s8963_s15 }
 0x6ba   :  { %12 = sbr.rel (!%p10_p5) target bundleno = 2 (0x2), region = 67 }

</bundles_post_ra>
